<compile_context>
chip_gen: v7x
topology: tpu7x:2x2x1
jax: 0.10.0
libtpu: 0.0.40
codegen_flags: <defaults>
</compile_context>

<pallas_src>
import math

import jax
import jax.numpy as jnp
from jax import lax
from jax.experimental import pallas as pl
from jax.experimental.pallas import tpu as pltpu


# --------------------------------------------------------------------------- #
# Fused Bottleneck kernel
# --------------------------------------------------------------------------- #

def _make_bottleneck_kernel(n, h, w, stride, has_down):
    """Builds the fused kernel for fixed static shapes.

    Ref order: x, w1, b1, w2, b2, w3, b3, [wd, bd], out, pad_scratch.
      x   : (N*H*W, Cin)     bf16   (stride==2: rows pre-ordered (ph,pw,n,i,j))
      w1  : (Cin, P) bf16    b1: (1, P)  f32      (BN1 folded)
      w2  : (9, P, P) bf16   b2: (1, P)  f32      (BN2 folded, tap = dy*3+dx)
      w3  : (P, 4P) bf16     b3: (1, 4P) f32      (BN3 folded)
      wd  : (Cin, 4P) bf16   bd: (1, 4P) f32      (downsample, BN folded)
      out : (N*Ho*Wo, 4P) f32
    """
    ho = -(-h // stride)
    wo = -(-w // stride)
    mo = n * ho * wo

    def kernel(*refs):
        if has_down:
            (x_ref, w1_ref, b1_ref, w2_ref, b2_ref, w3_ref, b3_ref,
             wd_ref, bd_ref, o_ref, pad_ref) = refs
        else:
            (x_ref, w1_ref, b1_ref, w2_ref, b2_ref, w3_ref, b3_ref,
             o_ref, pad_ref) = refs

        p = w1_ref.shape[1]
        x = x_ref[...]                                           # (Mi, Cin) bf16

        # ---- conv1 (1x1) + BN1 + ReLU6 ------------------------------------ #
        t1 = jnp.dot(x, w1_ref[...], preferred_element_type=jnp.float32)
        t1 = jnp.clip(t1 + b1_ref[...], 0.0, 6.0).astype(jnp.bfloat16)

        # ---- stage t1 into a zero-padded VMEM scratch (SAME padding) ------ #
        pad_ref[...] = jnp.zeros_like(pad_ref)
        if stride == 1:
            # pad_ref: (n, h+2, w+2, p); 1-ring of zeros = symmetric SAME pad.
            pad_ref[:, 1:h + 1, 1:w + 1, :] = t1.reshape(n, h, w, p)
        else:
            # Rows are ordered (ph, pw, n, i, j); slab (ph,pw) is contiguous.
            # pad_ref: (4n, ho+1, wo+1, p); extra zero row/col = bottom/right
            # SAME pad of a stride-2 / even-extent Conv2dSame.
            pad_ref[:, 0:ho, 0:wo, :] = t1.reshape(4 * n, ho, wo, p)

        # ---- conv2 (3x3 Conv2dSame, stride) + BN2 + ReLU6 ----------------- #
        acc = None
        for dy in range(3):
            for dx in range(3):
                if stride == 1:
                    tap = pad_ref[:, dy:dy + ho, dx:dx + wo, :]
                else:
                    base = ((dy % 2) * 2 + (dx % 2)) * n         # parity slab
                    sh, sw = dy // 2, dx // 2                    # +1 output shift
                    tap = pad_ref[base:base + n, sh:sh + ho, sw:sw + wo, :]
                tap = tap.reshape(mo, p)
                d = jnp.dot(tap, w2_ref[dy * 3 + dx],
                            preferred_element_type=jnp.float32)
                acc = d if acc is None else acc + d
        t2 = jnp.clip(acc + b2_ref[...], 0.0, 6.0).astype(jnp.bfloat16)

        # ---- conv3 (1x1) + BN3 --------------------------------------------- #
        out = jnp.dot(t2, w3_ref[...], preferred_element_type=jnp.float32)
        out = out + b3_ref[...]

        # ---- residual ------------------------------------------------------ #
        if has_down:
            # stride==2: rows 0..mo are exactly the (ph,pw)==(0,0) slab, i.e.
            # the stride-2 subsample in (n,i,j) order -- a contiguous slice.
            xs = x if stride == 1 else x[0:mo, :]
            res = jnp.dot(xs, wd_ref[...], preferred_element_type=jnp.float32)
            res = res + bd_ref[...]
        else:
            res = x.astype(jnp.float32)                          # identity

        o_ref[...] = jnp.clip(out + res, 0.0, 6.0).astype(o_ref.dtype)

    return kernel


# --------------------------------------------------------------------------- #
# Host wrapper
# --------------------------------------------------------------------------- #

def bottleneck_forward(x_nchw, params):
    """x: (N, Cin, H, W) f32 -> (N, 4*planes, Ho, Wo) f32."""
    stride = params['stride']
    has_down = 'wd' in params
    n, cin, h, w = x_nchw.shape
    p = params['w1'].shape[1]
    c4 = params['w3'].shape[1]
    ho, wo = -(-h // stride), -(-w // stride)
    mo = n * ho * wo

    x_nhwc = jnp.transpose(x_nchw, (0, 2, 3, 1))
    if stride == 1:
        x_rows = x_nhwc.reshape(n * h * w, cin)
        scr_shape = (n, h + 2, w + 2, p)
    else:
        assert stride == 2 and h % 2 == 0 and w % 2 == 0
        # Pre-order rows by spatial parity: (ph, pw, n, i, j).
        x6 = x_nhwc.reshape(n, ho, 2, wo, 2, cin)
        x_rows = jnp.transpose(x6, (2, 4, 0, 1, 3, 5)).reshape(n * h * w, cin)
        scr_shape = (4 * n, ho + 1, wo + 1, p)
    x_rows = x_rows.astype(jnp.bfloat16)

    args = [x_rows, params['w1'], params['b1'], params['w2'], params['b2'],
            params['w3'], params['b3']]
    if has_down:
        args += [params['wd'], params['bd']]

    vspec = pl.BlockSpec(memory_space=pltpu.MemorySpace.VMEM)
    out = pl.pallas_call(
        _make_bottleneck_kernel(n, h, w, stride, has_down),
        out_shape=jax.ShapeDtypeStruct((mo, c4), jnp.float32),
        in_specs=[vspec] * len(args),
        out_specs=vspec,
        scratch_shapes=[pltpu.VMEM(scr_shape, jnp.bfloat16)],
    )(*args)

    out = out.reshape(n, ho, wo, c4)
    return jnp.transpose(out, (0, 3, 1, 2))


# --------------------------------------------------------------------------- #
# Parameters (BN folded into bf16 weights)
# --------------------------------------------------------------------------- #

def _fold_bn(key, c, eps=1e-5):
    k1, k2, k3, k4 = jax.random.split(key, 4)
    gamma = 1.0 + 0.1 * jax.random.normal(k1, (c,), jnp.float32)
    beta = 0.1 * jax.random.normal(k2, (c,), jnp.float32)
    mean = 0.1 * jax.random.normal(k3, (c,), jnp.float32)
    var = 1.0 + 0.1 * jax.random.uniform(k4, (c,), jnp.float32)
    scale = gamma / jnp.sqrt(var + eps)
    return scale, beta - mean * scale


def _conv_weight(key, cout, cin, k):
    std = math.sqrt(2.0 / (k * k * cout))
    return jax.random.normal(key, (cout, cin, k, k), jnp.float32) * std


def build_bottleneck_params(key, inplanes, planes, stride):
    keys = jax.random.split(key, 8)
    w1 = _conv_weight(keys[0], planes, inplanes, 1)
    s1, b1 = _fold_bn(keys[1], planes)
    w2 = _conv_weight(keys[2], planes, planes, 3)
    s2, b2 = _fold_bn(keys[3], planes)
    w3 = _conv_weight(keys[4], planes * 4, planes, 1)
    s3, b3 = _fold_bn(keys[5], planes * 4)

    params = {
        'stride': stride,
        'w1': (w1.reshape(planes, inplanes).T * s1[None, :]).astype(jnp.bfloat16),
        'b1': b1.reshape(1, planes).astype(jnp.float32),
        'w2': (jnp.transpose(w2, (2, 3, 1, 0)).reshape(9, planes, planes)
               * s2[None, None, :]).astype(jnp.bfloat16),
        'b2': b2.reshape(1, planes).astype(jnp.float32),
        'w3': (w3.reshape(planes * 4, planes).T * s3[None, :]).astype(jnp.bfloat16),
        'b3': b3.reshape(1, planes * 4).astype(jnp.float32),
    }
    if stride != 1 or inplanes != planes * 4:
        wd = _conv_weight(keys[6], planes * 4, inplanes, 1)
        sd, bd = _fold_bn(keys[7], planes * 4)
        params['wd'] = (wd.reshape(planes * 4, inplanes).T
                        * sd[None, :]).astype(jnp.bfloat16)
        params['bd'] = bd.reshape(1, planes * 4).astype(jnp.float32)
    return params


# --------------------------------------------------------------------------- #
# Pure-JAX reference (same folded bf16 weights, XLA convs) for validation
# --------------------------------------------------------------------------- #

def _mat_to_oihw(wmat):
    return jnp.transpose(wmat.astype(jnp.float32), (1, 0))[:, :, None, None]


def bottleneck_reference(x_nchw, params):
    stride = params['stride']
    p = params['w1'].shape[1]
    c4 = params['w3'].shape[1]
    dn = ('NCHW', 'OIHW', 'NCHW')

    x = x_nchw.astype(jnp.bfloat16).astype(jnp.float32)

    t1 = lax.conv_general_dilated(x, _mat_to_oihw(params['w1']), (1, 1),
                                  'VALID', dimension_numbers=dn)
    t1 = jnp.clip(t1 + params['b1'].reshape(1, p, 1, 1), 0.0, 6.0)
    t1 = t1.astype(jnp.bfloat16).astype(jnp.float32)

    h, w = t1.shape[-2:]
    ph = max((-(-h // stride) - 1) * stride + 3 - h, 0)
    pw = max((-(-w // stride) - 1) * stride + 3 - w, 0)
    w2 = jnp.transpose(params['w2'].astype(jnp.float32).reshape(3, 3, p, p),
                       (3, 2, 0, 1))
    t2 = lax.conv_general_dilated(
        t1, w2, (stride, stride),
        [(ph // 2, ph - ph // 2), (pw // 2, pw - pw // 2)],
        dimension_numbers=dn)
    t2 = jnp.clip(t2 + params['b2'].reshape(1, p, 1, 1), 0.0, 6.0)
    t2 = t2.astype(jnp.bfloat16).astype(jnp.float32)

    out = lax.conv_general_dilated(t2, _mat_to_oihw(params['w3']), (1, 1),
                                   'VALID', dimension_numbers=dn)
    out = out + params['b3'].reshape(1, c4, 1, 1)

    if 'wd' in params:
        res = lax.conv_general_dilated(x, _mat_to_oihw(params['wd']),
                                       (stride, stride), 'VALID',
                                       dimension_numbers=dn)
        res = res + params['bd'].reshape(1, c4, 1, 1)
    else:
        res = x
    return jnp.clip(out + res, 0.0, 6.0)


# --------------------------------------------------------------------------- #
# main
# --------------------------------------------------------------------------- #

if __name__ == "__main__":
    key = jax.random.PRNGKey(0)
    kx, ka, kb = jax.random.split(key, 3)

    x = jax.random.normal(kx, (2, 64, 16, 16), jnp.float32)       # NCHW

    # Bottleneck(inplanes=64, planes=32, stride=2, downsample=1x1conv+BN)
    params_a = build_bottleneck_params(ka, inplanes=64, planes=32, stride=2)
    # Bottleneck(inplanes=128, planes=32, stride=1, downsample=None)
    params_b = build_bottleneck_params(kb, inplanes=128, planes=32, stride=1)

    y1 = bottleneck_forward(x, params_a)
    y2 = bottleneck_forward(y1, params_b)
    jax.block_until_ready((y1, y2))

    assert y1.shape == (2, 128, 8, 8), y1.shape
    assert y2.shape == (2, 128, 8, 8), y2.shape
    assert bool(jnp.all(jnp.isfinite(y1))) and bool(jnp.all(jnp.isfinite(y2)))

    r1 = bottleneck_reference(x, params_a)
    r2 = bottleneck_reference(y1, params_b)
    err1 = float(jnp.max(jnp.abs(y1 - r1)))
    err2 = float(jnp.max(jnp.abs(y2 - r2)))
    assert err1 < 5e-2 and err2 < 5e-2, (err1, err2)

    print("KERNEL_OK")
</pallas_src>

<mosaic_0001>
module attributes {stable_mosaic.version = 11 : i64} {
  func.func @kernel(%arg0: memref<512x64xbf16, #tpu.memory_space<vmem>>, %arg1: memref<64x32xbf16, #tpu.memory_space<vmem>>, %arg2: memref<1x32xf32, #tpu.memory_space<vmem>>, %arg3: memref<9x32x32xbf16, #tpu.memory_space<vmem>>, %arg4: memref<1x32xf32, #tpu.memory_space<vmem>>, %arg5: memref<32x128xbf16, #tpu.memory_space<vmem>>, %arg6: memref<1x128xf32, #tpu.memory_space<vmem>>, %arg7: memref<64x128xbf16, #tpu.memory_space<vmem>>, %arg8: memref<1x128xf32, #tpu.memory_space<vmem>>, %arg9: memref<128x128xf32, #tpu.memory_space<vmem>>, %arg10: memref<8x9x9x32xbf16, #tpu.memory_space<vmem>>) attributes {dimension_semantics = [], scalar_prefetch = 0 : i64, scratch_operands = 1 : i64, tpu.core_type = #tpu.core_type<tc>} {
    %c0 = arith.constant 0 : index
    %c0_0 = arith.constant 0 : index
    %0 = vector.load %arg0[%c0, %c0_0] : memref<512x64xbf16, #tpu.memory_space<vmem>>, vector<512x64xbf16>
    %c0_1 = arith.constant 0 : index
    %c0_2 = arith.constant 0 : index
    %1 = vector.load %arg1[%c0_1, %c0_2] : memref<64x32xbf16, #tpu.memory_space<vmem>>, vector<64x32xbf16>
    %cst = arith.constant dense<0.000000e+00> : vector<512x32xf32>
    %2 = tpu.matmul %0, %1, %cst {dimension_numbers = #tpu.dot_dimension_numbers<[1], [0], [0], [1], [0, 0, 1, 1], [], []>} : vector<512x64xbf16>, vector<64x32xbf16>, vector<512x32xf32> -> vector<512x32xf32>
    %c0_3 = arith.constant 0 : index
    %c0_4 = arith.constant 0 : index
    %3 = vector.load %arg2[%c0_3, %c0_4] : memref<1x32xf32, #tpu.memory_space<vmem>>, vector<1x32xf32>
    %4 = vector.broadcast %3 : vector<1x32xf32> to vector<512x32xf32>
    %5 = arith.addf %2, %4 : vector<512x32xf32>
    %cst_5 = arith.constant 0.000000e+00 : f32
    %cst_6 = arith.constant 6.000000e+00 : f32
    %6 = vector.broadcast %cst_5 : f32 to vector<512x32xf32>
    %7 = arith.maximumf %6, %5 : vector<512x32xf32>
    %8 = vector.broadcast %cst_6 : f32 to vector<512x32xf32>
    %9 = arith.minimumf %8, %7 : vector<512x32xf32>
    %10 = arith.truncf %9 : vector<512x32xf32> to vector<512x32xbf16>
    %cst_7 = arith.constant 0.000000e+00 : bf16
    %11 = vector.broadcast %cst_7 : bf16 to vector<8x9x9x32xbf16>
    %c0_8 = arith.constant 0 : index
    %c0_9 = arith.constant 0 : index
    %c0_10 = arith.constant 0 : index
    %c0_11 = arith.constant 0 : index
    %12 = vector.load %arg10[%c0_8, %c0_9, %c0_10, %c0_11] : memref<8x9x9x32xbf16, #tpu.memory_space<vmem>>, vector<8x9x9x32xbf16>
    tpu.vector_store %arg10[%c0_8, %c0_9, %c0_10, %c0_11], %11 {strides = array<i32>} : memref<8x9x9x32xbf16, #tpu.memory_space<vmem>>, vector<8x9x9x32xbf16>,
    %13 = vector.shape_cast %10 : vector<512x32xbf16> to vector<8x8x8x32xbf16>
    %c0_12 = arith.constant 0 : index
    %c0_13 = arith.constant 0 : index
    %c0_14 = arith.constant 0 : index
    %c0_15 = arith.constant 0 : index
    %14 = vector.load %arg10[%c0_12, %c0_13, %c0_14, %c0_15] : memref<8x9x9x32xbf16, #tpu.memory_space<vmem>>, vector<8x8x8x32xbf16>
    tpu.vector_store %arg10[%c0_12, %c0_13, %c0_14, %c0_15], %13 {strides = array<i32>} : memref<8x9x9x32xbf16, #tpu.memory_space<vmem>>, vector<8x8x8x32xbf16>,
    %c0_16 = arith.constant 0 : index
    %c0_17 = arith.constant 0 : index
    %c0_18 = arith.constant 0 : index
    %c0_19 = arith.constant 0 : index
    %15 = vector.load %arg10[%c0_16, %c0_17, %c0_18, %c0_19] : memref<8x9x9x32xbf16, #tpu.memory_space<vmem>>, vector<2x8x8x32xbf16>
    %16 = vector.shape_cast %15 : vector<2x8x8x32xbf16> to vector<128x32xbf16>
    %c0_20 = arith.constant 0 : index
    %c0_21 = arith.constant 0 : index
    %c0_22 = arith.constant 0 : index
    %17 = vector.load %arg3[%c0_20, %c0_21, %c0_22] : memref<9x32x32xbf16, #tpu.memory_space<vmem>>, vector<1x32x32xbf16>
    %18 = vector.shape_cast %17 : vector<1x32x32xbf16> to vector<32x32xbf16>
    %cst_23 = arith.constant dense<0.000000e+00> : vector<128x32xf32>
    %19 = tpu.matmul %16, %18, %cst_23 {dimension_numbers = #tpu.dot_dimension_numbers<[1], [0], [0], [1], [0, 0, 1, 1], [], []>} : vector<128x32xbf16>, vector<32x32xbf16>, vector<128x32xf32> -> vector<128x32xf32>
    %c2 = arith.constant 2 : index
    %c0_24 = arith.constant 0 : index
    %c0_25 = arith.constant 0 : index
    %c0_26 = arith.constant 0 : index
    %20 = vector.load %arg10[%c2, %c0_24, %c0_25, %c0_26] : memref<8x9x9x32xbf16, #tpu.memory_space<vmem>>, vector<2x8x8x32xbf16>
    %21 = vector.shape_cast %20 : vector<2x8x8x32xbf16> to vector<128x32xbf16>
    %c1 = arith.constant 1 : index
    %c0_27 = arith.constant 0 : index
    %c0_28 = arith.constant 0 : index
    %22 = vector.load %arg3[%c1, %c0_27, %c0_28] : memref<9x32x32xbf16, #tpu.memory_space<vmem>>, vector<1x32x32xbf16>
    %23 = vector.shape_cast %22 : vector<1x32x32xbf16> to vector<32x32xbf16>
    %cst_29 = arith.constant dense<0.000000e+00> : vector<128x32xf32>
    %24 = tpu.matmul %21, %23, %cst_29 {dimension_numbers = #tpu.dot_dimension_numbers<[1], [0], [0], [1], [0, 0, 1, 1], [], []>} : vector<128x32xbf16>, vector<32x32xbf16>, vector<128x32xf32> -> vector<128x32xf32>
    %25 = arith.addf %19, %24 : vector<128x32xf32>
    %c0_30 = arith.constant 0 : index
    %c0_31 = arith.constant 0 : index
    %c1_32 = arith.constant 1 : index
    %c0_33 = arith.constant 0 : index
    %26 = vector.load %arg10[%c0_30, %c0_31, %c1_32, %c0_33] : memref<8x9x9x32xbf16, #tpu.memory_space<vmem>>, vector<2x8x8x32xbf16>
    %27 = vector.shape_cast %26 : vector<2x8x8x32xbf16> to vector<128x32xbf16>
    %c2_34 = arith.constant 2 : index
    %c0_35 = arith.constant 0 : index
    %c0_36 = arith.constant 0 : index
    %28 = vector.load %arg3[%c2_34, %c0_35, %c0_36] : memref<9x32x32xbf16, #tpu.memory_space<vmem>>, vector<1x32x32xbf16>
    %29 = vector.shape_cast %28 : vector<1x32x32xbf16> to vector<32x32xbf16>
    %cst_37 = arith.constant dense<0.000000e+00> : vector<128x32xf32>
    %30 = tpu.matmul %27, %29, %cst_37 {dimension_numbers = #tpu.dot_dimension_numbers<[1], [0], [0], [1], [0, 0, 1, 1], [], []>} : vector<128x32xbf16>, vector<32x32xbf16>, vector<128x32xf32> -> vector<128x32xf32>
    %31 = arith.addf %25, %30 : vector<128x32xf32>
    %c4 = arith.constant 4 : index
    %c0_38 = arith.constant 0 : index
    %c0_39 = arith.constant 0 : index
    %c0_40 = arith.constant 0 : index
    %32 = vector.load %arg10[%c4, %c0_38, %c0_39, %c0_40] : memref<8x9x9x32xbf16, #tpu.memory_space<vmem>>, vector<2x8x8x32xbf16>
    %33 = vector.shape_cast %32 : vector<2x8x8x32xbf16> to vector<128x32xbf16>
    %c3 = arith.constant 3 : index
    %c0_41 = arith.constant 0 : index
    %c0_42 = arith.constant 0 : index
    %34 = vector.load %arg3[%c3, %c0_41, %c0_42] : memref<9x32x32xbf16, #tpu.memory_space<vmem>>, vector<1x32x32xbf16>
    %35 = vector.shape_cast %34 : vector<1x32x32xbf16> to vector<32x32xbf16>
    %cst_43 = arith.constant dense<0.000000e+00> : vector<128x32xf32>
    %36 = tpu.matmul %33, %35, %cst_43 {dimension_numbers = #tpu.dot_dimension_numbers<[1], [0], [0], [1], [0, 0, 1, 1], [], []>} : vector<128x32xbf16>, vector<32x32xbf16>, vector<128x32xf32> -> vector<128x32xf32>
    %37 = arith.addf %31, %36 : vector<128x32xf32>
    %c6 = arith.constant 6 : index
    %c0_44 = arith.constant 0 : index
    %c0_45 = arith.constant 0 : index
    %c0_46 = arith.constant 0 : index
    %38 = vector.load %arg10[%c6, %c0_44, %c0_45, %c0_46] : memref<8x9x9x32xbf16, #tpu.memory_space<vmem>>, vector<2x8x8x32xbf16>
    %39 = vector.shape_cast %38 : vector<2x8x8x32xbf16> to vector<128x32xbf16>
    %c4_47 = arith.constant 4 : index
    %c0_48 = arith.constant 0 : index
    %c0_49 = arith.constant 0 : index
    %40 = vector.load %arg3[%c4_47, %c0_48, %c0_49] : memref<9x32x32xbf16, #tpu.memory_space<vmem>>, vector<1x32x32xbf16>
    %41 = vector.shape_cast %40 : vector<1x32x32xbf16> to vector<32x32xbf16>
    %cst_50 = arith.constant dense<0.000000e+00> : vector<128x32xf32>
    %42 = tpu.matmul %39, %41, %cst_50 {dimension_numbers = #tpu.dot_dimension_numbers<[1], [0], [0], [1], [0, 0, 1, 1], [], []>} : vector<128x32xbf16>, vector<32x32xbf16>, vector<128x32xf32> -> vector<128x32xf32>
    %43 = arith.addf %37, %42 : vector<128x32xf32>
    %c4_51 = arith.constant 4 : index
    %c0_52 = arith.constant 0 : index
    %c1_53 = arith.constant 1 : index
    %c0_54 = arith.constant 0 : index
    %44 = vector.load %arg10[%c4_51, %c0_52, %c1_53, %c0_54] : memref<8x9x9x32xbf16, #tpu.memory_space<vmem>>, vector<2x8x8x32xbf16>
    %45 = vector.shape_cast %44 : vector<2x8x8x32xbf16> to vector<128x32xbf16>
    %c5 = arith.constant 5 : index
    %c0_55 = arith.constant 0 : index
    %c0_56 = arith.constant 0 : index
    %46 = vector.load %arg3[%c5, %c0_55, %c0_56] : memref<9x32x32xbf16, #tpu.memory_space<vmem>>, vector<1x32x32xbf16>
    %47 = vector.shape_cast %46 : vector<1x32x32xbf16> to vector<32x32xbf16>
    %cst_57 = arith.constant dense<0.000000e+00> : vector<128x32xf32>
    %48 = tpu.matmul %45, %47, %cst_57 {dimension_numbers = #tpu.dot_dimension_numbers<[1], [0], [0], [1], [0, 0, 1, 1], [], []>} : vector<128x32xbf16>, vector<32x32xbf16>, vector<128x32xf32> -> vector<128x32xf32>
    %49 = arith.addf %43, %48 : vector<128x32xf32>
    %c0_58 = arith.constant 0 : index
    %c1_59 = arith.constant 1 : index
    %c0_60 = arith.constant 0 : index
    %c0_61 = arith.constant 0 : index
    %50 = vector.load %arg10[%c0_58, %c1_59, %c0_60, %c0_61] : memref<8x9x9x32xbf16, #tpu.memory_space<vmem>>, vector<2x8x8x32xbf16>
    %51 = vector.shape_cast %50 : vector<2x8x8x32xbf16> to vector<128x32xbf16>
    %c6_62 = arith.constant 6 : index
    %c0_63 = arith.constant 0 : index
    %c0_64 = arith.constant 0 : index
    %52 = vector.load %arg3[%c6_62, %c0_63, %c0_64] : memref<9x32x32xbf16, #tpu.memory_space<vmem>>, vector<1x32x32xbf16>
    %53 = vector.shape_cast %52 : vector<1x32x32xbf16> to vector<32x32xbf16>
    %cst_65 = arith.constant dense<0.000000e+00> : vector<128x32xf32>
    %54 = tpu.matmul %51, %53, %cst_65 {dimension_numbers = #tpu.dot_dimension_numbers<[1], [0], [0], [1], [0, 0, 1, 1], [], []>} : vector<128x32xbf16>, vector<32x32xbf16>, vector<128x32xf32> -> vector<128x32xf32>
    %55 = arith.addf %49, %54 : vector<128x32xf32>
    %c2_66 = arith.constant 2 : index
    %c1_67 = arith.constant 1 : index
    %c0_68 = arith.constant 0 : index
    %c0_69 = arith.constant 0 : index
    %56 = vector.load %arg10[%c2_66, %c1_67, %c0_68, %c0_69] : memref<8x9x9x32xbf16, #tpu.memory_space<vmem>>, vector<2x8x8x32xbf16>
    %57 = vector.shape_cast %56 : vector<2x8x8x32xbf16> to vector<128x32xbf16>
    %c7 = arith.constant 7 : index
    %c0_70 = arith.constant 0 : index
    %c0_71 = arith.constant 0 : index
    %58 = vector.load %arg3[%c7, %c0_70, %c0_71] : memref<9x32x32xbf16, #tpu.memory_space<vmem>>, vector<1x32x32xbf16>
    %59 = vector.shape_cast %58 : vector<1x32x32xbf16> to vector<32x32xbf16>
    %cst_72 = arith.constant dense<0.000000e+00> : vector<128x32xf32>
    %60 = tpu.matmul %57, %59, %cst_72 {dimension_numbers = #tpu.dot_dimension_numbers<[1], [0], [0], [1], [0, 0, 1, 1], [], []>} : vector<128x32xbf16>, vector<32x32xbf16>, vector<128x32xf32> -> vector<128x32xf32>
    %61 = arith.addf %55, %60 : vector<128x32xf32>
    %c0_73 = arith.constant 0 : index
    %c1_74 = arith.constant 1 : index
    %c1_75 = arith.constant 1 : index
    %c0_76 = arith.constant 0 : index
    %62 = vector.load %arg10[%c0_73, %c1_74, %c1_75, %c0_76] : memref<8x9x9x32xbf16, #tpu.memory_space<vmem>>, vector<2x8x8x32xbf16>
    %63 = vector.shape_cast %62 : vector<2x8x8x32xbf16> to vector<128x32xbf16>
    %c8 = arith.constant 8 : index
    %c0_77 = arith.constant 0 : index
    %c0_78 = arith.constant 0 : index
    %64 = vector.load %arg3[%c8, %c0_77, %c0_78] : memref<9x32x32xbf16, #tpu.memory_space<vmem>>, vector<1x32x32xbf16>
    %65 = vector.shape_cast %64 : vector<1x32x32xbf16> to vector<32x32xbf16>
    %cst_79 = arith.constant dense<0.000000e+00> : vector<128x32xf32>
    %66 = tpu.matmul %63, %65, %cst_79 {dimension_numbers = #tpu.dot_dimension_numbers<[1], [0], [0], [1], [0, 0, 1, 1], [], []>} : vector<128x32xbf16>, vector<32x32xbf16>, vector<128x32xf32> -> vector<128x32xf32>
    %67 = arith.addf %61, %66 : vector<128x32xf32>
    %c0_80 = arith.constant 0 : index
    %c0_81 = arith.constant 0 : index
    %68 = vector.load %arg4[%c0_80, %c0_81] : memref<1x32xf32, #tpu.memory_space<vmem>>, vector<1x32xf32>
    %69 = vector.broadcast %68 : vector<1x32xf32> to vector<128x32xf32>
    %70 = arith.addf %67, %69 : vector<128x32xf32>
    %cst_82 = arith.constant 0.000000e+00 : f32
    %cst_83 = arith.constant 6.000000e+00 : f32
    %71 = vector.broadcast %cst_82 : f32 to vector<128x32xf32>
    %72 = arith.maximumf %71, %70 : vector<128x32xf32>
    %73 = vector.broadcast %cst_83 : f32 to vector<128x32xf32>
    %74 = arith.minimumf %73, %72 : vector<128x32xf32>
    %75 = arith.truncf %74 : vector<128x32xf32> to vector<128x32xbf16>
    %c0_84 = arith.constant 0 : index
    %c0_85 = arith.constant 0 : index
    %76 = vector.load %arg5[%c0_84, %c0_85] : memref<32x128xbf16, #tpu.memory_space<vmem>>, vector<32x128xbf16>
    %cst_86 = arith.constant dense<0.000000e+00> : vector<128x128xf32>
    %77 = tpu.matmul %75, %76, %cst_86 {dimension_numbers = #tpu.dot_dimension_numbers<[1], [0], [0], [1], [0, 0, 1, 1], [], []>} : vector<128x32xbf16>, vector<32x128xbf16>, vector<128x128xf32> -> vector<128x128xf32>
    %c0_87 = arith.constant 0 : index
    %c0_88 = arith.constant 0 : index
    %78 = vector.load %arg6[%c0_87, %c0_88] : memref<1x128xf32, #tpu.memory_space<vmem>>, vector<1x128xf32>
    %79 = vector.broadcast %78 : vector<1x128xf32> to vector<128x128xf32>
    %80 = arith.addf %77, %79 : vector<128x128xf32>
    %81 = vector.extract_strided_slice %0 {offsets = [0, 0], sizes = [128, 64], strides = [1, 1]} : vector<512x64xbf16> to vector<128x64xbf16>
    %c0_89 = arith.constant 0 : index
    %c0_90 = arith.constant 0 : index
    %82 = vector.load %arg7[%c0_89, %c0_90] : memref<64x128xbf16, #tpu.memory_space<vmem>>, vector<64x128xbf16>
    %cst_91 = arith.constant dense<0.000000e+00> : vector<128x128xf32>
    %83 = tpu.matmul %81, %82, %cst_91 {dimension_numbers = #tpu.dot_dimension_numbers<[1], [0], [0], [1], [0, 0, 1, 1], [], []>} : vector<128x64xbf16>, vector<64x128xbf16>, vector<128x128xf32> -> vector<128x128xf32>
    %c0_92 = arith.constant 0 : index
    %c0_93 = arith.constant 0 : index
    %84 = vector.load %arg8[%c0_92, %c0_93] : memref<1x128xf32, #tpu.memory_space<vmem>>, vector<1x128xf32>
    %85 = vector.broadcast %84 : vector<1x128xf32> to vector<128x128xf32>
    %86 = arith.addf %83, %85 : vector<128x128xf32>
    %87 = arith.addf %80, %86 : vector<128x128xf32>
    %cst_94 = arith.constant 0.000000e+00 : f32
    %cst_95 = arith.constant 6.000000e+00 : f32
    %88 = vector.broadcast %cst_94 : f32 to vector<128x128xf32>
    %89 = arith.maximumf %88, %87 : vector<128x128xf32>
    %90 = vector.broadcast %cst_95 : f32 to vector<128x128xf32>
    %91 = arith.minimumf %90, %89 : vector<128x128xf32>
    %c0_96 = arith.constant 0 : index
    %c0_97 = arith.constant 0 : index
    %92 = vector.load %arg9[%c0_96, %c0_97] : memref<128x128xf32, #tpu.memory_space<vmem>>, vector<128x128xf32>
    tpu.vector_store %arg9[%c0_96, %c0_97], %91 {strides = array<i32>} : memref<128x128xf32, #tpu.memory_space<vmem>>, vector<128x128xf32>,
    return
  }
}

</mosaic_0001>

<bundles_post_ra>
// kernel: tpu_custom_call.1
= control target key start
LH: loop header
LB: loop body
LE: loop exit
PB: predicated region body
PF: predicated region fallthrough
CT: control target
= control target key end

     0   :  { %vm297_vm0 = vcmask 523264   ;;  %s6753_s0 = inlined_call_operand.vmem [shape: bf16[512,64], index: 0, kind: input, shape index: {}]   ;;  %s6754_s1 = inlined_call_operand.vmem [shape: bf16[64,32], index: 1, kind: input, shape index: {}]   ;;  %s6755_s2 = inlined_call_operand.vmem [shape: f32[1,32], index: 2, kind: input, shape index: {}]   ;;  %s6756_s3 = inlined_call_operand.vmem [shape: bf16[9,32,32], index: 3, kind: input, shape index: {}]   ;;  %s6757_s4 = inlined_call_operand.vmem [shape: f32[1,32], index: 4, kind: input, shape index: {}]   ;;  %s6758_s5 = inlined_call_operand.vmem [shape: bf16[32,128], index: 5, kind: input, shape index: {}]   ;;  %s6759_s6 = inlined_call_operand.vmem [shape: f32[1,128], index: 6, kind: input, shape index: {}]   ;;  %s6760_s7 = inlined_call_operand.vmem [shape: bf16[64,128], index: 7, kind: input, shape index: {}]   ;;  %s6761_s8 = inlined_call_operand.vmem [shape: f32[1,128], index: 8, kind: input, shape index: {}]   ;;  %s6762_s9 = inlined_call_operand.hbm [shape: f32[128,128], index: 9, kind: output, shape index: {}]  }
   0x1   :  { %v5428_v0 = vld [vmem:[%s6754_s1] sm:$0xff]   ;;  %v5429_v1 = vld [vmem:[%s6754_s1 + $0x8] sm:$0xff]   ;;  %v5430_v2 = vld [vmem:[%s6754_s1 + $0x10] sm:$0xff]  }
   0x2   :  { %4948 = vmatprep.subr.bf16.mxu0 %v5428_v0  ;;  %v5432_v3 = vld [vmem:[%s6753_s0] sm:$0xff]   ;;  %v5431_v4 = vld [vmem:[%s6754_s1 + $0x18] sm:$0xff]   ;;  %v5433_v5 = vld [vmem:[%s6753_s0 + $0x8] sm:$0xff]  }
   0x3   :  { %4949 = vmatpush3.bf16.msra.mxu0 %v5428_v0  ;;  %4956 = vmatprep.mubr.msk.bf16.mxu0 %vm297_vm0, %v5432_v3  ;;  %v5434_v6 = vld [vmem:[%s6753_s0 + $0x10] sm:$0xff]   ;;  %v5435_v7 = vld [vmem:[%s6753_s0 + $0x18] sm:$0xff]   ;;  %v5436_v8 = vld [vmem:[%s6753_s0 + $0x20] sm:$0xff]  }
   0x4   :  { %4950 = vmatprep.subr.bf16.mxu0 %v5429_v1  ;;  %v5437_v9 = vld [vmem:[%s6753_s0 + $0x28] sm:$0xff]   ;;  %v5438_v10 = vld [vmem:[%s6753_s0 + $0x30] sm:$0xff]   ;;  %v5439_v11 = vld [vmem:[%s6753_s0 + $0x38] sm:$0xff]  }
   0x5   :  { %v5440_v12 = vld [vmem:[%s6753_s0 + $0x40] sm:$0xff]   ;;  %v5441_v13 = vld [vmem:[%s6753_s0 + $0x48] sm:$0xff]   ;;  %v5442_v14 = vld [vmem:[%s6753_s0 + $0x50] sm:$0xff]  }
   0x7   :  { %4951 = vmatpush3.bf16.msra.mxu0 %v5429_v1 }
   0x8   :  { %4952 = vmatprep.subr.bf16.mxu0 %v5430_v2 }
   0xb   :  { %4953 = vmatpush3.bf16.msra.mxu0 %v5430_v2 }
   0xc   :  { %4954 = vmatprep.subr.bf16.mxu0 %v5431_v4 }
   0xf   :  { %4955 = vmatpush3.bf16.msra.mxu0 %v5431_v4 }
  0x12   :  { %4957 = vmatmul.mubr.msk.bf16.vlgmr.msra.gmra.mrb[0].mxu0 %vm297_vm0, %v5433_v5 }
  0x13   :  { %4960 = vmatprep.mubr.msk.bf16.mxu0 %vm297_vm0, %v5434_v6 }
  0x1a   :  { %4961 = vmatmul.mubr.msk.bf16.gmra.mrb[4].mxu0 %vm297_vm0, %v5435_v7 }
  0x1b   :  { %4964 = vmatprep.mubr.msk.bf16.mxu0 %vm297_vm0, %v5436_v8 }
  0x22   :  { %4965 = vmatmul.mubr.msk.bf16.gmra.mrb[8].mxu0 %vm297_vm0, %v5437_v9 }
  0x23   :  { %4968 = vmatprep.mubr.msk.bf16.mxu0 %vm297_vm0, %v5438_v10 }
  0x2a   :  { %4969 = vmatmul.mubr.msk.bf16.gmra.mrb[12].mxu0 %vm297_vm0, %v5439_v11 }
  0x2b   :  { %4972 = vmatprep.mubr.msk.bf16.mxu0 %vm297_vm0, %v5440_v12 }
  0x32   :  { %4973 = vmatmul.mubr.msk.bf16.gmra.mrb[16].mxu0 %vm297_vm0, %v5441_v13 }
  0x33   :  { %4976 = vmatprep.mubr.msk.bf16.mxu0 %vm297_vm0, %v5442_v14 }
  0x34   :  { %14 = vsyncpa [#allocation4], 0  ;;  %v5443_v15 = vld [vmem:[%s6753_s0 + $0x58] sm:$0xff]   ;;  %v5444_v16 = vld [vmem:[%s6753_s0 + $0x60] sm:$0xff]   ;;  %vm843_vm1 = vcmask 257024   ;;  %v5571_v29 = vmov 0  }
  0x35   :  { %v5445_v17 = vld [vmem:[%s6753_s0 + $0x68] sm:$0xff]   ;;  %v5446_v18 = vld [vmem:[%s6753_s0 + $0x70] sm:$0xff]   ;;  %v5447_v19 = vld [vmem:[%s6753_s0 + $0x78] sm:$0xff]   ;;  %855 = vst.msk [vmem:[#allocation2 + $0x10] sm:$0xf] %vm843_vm1, %v5571_v29  ;;  %vm845_vm2 = vcmask 253952  }
  0x36   :  { %v5448_v20 = vld [vmem:[%s6753_s0 + $0x80] sm:$0xff]   ;;  %v5449_v21 = vld [vmem:[%s6753_s0 + $0x88] sm:$0xff]   ;;  %v5450_v22 = vld [vmem:[%s6753_s0 + $0x90] sm:$0xff]   ;;  %844 = vst.msk [vmem:[#allocation2] sm:$0xf] %vm843_vm1, %v5571_v29  ;;  %vm1517_vm5 = vcmask 261120  }
  0x37   :  { %v5451_v23 = vld [vmem:[%s6753_s0 + $0x98] sm:$0xff]   ;;  %v5452_v24 = vld [vmem:[%s6753_s0 + $0xa0] sm:$0xff]   ;;  %v5453_v25 = vld [vmem:[%s6753_s0 + $0xa8] sm:$0xff]   ;;  %851 = vst.msk [vmem:[#allocation2 + $0x8] sm:$0xf] %vm843_vm1, %v5571_v29 }
  0x38   :  { %v5454_v26 = vld [vmem:[%s6753_s0 + $0xb0] sm:$0xff]   ;;  %v5455_v27 = vld [vmem:[%s6753_s0 + $0xb8] sm:$0xff]   ;;  %v5456_v28 = vld [vmem:[%s6753_s0 + $0xc0] sm:$0xff]   ;;  %859 = vst.msk [vmem:[#allocation2 + $0x18] sm:$0xf] %vm843_vm1, %v5571_v29 }
  0x39   :  { %863 = vst.msk [vmem:[#allocation2 + $0x20] sm:$0xf] %vm843_vm1, %v5571_v29  ;;  %867 = vst.msk [vmem:[#allocation2 + $0x28] sm:$0xf] %vm843_vm1, %v5571_v29  ;;  %v5457_v30 = vld [vmem:[%s6753_s0 + $0xc8] sm:$0xff]   ;;  %v5458_v31 = vld [vmem:[%s6753_s0 + $0xd0] sm:$0xff]  }
  0x3a   :  { %4977 = vmatmul.mubr.msk.bf16.gmra.mrb[20].mxu0 %vm297_vm0, %v5443_v15  ;;  %871 = vst.msk [vmem:[#allocation2 + $0x30] sm:$0xf] %vm843_vm1, %v5571_v29  ;;  %875 = vst.msk [vmem:[#allocation2 + $0x38] sm:$0xf] %vm843_vm1, %v5571_v29  ;;  %vm846_vm3 = vsmask.f32 256 }
  0x3b   :  { %4980 = vmatprep.mubr.msk.bf16.mxu0 %vm297_vm0, %v5444_v16  ;;  %879 = vst.msk [vmem:[#allocation2 + $0x40] sm:$0xf] %vm843_vm1, %v5571_v29  ;;  %883 = vst.msk [vmem:[#allocation2 + $0x48] sm:$0xf] %vm843_vm1, %v5571_v29  ;;  %v848_v33 = vld [vmem:[#allocation2 + $0x4] sm:$0x1] }
  0x3c   :  { %887 = vst.msk [vmem:[#allocation2 + $0x50] sm:$0xf] %vm843_vm1, %v5571_v29  ;;  %891 = vst.msk [vmem:[#allocation2 + $0x58] sm:$0xf] %vm843_vm1, %v5571_v29  ;;  %v856_v35 = vld [vmem:[#allocation2 + $0x14] sm:$0x1] }
  0x3d   :  { %895 = vst.msk [vmem:[#allocation2 + $0x60] sm:$0xf] %vm843_vm1, %v5571_v29  ;;  %899 = vst.msk [vmem:[#allocation2 + $0x68] sm:$0xf] %vm843_vm1, %v5571_v29  ;;  %v852_v36 = vld [vmem:[#allocation2 + $0xc] sm:$0x1] }
  0x3e   :  { %903 = vst.msk [vmem:[#allocation2 + $0x70] sm:$0xf] %vm843_vm1, %v5571_v29  ;;  %907 = vst.msk [vmem:[#allocation2 + $0x78] sm:$0xf] %vm843_vm1, %v5571_v29  ;;  %v860_v39 = vld [vmem:[#allocation2 + $0x1c] sm:$0x1] }
  0x3f   :  { %911 = vst.msk [vmem:[#allocation2 + $0x80] sm:$0xf] %vm843_vm1, %v5571_v29  ;;  %915 = vst.msk [vmem:[#allocation2 + $0x88] sm:$0xf] %vm843_vm1, %v5571_v29  ;;  %v5459_v41 = vld [vmem:[%s6753_s0 + $0xd8] sm:$0xff]   ;;  %v5460_v42 = vld [vmem:[%s6753_s0 + $0xe0] sm:$0xff]  }
  0x40   :  { %919 = vst.msk [vmem:[#allocation2 + $0x90] sm:$0xf] %vm843_vm1, %v5571_v29  ;;  %923 = vst.msk [vmem:[#allocation2 + $0x98] sm:$0xf] %vm843_vm1, %v5571_v29  ;;  %v5464_v43 = vld [vmem:[%s6756_s3] sm:$0xff]   ;;  %v5465_v44 = vld [vmem:[%s6756_s3 + $0x8] sm:$0xff]  }
  0x41   :  { %927 = vst.msk [vmem:[#allocation2 + $0xa0] sm:$0xf] %vm843_vm1, %v5571_v29  ;;  %931 = vst.msk [vmem:[#allocation2 + $0xa8] sm:$0xf] %vm843_vm1, %v5571_v29  ;;  %5244 = vmatprep.subr.bf16.mxu1 %v5464_v43  ;;  %v5461_v45 = vld [vmem:[%s6753_s0 + $0xe8] sm:$0xff]   ;;  %v5462_v46 = vld [vmem:[%s6753_s0 + $0xf0] sm:$0xff]  }
  0x42   :  { %4981 = vmatmul.mubr.msk.bf16.gmra.mrb[24].mxu0 %vm297_vm0, %v5445_v17  ;;  %935 = vst.msk [vmem:[#allocation2 + $0xb0] sm:$0xf] %vm843_vm1, %v5571_v29  ;;  %939 = vst.msk [vmem:[#allocation2 + $0xb8] sm:$0xf] %vm843_vm1, %v5571_v29  ;;  %5246 = vmatpush3.bf16.msra.mxu1 %v5464_v43  ;;  %v872_v47 = vld [vmem:[#allocation2 + $0x34] sm:$0x1] }
  0x43   :  { %4984 = vmatprep.mubr.msk.bf16.mxu0 %vm297_vm0, %v5446_v18  ;;  %943 = vst.msk [vmem:[#allocation2 + $0xc0] sm:$0xf] %vm843_vm1, %v5571_v29  ;;  %947 = vst.msk [vmem:[#allocation2 + $0xc8] sm:$0xf] %vm843_vm1, %v5571_v29  ;;  %5245 = vmatprep.subr.bf16.mxu1 %v5465_v44  ;;  %v864_v48 = vld [vmem:[#allocation2 + $0x24] sm:$0x1] }
  0x44   :  { %951 = vst.msk [vmem:[#allocation2 + $0xd0] sm:$0xf] %vm843_vm1, %v5571_v29  ;;  %955 = vst.msk [vmem:[#allocation2 + $0xd8] sm:$0xf] %vm843_vm1, %v5571_v29  ;;  %v876_v51 = vld [vmem:[#allocation2 + $0x3c] sm:$0x1] }
  0x45   :  { %959 = vst.msk [vmem:[#allocation2 + $0xe0] sm:$0xf] %vm843_vm1, %v5571_v29  ;;  %963 = vst.msk [vmem:[#allocation2 + $0xe8] sm:$0xf] %vm843_vm1, %v5571_v29  ;;  %v5463_v52 = vld [vmem:[%s6753_s0 + $0xf8] sm:$0xff]   ;;  %v5929_v56 = vld [vmem:[%s6756_s3 + $0x20] sm:$0xff]  }
  0x46   :  { %967 = vst.msk [vmem:[#allocation2 + $0xf0] sm:$0xf] %vm843_vm1, %v5571_v29  ;;  %971 = vst.msk [vmem:[#allocation2 + $0xf8] sm:$0xf] %vm843_vm1, %v5571_v29  ;;  %5247 = vmatpush3.bf16.msra.mxu1 %v5465_v44  ;;  %v868_v53 = vld [vmem:[#allocation2 + $0x2c] sm:$0x1] }
  0x47   :  { %975 = vst.msk [vmem:[#allocation2 + $0x100] sm:$0xf] %vm843_vm1, %v5571_v29  ;;  %979 = vst.msk [vmem:[#allocation2 + $0x108] sm:$0xf] %vm843_vm1, %v5571_v29  ;;  %5060 = vmatprep.subr.bf16.mxu1 %v5929_v56  ;;  %v5473_v57 = vld [vmem:[%s6756_s3 + $0x10] sm:$0xff]   ;;  %v5475_v1 = vld [vmem:[%s6756_s3 + $0x18] sm:$0xff]  }
  0x48   :  { %983 = vst.msk [vmem:[#allocation2 + $0x110] sm:$0xf] %vm843_vm1, %v5571_v29  ;;  %987 = vst.msk [vmem:[#allocation2 + $0x118] sm:$0xf] %vm843_vm1, %v5571_v29  ;;  %5020 = vmatprep.subr.bf16.mxu0 %v5473_v57  ;;  %v892_v58 = vld [vmem:[#allocation2 + $0x5c] sm:$0x1] }
  0x49   :  { %991 = vst.msk [vmem:[#allocation2 + $0x120] sm:$0xf] %vm843_vm1, %v5571_v29  ;;  %995 = vst.msk [vmem:[#allocation2 + $0x128] sm:$0xf] %vm843_vm1, %v5571_v29  ;;  %5021 = vmatpush3.bf16.msra.mxu0 %v5473_v57  ;;  %v884_v59 = vld [vmem:[#allocation2 + $0x4c] sm:$0x1] }
  0x4a   :  { %4985 = vmatmul.mubr.msk.bf16.gmra.mrb[28].mxu0 %vm297_vm0, %v5447_v19  ;;  %999 = vst.msk [vmem:[#allocation2 + $0x130] sm:$0xf] %vm843_vm1, %v5571_v29  ;;  %1003 = vst.msk [vmem:[#allocation2 + $0x138] sm:$0xf] %vm843_vm1, %v5571_v29  ;;  %v896_v62 = vld [vmem:[#allocation2 + $0x64] sm:$0x1]  ;;  %5022 = vmatprep.subr.bf16.mxu0 %v5475_v1 }
  0x4b   :  { %4988 = vmatprep.mubr.msk.bf16.mxu0 %vm297_vm0, %v5448_v20  ;;  %1007 = vst.msk [vmem:[#allocation2 + $0x140] sm:$0xf] %vm843_vm1, %v5571_v29  ;;  %1011 = vst.msk [vmem:[#allocation2 + $0x148] sm:$0xf] %vm843_vm1, %v5571_v29  ;;  %v888_v63 = vld [vmem:[#allocation2 + $0x54] sm:$0x1] }
  0x4c   :  { %1015 = vst.msk [vmem:[#allocation2 + $0x150] sm:$0xf] %vm843_vm1, %v5571_v29  ;;  %1019 = vst.msk [vmem:[#allocation2 + $0x158] sm:$0xf] %vm843_vm1, %v5571_v29  ;;  %v920_v3 = vld [vmem:[#allocation2 + $0x94] sm:$0x1] }
  0x4d   :  { %1027 = vst.msk [vmem:[#allocation2 + $0x168] sm:$0xf] %vm843_vm1, %v5571_v29  ;;  %1031 = vst.msk [vmem:[#allocation2 + $0x170] sm:$0xf] %vm843_vm1, %v5571_v29  ;;  %5023 = vmatpush3.bf16.msra.mxu0 %v5475_v1  ;;  %v924_v4 = vld [vmem:[#allocation2 + $0x9c] sm:$0x1] }
  0x4e   :  { %1035 = vst.msk [vmem:[#allocation2 + $0x178] sm:$0xf] %vm843_vm1, %v5571_v29  ;;  %1039 = vst.msk [vmem:[#allocation2 + $0x180] sm:$0xf] %vm843_vm1, %v5571_v29  ;;  %5040 = vmatprep.subr.bf16.mxu0 %v5464_v43  ;;  %v928_v5 = vld [vmem:[#allocation2 + $0xa4] sm:$0x1] }
  0x4f   :  { %1043 = vst.msk [vmem:[#allocation2 + $0x188] sm:$0xf] %vm843_vm1, %v5571_v29  ;;  %1047 = vst.msk [vmem:[#allocation2 + $0x190] sm:$0xf] %vm843_vm1, %v5571_v29  ;;  %v932_v6 = vld [vmem:[#allocation2 + $0xac] sm:$0x1] }
  0x50   :  { %1051 = vst.msk [vmem:[#allocation2 + $0x198] sm:$0xf] %vm843_vm1, %v5571_v29  ;;  %1055 = vst.msk [vmem:[#allocation2 + $0x1a0] sm:$0xf] %vm843_vm1, %v5571_v29  ;;  %v936_v7 = vld [vmem:[#allocation2 + $0xb4] sm:$0x1] }
  0x51   :  { %1063 = vst.msk [vmem:[#allocation2 + $0x1b0] sm:$0xf] %vm843_vm1, %v5571_v29  ;;  %1067 = vst.msk [vmem:[#allocation2 + $0x1b8] sm:$0xf] %vm843_vm1, %v5571_v29  ;;  %v940_v8 = vld [vmem:[#allocation2 + $0xbc] sm:$0x1] }
  0x52   :  { %4989 = vmatmul.mubr.msk.bf16.gmra.mrb[32].mxu0 %vm297_vm0, %v5449_v21  ;;  %1071 = vst.msk [vmem:[#allocation2 + $0x1c0] sm:$0xf] %vm843_vm1, %v5571_v29  ;;  %1075 = vst.msk [vmem:[#allocation2 + $0x1c8] sm:$0xf] %vm843_vm1, %v5571_v29  ;;  %v944_v9 = vld [vmem:[#allocation2 + $0xc4] sm:$0x1] }
  0x53   :  { %4992 = vmatprep.mubr.msk.bf16.mxu0 %vm297_vm0, %v5450_v22  ;;  %1079 = vst.msk [vmem:[#allocation2 + $0x1d0] sm:$0xf] %vm843_vm1, %v5571_v29  ;;  %1083 = vst.msk [vmem:[#allocation2 + $0x1d8] sm:$0xf] %vm843_vm1, %v5571_v29  ;;  %v948_v10 = vld [vmem:[#allocation2 + $0xcc] sm:$0x1] }
  0x54   :  { %1087 = vst.msk [vmem:[#allocation2 + $0x1e0] sm:$0xf] %vm843_vm1, %v5571_v29  ;;  %1091 = vst.msk [vmem:[#allocation2 + $0x1e8] sm:$0xf] %vm843_vm1, %v5571_v29  ;;  %v952_v11 = vld [vmem:[#allocation2 + $0xd4] sm:$0x1] }
  0x55   :  { %1099 = vst.msk [vmem:[#allocation2 + $0x1f8] sm:$0xf] %vm843_vm1, %v5571_v29  ;;  %1103 = vst.msk [vmem:[#allocation2 + $0x200] sm:$0xf] %vm843_vm1, %v5571_v29  ;;  %v956_v12 = vld [vmem:[#allocation2 + $0xdc] sm:$0x1] }
  0x56   :  { %1107 = vst.msk [vmem:[#allocation2 + $0x208] sm:$0xf] %vm843_vm1, %v5571_v29  ;;  %1111 = vst.msk [vmem:[#allocation2 + $0x210] sm:$0xf] %vm843_vm1, %v5571_v29  ;;  %v960_v13 = vld [vmem:[#allocation2 + $0xe4] sm:$0x1] }
  0x57   :  { %1115 = vst.msk [vmem:[#allocation2 + $0x218] sm:$0xf] %vm843_vm1, %v5571_v29  ;;  %1119 = vst.msk [vmem:[#allocation2 + $0x220] sm:$0xf] %vm843_vm1, %v5571_v29  ;;  %v964_v14 = vld [vmem:[#allocation2 + $0xec] sm:$0x1] }
  0x58   :  { %1123 = vst.msk [vmem:[#allocation2 + $0x228] sm:$0xf] %vm843_vm1, %v5571_v29  ;;  %1127 = vst.msk [vmem:[#allocation2 + $0x230] sm:$0xf] %vm843_vm1, %v5571_v29  ;;  %v968_v15 = vld [vmem:[#allocation2 + $0xf4] sm:$0x1] }
  0x59   :  { %vm5879_vm4 = vmand %vm845_vm2, %vm846_vm3  ;;  %v972_v16 = vld [vmem:[#allocation2 + $0xfc] sm:$0x1]  ;;  %v976_v17 = vld [vmem:[#allocation2 + $0x104] sm:$0x1]  ;;  %vm1844_vm6 = vsmask.f32 3328 }
  0x5a   :  { %4993 = vmatmul.mubr.msk.bf16.gmra.mrb[36].mxu0 %vm297_vm0, %v5451_v23  ;;  %v849_v34 = vsel %vm5879_vm4, 0, %v848_v33  ;;  %v857_v37 = vsel %vm5879_vm4, 0, %v856_v35  ;;  %v853_v38 = vsel %vm5879_vm4, 0, %v852_v36  ;;  %v861_v40 = vsel %vm5879_vm4, 0, %v860_v39  ;;  %v980_v18 = vld [vmem:[#allocation2 + $0x10c] sm:$0x1] }
  0x5b   :  { %4996 = vmatprep.mubr.msk.bf16.mxu0 %vm297_vm0, %v5452_v24  ;;  %850 = vst [vmem:[#allocation2 + $0x4] sm:$0x1] %v849_v34  ;;  %858 = vst [vmem:[#allocation2 + $0x14] sm:$0x1] %v857_v37  ;;  %v873_v49 = vsel %vm5879_vm4, 0, %v872_v47  ;;  %v865_v50 = vsel %vm5879_vm4, 0, %v864_v48 }
  0x5c   :  { %854 = vst [vmem:[#allocation2 + $0xc] sm:$0x1] %v853_v38  ;;  %862 = vst [vmem:[#allocation2 + $0x1c] sm:$0x1] %v861_v40  ;;  %v877_v54 = vsel %vm5879_vm4, 0, %v876_v51  ;;  %v869_v55 = vsel %vm5879_vm4, 0, %v868_v53 }
  0x5d   :  { %874 = vst [vmem:[#allocation2 + $0x34] sm:$0x1] %v873_v49  ;;  %866 = vst [vmem:[#allocation2 + $0x24] sm:$0x1] %v865_v50  ;;  %v893_v60 = vsel %vm5879_vm4, 0, %v892_v58  ;;  %v885_v61 = vsel %vm5879_vm4, 0, %v884_v59 }
  0x5e   :  { %878 = vst [vmem:[#allocation2 + $0x3c] sm:$0x1] %v877_v54  ;;  %870 = vst [vmem:[#allocation2 + $0x2c] sm:$0x1] %v869_v55  ;;  %v897_v0 = vsel %vm5879_vm4, 0, %v896_v62  ;;  %v889_v2 = vsel %vm5879_vm4, 0, %v888_v63 }
  0x5f   :  { %894 = vst [vmem:[#allocation2 + $0x5c] sm:$0x1] %v893_v60  ;;  %886 = vst [vmem:[#allocation2 + $0x4c] sm:$0x1] %v885_v61  ;;  %v984_v19 = vld [vmem:[#allocation2 + $0x114] sm:$0x1] }
  0x60   :  { %898 = vst [vmem:[#allocation2 + $0x64] sm:$0x1] %v897_v0  ;;  %890 = vst [vmem:[#allocation2 + $0x54] sm:$0x1] %v889_v2  ;;  %v988_v20 = vld [vmem:[#allocation2 + $0x11c] sm:$0x1] }
  0x61   :  { %v5947_v21 = vld [vmem:[#allocation2 + $0x164] sm:$0x1]  ;;  %v5949_v22 = vld [vmem:[#allocation2 + $0x1ac] sm:$0x1]  ;;  %v5951_v23 = vld [vmem:[#allocation2 + $0x1b4] sm:$0x1] }
  0x62   :  { %4997 = vmatmul.mubr.msk.bf16.gmra.mrb[40].mxu0 %vm297_vm0, %v5453_v25  ;;  %v5953_v24 = vld [vmem:[#allocation2 + $0x1bc] sm:$0x1]  ;;  %v921_v25 = vsel %vm5879_vm4, 0, %v920_v3  ;;  %v5963_v29 = vld [vmem:[#allocation2 + $0x1d4] sm:$0x1]  ;;  %v933_v33 = vsel %vm5879_vm4, 0, %v932_v6 }
  0x63   :  { %5000 = vmatprep.mubr.msk.bf16.mxu0 %vm297_vm0, %v5454_v26  ;;  %v925_v26 = vsel %vm5879_vm4, 0, %v924_v4  ;;  %v937_v34 = vsel %vm5879_vm4, 0, %v936_v7  ;;  %v941_v35 = vsel %vm5879_vm4, 0, %v940_v8  ;;  %922 = vst [vmem:[#allocation2 + $0x94] sm:$0x1] %v921_v25  ;;  %v945_v40 = vsel %vm5879_vm4, 0, %v944_v9 }
  0x64   :  { %926 = vst [vmem:[#allocation2 + $0x9c] sm:$0x1] %v925_v26  ;;  %v5975_v36 = vld [vmem:[#allocation2 + $0x1e4] sm:$0x1]  ;;  %v5977_v37 = vld [vmem:[#allocation2 + $0x1ec] sm:$0x1] }
  0x65   :  { %v5979_v38 = vld [vmem:[#allocation2 + $0x1f4] sm:$0x1]  ;;  %v5981_v39 = vld [vmem:[#allocation2 + $0x1fc] sm:$0x1]  ;;  %v957_v43 = vsel %vm5879_vm4, 0, %v956_v12  ;;  %v961_v48 = vsel %vm5879_vm4, 0, %v960_v13 }
  0x66   :  { %934 = vst [vmem:[#allocation2 + $0xac] sm:$0x1] %v933_v33  ;;  %938 = vst [vmem:[#allocation2 + $0xb4] sm:$0x1] %v937_v34  ;;  %v5991_v44 = vld [vmem:[#allocation2 + $0x204] sm:$0x1] }
  0x67   :  { %942 = vst [vmem:[#allocation2 + $0xbc] sm:$0x1] %v941_v35  ;;  %v5997_v47 = vld [vmem:[#allocation2 + $0x21c] sm:$0x1]  ;;  %v965_v49 = vsel %vm5879_vm4, 0, %v964_v14  ;;  %v969_v50 = vsel %vm5879_vm4, 0, %v968_v15 }
  0x68   :  { %v973_v51 = vsel %vm5879_vm4, 0, %v972_v16  ;;  %946 = vst [vmem:[#allocation2 + $0xc4] sm:$0x1] %v945_v40  ;;  %958 = vst [vmem:[#allocation2 + $0xdc] sm:$0x1] %v957_v43  ;;  %v977_v55 = vsel %vm5879_vm4, 0, %v976_v17 }
  0x69   :  { %v1124_v53 = vld [vmem:[#allocation2 + $0x22c] sm:$0x1]  ;;  %v1128_v54 = vld [vmem:[#allocation2 + $0x234] sm:$0x1]  ;;  %v981_v57 = vsel %vm5879_vm4, 0, %v980_v18  ;;  %v985_v58 = vsel %vm5879_vm4, 0, %v984_v19 }
  0x6a   :  { %5001 = vmatmul.mubr.msk.bf16.gmra.mrb[44].mxu0 %vm297_vm0, %v5455_v27  ;;  %v5959_v27 = vld [vmem:[#allocation2 + $0x1c4] sm:$0x1]  ;;  %v989_v59 = vsel %vm5879_vm4, 0, %v988_v20  ;;  %962 = vst [vmem:[#allocation2 + $0xe4] sm:$0x1] %v961_v48  ;;  %v1025_v61 = vsel %vm5879_vm4, 0, %v5947_v21 }
  0x6b   :  { %5004 = vmatprep.mubr.msk.bf16.mxu0 %vm297_vm0, %v5456_v28  ;;  %v5961_v28 = vld [vmem:[#allocation2 + $0x1cc] sm:$0x1]  ;;  %966 = vst [vmem:[#allocation2 + $0xec] sm:$0x1] %v965_v49  ;;  %970 = vst [vmem:[#allocation2 + $0xf4] sm:$0x1] %v969_v50 }
  0x6c   :  { %974 = vst [vmem:[#allocation2 + $0xfc] sm:$0x1] %v973_v51  ;;  %v1132_v60 = vld [vmem:[#allocation2 + $0x23c] sm:$0x1]  ;;  %v1061_v62 = vsel %vm5879_vm4, 0, %v5949_v22  ;;  %v1065_v63 = vsel %vm5879_vm4, 0, %v5951_v23 }
  0x6d   :  { %v1069_v0 = vsel %vm5879_vm4, 0, %v5953_v24  ;;  %978 = vst [vmem:[#allocation2 + $0x104] sm:$0x1] %v977_v55  ;;  %982 = vst [vmem:[#allocation2 + $0x10c] sm:$0x1] %v981_v57  ;;  %v1073_v1 = vsel %vm5879_vm4, 0, %v5959_v27 }
  0x6e   :  { %986 = vst [vmem:[#allocation2 + $0x114] sm:$0x1] %v985_v58  ;;  %990 = vst [vmem:[#allocation2 + $0x11c] sm:$0x1] %v989_v59  ;;  %v1077_v2 = vsel %vm5879_vm4, 0, %v5961_v28  ;;  %v1081_v3 = vsel %vm5879_vm4, 0, %v5963_v29 }
  0x6f   :  { %1026 = vst [vmem:[#allocation2 + $0x164] sm:$0x1] %v1025_v61  ;;  %1062 = vst [vmem:[#allocation2 + $0x1ac] sm:$0x1] %v1061_v62  ;;  %v1089_v6 = vsel %vm5879_vm4, 0, %v5975_v36  ;;  %v1093_v7 = vsel %vm5879_vm4, 0, %v5977_v37 }
  0x70   :  { %1066 = vst [vmem:[#allocation2 + $0x1b4] sm:$0x1] %v1065_v63  ;;  %1070 = vst [vmem:[#allocation2 + $0x1bc] sm:$0x1] %v1069_v0  ;;  %v1097_v8 = vsel %vm5879_vm4, 0, %v5979_v38  ;;  %v1101_v9 = vsel %vm5879_vm4, 0, %v5981_v39 }
  0x71   :  { %1074 = vst [vmem:[#allocation2 + $0x1c4] sm:$0x1] %v1073_v1  ;;  %1078 = vst [vmem:[#allocation2 + $0x1cc] sm:$0x1] %v1077_v2  ;;  %v1117_v14 = vsel %vm5879_vm4, 0, %v5997_v47  ;;  %v1125_v17 = vsel %vm5879_vm4, 0, %v1124_v53 }
  0x72   :  { %5005 = vmatmul.mubr.msk.bf16.gmra.mrb[48].mxu0 %vm297_vm0, %v5457_v30  ;;  %v5965_v30 = vld [vmem:[#allocation2 + $0x1dc] sm:$0x1]  ;;  %1082 = vst [vmem:[#allocation2 + $0x1d4] sm:$0x1] %v1081_v3  ;;  %1090 = vst [vmem:[#allocation2 + $0x1e4] sm:$0x1] %v1089_v6 }
  0x73   :  { %5008 = vmatprep.mubr.msk.bf16.mxu0 %vm297_vm0, %v5458_v31  ;;  %v929_v31 = vsel %vm5879_vm4, 0, %v928_v5  ;;  %v1085_v4 = vsel %vm5879_vm4, 0, %v5965_v30  ;;  %v900_v5 = vld [vmem:[#allocation2 + $0x6c] sm:$0x1]  ;;  %1094 = vst [vmem:[#allocation2 + $0x1ec] sm:$0x1] %v1093_v7 }
  0x74   :  { %930 = vst [vmem:[#allocation2 + $0xa4] sm:$0x1] %v929_v31  ;;  %1086 = vst [vmem:[#allocation2 + $0x1dc] sm:$0x1] %v1085_v4  ;;  %v908_v15 = vld [vmem:[#allocation2 + $0x7c] sm:$0x1] }
  0x75   :  { %1098 = vst [vmem:[#allocation2 + $0x1f4] sm:$0x1] %v1097_v8  ;;  %1102 = vst [vmem:[#allocation2 + $0x1fc] sm:$0x1] %v1101_v9  ;;  %v1129_v18 = vsel %vm5879_vm4, 0, %v1128_v54  ;;  %v1133_v19 = vsel %vm5879_vm4, 0, %v1132_v60 }
  0x76   :  { %1118 = vst [vmem:[#allocation2 + $0x21c] sm:$0x1] %v1117_v14  ;;  %v912_v20 = vld [vmem:[#allocation2 + $0x84] sm:$0x1]  ;;  %1126 = vst [vmem:[#allocation2 + $0x22c] sm:$0x1] %v1125_v17 }
  0x77   :  { %1130 = vst [vmem:[#allocation2 + $0x234] sm:$0x1] %v1129_v18  ;;  %1134 = vst [vmem:[#allocation2 + $0x23c] sm:$0x1] %v1133_v19  ;;  %v901_v21 = vsel %vm5879_vm4, 0, %v900_v5  ;;  %v909_v23 = vsel %vm5879_vm4, 0, %v908_v15 }
  0x78   :  { %902 = vst [vmem:[#allocation2 + $0x6c] sm:$0x1] %v901_v21  ;;  %910 = vst [vmem:[#allocation2 + $0x7c] sm:$0x1] %v909_v23  ;;  %v913_v24 = vsel %vm5879_vm4, 0, %v912_v20 }
  0x79   :  { %914 = vst [vmem:[#allocation2 + $0x84] sm:$0x1] %v913_v24  ;;  %v1000_v25 = vld [vmem:[#allocation2 + $0x134] sm:$0x1]  ;;  %v992_v26 = vld [vmem:[#allocation2 + $0x124] sm:$0x1] }
  0x7a   :  { %5009 = vmatmul.mubr.msk.bf16.gmra.mrb[52].mxu0 %vm297_vm0, %v5459_v41  ;;  %v949_v41 = vsel %vm5879_vm4, 0, %v948_v10  ;;  %v904_v10 = vld [vmem:[#allocation2 + $0x74] sm:$0x1]  ;;  %v1001_v27 = vsel %vm5879_vm4, 0, %v1000_v25  ;;  %v993_v28 = vsel %vm5879_vm4, 0, %v992_v26 }
  0x7b   :  { %5012 = vmatprep.mubr.msk.bf16.mxu0 %vm297_vm0, %v5460_v42  ;;  %v953_v42 = vsel %vm5879_vm4, 0, %v952_v11  ;;  %950 = vst [vmem:[#allocation2 + $0xcc] sm:$0x1] %v949_v41  ;;  %v1105_v11 = vsel %vm5879_vm4, 0, %v5991_v44  ;;  %v905_v22 = vsel %vm5879_vm4, 0, %v904_v10 }
  0x7c   :  { %954 = vst [vmem:[#allocation2 + $0xd4] sm:$0x1] %v953_v42  ;;  %1106 = vst [vmem:[#allocation2 + $0x204] sm:$0x1] %v1105_v11  ;;  %v1004_v29 = vld [vmem:[#allocation2 + $0x13c] sm:$0x1] }
  0x7d   :  { %906 = vst [vmem:[#allocation2 + $0x74] sm:$0x1] %v905_v22  ;;  %1002 = vst [vmem:[#allocation2 + $0x134] sm:$0x1] %v1001_v27  ;;  %v996_v30 = vld [vmem:[#allocation2 + $0x12c] sm:$0x1] }
  0x7e   :  { %994 = vst [vmem:[#allocation2 + $0x124] sm:$0x1] %v993_v28  ;;  %v1005_v31 = vsel %vm5879_vm4, 0, %v1004_v29  ;;  %v997_v33 = vsel %vm5879_vm4, 0, %v996_v30  ;;  %v1016_v34 = vld [vmem:[#allocation2 + $0x154] sm:$0x1] }
  0x7f   :  { %1006 = vst [vmem:[#allocation2 + $0x13c] sm:$0x1] %v1005_v31  ;;  %998 = vst [vmem:[#allocation2 + $0x12c] sm:$0x1] %v997_v33  ;;  %v1008_v35 = vld [vmem:[#allocation2 + $0x144] sm:$0x1] }
  0x80   :  { %v1017_v36 = vsel %vm5879_vm4, 0, %v1016_v34  ;;  %v1009_v37 = vsel %vm5879_vm4, 0, %v1008_v35  ;;  %v1020_v38 = vld [vmem:[#allocation2 + $0x15c] sm:$0x1]  ;;  %v1012_v39 = vld [vmem:[#allocation2 + $0x14c] sm:$0x1] }
  0x81   :  { %1018 = vst [vmem:[#allocation2 + $0x154] sm:$0x1] %v1017_v36  ;;  %1010 = vst [vmem:[#allocation2 + $0x144] sm:$0x1] %v1009_v37  ;;  %v1021_v40 = vsel %vm5879_vm4, 0, %v1020_v38  ;;  %v1013_v41 = vsel %vm5879_vm4, 0, %v1012_v39 }
  0x82   :  { %5013 = vmatmul.mubr.msk.bf16.gmra.mrb[56].mxu0 %vm297_vm0, %v5461_v45  ;;  %v5993_v45 = vld [vmem:[#allocation2 + $0x20c] sm:$0x1]  ;;  %1022 = vst [vmem:[#allocation2 + $0x15c] sm:$0x1] %v1021_v40  ;;  %1014 = vst [vmem:[#allocation2 + $0x14c] sm:$0x1] %v1013_v41 }
  0x83   :  { %5016 = vmatprep.mubr.msk.bf16.mxu0 %vm297_vm0, %v5462_v46  ;;  %v5995_v46 = vld [vmem:[#allocation2 + $0x214] sm:$0x1]  ;;  %v1109_v12 = vsel %vm5879_vm4, 0, %v5993_v45  ;;  %v1813_v42 = vld [vmem:[#allocation2 + $0x4] sm:$0x1] }
  0x84   :  { %v1113_v13 = vsel %vm5879_vm4, 0, %v5995_v46  ;;  %1110 = vst [vmem:[#allocation2 + $0x20c] sm:$0x1] %v1109_v12  ;;  %v1815_v43 = vld [vmem:[#allocation2 + $0xc] sm:$0x1] }
  0x85   :  { %1114 = vst [vmem:[#allocation2 + $0x214] sm:$0x1] %v1113_v13  ;;  %v1817_v44 = vld [vmem:[#allocation2 + $0x14] sm:$0x1]  ;;  %v6098_v45 = vld [vmem:[%s6755_s2] ss:$0 sm:$0xff] }
  0x86   :  { %v1819_v46 = vld [vmem:[#allocation2 + $0x1c] sm:$0x1]  ;;  %v1821_v47 = vld [vmem:[#allocation2 + $0x24] sm:$0x1]  ;;  %v1823_v49 = vld [vmem:[#allocation2 + $0x2c] sm:$0x1] }
  0x87   :  { %v1036_v48 = vld [vmem:[#allocation2 + $0x17c] sm:$0x1]  ;;  %v1028_v50 = vld [vmem:[#allocation2 + $0x16c] sm:$0x1]  ;;  %v1885_v53 = vshll.u32 %v1817_v44, 16  ;;  %v1871_v57 = vshll.u32 %v1815_v43, 16 }
  0x88   :  { %v1037_v51 = vsel %vm5879_vm4, 0, %v1036_v48  ;;  %v1029_v54 = vsel %vm5879_vm4, 0, %v1028_v50  ;;  %v1040_v55 = vld [vmem:[#allocation2 + $0x184] sm:$0x1]  ;;  %v1899_v58 = vshll.u32 %v1819_v46, 16  ;;  %v1913_v62 = vshll.u32 %v1821_v47, 16 }
  0x89   :  { %1038 = vst [vmem:[#allocation2 + $0x17c] sm:$0x1] %v1037_v51  ;;  %1030 = vst [vmem:[#allocation2 + $0x16c] sm:$0x1] %v1029_v54  ;;  %v1032_v59 = vld [vmem:[#allocation2 + $0x174] sm:$0x1] }
  0x8a   :  { %5017 = vmatmul.mubr.msk.bf16.gmra.mrb[60].mxu0 %vm297_vm0, %v5463_v52  ;;  %v1120_v52 = vld [vmem:[#allocation2 + $0x224] sm:$0x1]  ;;  %v1041_v60 = vsel %vm5879_vm4, 0, %v1040_v55  ;;  %v1927_v63 = vshll.u32 %v1823_v49, 16  ;;  %v1033_v0 = vsel %vm5879_vm4, 0, %v1032_v59  ;;  %v6112_v6 = vrot.slane %v1885_v53, 5 }
  0x8b   :  { %v1121_v16 = vsel %vm5879_vm4, 0, %v1120_v52  ;;  %v1857_v52 = vshll.u32 %v1813_v42, 16  ;;  %1042 = vst [vmem:[#allocation2 + $0x184] sm:$0x1] %v1041_v60  ;;  %1034 = vst [vmem:[#allocation2 + $0x174] sm:$0x1] %v1033_v0 }
  0x8c   :  { %1122 = vst [vmem:[#allocation2 + $0x224] sm:$0x1] %v1121_v16  ;;  %v6115_v10 = vrot.slane %v1871_v57, 5  ;;  %v6117_v11 = vrot.slane %v1899_v58, 5  ;;  %v1825_v12 = vld [vmem:[#allocation2 + $0x34] sm:$0x1] }
  0x8d   :  { %v6110_v5 = vrot.slane %v1857_v52, 5  ;;  %v6120_v15 = vrot.slane %v1913_v62, 5  ;;  %v6122_v16 = vrot.slane %v1927_v63, 5  ;;  %v1827_v17 = vld [vmem:[#allocation2 + $0x3c] sm:$0x1]  ;;  %v1941_v24 = vshll.u32 %v1825_v12, 16 }
  0x8e   :  { %v1829_v20 = vld [vmem:[#allocation2 + $0x4c] sm:$0x1]  ;;  %v1831_v25 = vld [vmem:[#allocation2 + $0x54] sm:$0x1]  ;;  %v1955_v29 = vshll.u32 %v1827_v17, 16 }
  0x8f   :  { %v1044_v21 = vld [vmem:[#allocation2 + $0x18c] sm:$0x1]  ;;  %v1833_v30 = vld [vmem:[#allocation2 + $0x5c] sm:$0x1]  ;;  %v1048_v31 = vld [vmem:[#allocation2 + $0x194] sm:$0x1] }
  0x90   :  { %v1045_v26 = vsel %vm5879_vm4, 0, %v1044_v21  ;;  %v1835_v36 = vld [vmem:[#allocation2 + $0x64] sm:$0x1]  ;;  %v1052_v37 = vld [vmem:[#allocation2 + $0x19c] sm:$0x1]  ;;  %v1969_v41 = vshll.u32 %v1829_v20, 16 }
  0x91   :  { %1046 = vst [vmem:[#allocation2 + $0x18c] sm:$0x1] %v1045_v26  ;;  %v1983_v42 = vshll.u32 %v1831_v25, 16  ;;  %v1056_v43 = vld [vmem:[#allocation2 + $0x1a4] sm:$0x1]  ;;  %v1997_v48 = vshll.u32 %v1833_v30, 16 }
  0x92   :  { %v1049_v49 = vsel %vm5879_vm4, 0, %v1048_v31  ;;  %v2011_v53 = vshll.u32 %v1835_v36, 16  ;;  %v1053_v54 = vsel %vm5879_vm4, 0, %v1052_v37  ;;  %v6138_v58 = vrot.slane %v1941_v24, 5  ;;  %v6140_v59 = vld [vmem:[#allocation2 + $0x6c] sm:$0x1] }
  0x93   :  { %1050 = vst [vmem:[#allocation2 + $0x194] sm:$0x1] %v1049_v49  ;;  %1054 = vst [vmem:[#allocation2 + $0x19c] sm:$0x1] %v1053_v54  ;;  %v1057_v60 = vsel %vm5879_vm4, 0, %v1056_v43  ;;  %v6144_v63 = vrot.slane %v1955_v29, 5 }
  0x94   :  { %v6146_v0 = vrot.slane %v1969_v41, 5  ;;  %1058 = vst [vmem:[#allocation2 + $0x1a4] sm:$0x1] %v1057_v60  ;;  %v6152_v12 = vrot.slane %v2011_v53, 5  ;;  %v6159_v26 = vld [vmem:[#allocation2 + $0x84] sm:$0x1] }
  0x95   :  { %vm1845_vm7 = vsmask.f32 7440 }
  0x96   :  { %vm6202_vm8 = vmor %vm1844_vm6, %vm1845_vm7 }
  0xe5   :  { %v4958_v61 = vpop.f32.mrb[0].mxu0 }
  0xe6   :  { %v437_v1 = vadd.f32 %v4958_v61, %v6098_v45  ;;  %v428_v2 = vpop.f32.mrb[1].mxu0 }
  0xe7   :  { %v429_v3 = vadd.f32 %v6098_v45, %v428_v2  ;;  %v4959_v4 = vpop.f32.mrb[2].mxu0 }
  0xe8   :  { %v685_v7 = vmax.f32 %v437_v1, 0.0  ;;  %v440_v8 = vadd.f32 %v4959_v4, %v6098_v45  ;;  %v431_v9 = vpop.f32.mrb[3].mxu0  ;;  %v6150_v4 = vrot.slane %v1997_v48, 5 }
  0xe9   :  { %v683_v13 = vmax.f32 %v429_v3, 0.0  ;;  %v432_v14 = vadd.f32 %v6098_v45, %v431_v9  ;;  %v6148_v3 = vrot.slane %v1983_v42, 5  ;;  %v2067_v42 = vshll.u32 %v6159_v26, 16 }
  0xea   :  { %v749_v18 = vmin.f32 %v685_v7, 6.0  ;;  %v686_v19 = vmax.f32 %v440_v8, 0.0  ;;  %v1839_v7 = vld [vmem:[#allocation2 + $0x74] sm:$0x1] }
  0xeb   :  { %v747_v22 = vmin.f32 %v683_v13, 6.0  ;;  %v684_v23 = vmax.f32 %v432_v14, 0.0  ;;  %v2025_v13 = vshll.u32 %v6140_v59, 16  ;;  %v6155_v14 = vld [vmem:[#allocation2 + $0x7c] sm:$0x1]  ;;  %v2039_v25 = vshll.u32 %v1839_v7, 16 }
  0xec   :  { %v4738_v27 = vpack.c.bf16 %v749_v18, %v749_v18  ;;  %v750_v28 = vmin.f32 %v686_v19, 6.0  ;;  %v2053_v41 = vshll.u32 %v6155_v14, 16  ;;  %v6364_v14 = vld [vmem:[%s6755_s2] ss:$0 sm:$0xff] }
  0xed   :  { %v4736_v33 = vpack.c.bf16 %v747_v22, %v747_v22  ;;  %v748_v34 = vmin.f32 %v684_v23, 6.0  ;;  %v4962_v35 = vpop.f32.mrb[4].mxu0 }
  0xee   :  { %1361 = vst.msk [vmem:[#allocation2 + $0x10] sm:$0xf] %vm843_vm1, %v4738_v27  ;;  %v4739_v38 = vpack.c.bf16 %v750_v28, %v750_v28  ;;  %v453_v39 = vadd.f32 %v4962_v35, %v6098_v45  ;;  %v444_v40 = vpop.f32.mrb[5].mxu0 }
  0xef   :  { %1359 = vst.msk [vmem:[#allocation2] sm:$0xf] %vm843_vm1, %v4736_v33  ;;  %v4737_v44 = vpack.c.bf16 %v748_v34, %v748_v34  ;;  %v445_v46 = vadd.f32 %v6098_v45, %v444_v40  ;;  %v4963_v47 = vpop.f32.mrb[6].mxu0 }
  0xf0   :  { %1362 = vst.msk [vmem:[#allocation2 + $0x18] sm:$0xf] %vm843_vm1, %v4739_v38  ;;  %v689_v50 = vmax.f32 %v453_v39, 0.0  ;;  %v456_v51 = vadd.f32 %v4963_v47, %v6098_v45  ;;  %v447_v52 = vpop.f32.mrb[7].mxu0 }
  0xf1   :  { %1360 = vst.msk [vmem:[#allocation2 + $0x8] sm:$0xf] %vm843_vm1, %v4737_v44  ;;  %v687_v55 = vmax.f32 %v445_v46, 0.0  ;;  %v448_v57 = vadd.f32 %v6098_v45, %v447_v52 }
  0xf2   :  { %v753_v61 = vmin.f32 %v689_v50, 6.0  ;;  %v690_v62 = vmax.f32 %v456_v51, 0.0 }
  0xf3   :  { %v751_v1 = vmin.f32 %v687_v55, 6.0  ;;  %v688_v2 = vmax.f32 %v448_v57, 0.0 }
  0xf4   :  { %v4742_v8 = vpack.c.bf16 %v753_v61, %v753_v61  ;;  %v754_v9 = vmin.f32 %v690_v62, 6.0 }
  0xf5   :  { %v4740_v17 = vpack.c.bf16 %v751_v1, %v751_v1  ;;  %v752_v18 = vmin.f32 %v688_v2, 6.0  ;;  %v4966_v19 = vpop.f32.mrb[8].mxu0  ;;  %v1816_v20 = vld [vmem:[#allocation2 + $0x10] sm:$0xf] }
  0xf6   :  { %1365 = vst.msk [vmem:[#allocation2 + $0x30] sm:$0xf] %vm843_vm1, %v4742_v8  ;;  %v4743_v21 = vpack.c.bf16 %v754_v9, %v754_v9  ;;  %v469_v22 = vadd.f32 %v4966_v19, %v6098_v45  ;;  %v460_v23 = vpop.f32.mrb[9].mxu0  ;;  %v1812_v24 = vld [vmem:[#allocation2] sm:$0xf]  ;;  %v1876_v37 = vshrl.u32 %v1816_v20, 16 }
  0xf7   :  { %1363 = vst.msk [vmem:[#allocation2 + $0x20] sm:$0xf] %vm843_vm1, %v4740_v17  ;;  %v4741_v27 = vpack.c.bf16 %v752_v18, %v752_v18  ;;  %v461_v28 = vadd.f32 %v6098_v45, %v460_v23  ;;  %v4967_v29 = vpop.f32.mrb[10].mxu0  ;;  %v1848_v30 = vshrl.u32 %v1812_v24, 16  ;;  %v1851_v31 = vshll.u32 %v1812_v24, 16 }
  0xf8   :  { %1366 = vst.msk [vmem:[#allocation2 + $0x38] sm:$0xf] %vm843_vm1, %v4743_v21  ;;  %v693_v33 = vmax.f32 %v469_v22, 0.0  ;;  %v472_v34 = vadd.f32 %v4967_v29, %v6098_v45  ;;  %v463_v35 = vpop.f32.mrb[11].mxu0  ;;  %v1814_v36 = vld [vmem:[#allocation2 + $0x8] sm:$0xf] }
  0xf9   :  { %v1879_v38 = vshll.u32 %v1816_v20, 16  ;;  %1364 = vst.msk [vmem:[#allocation2 + $0x28] sm:$0xf] %vm843_vm1, %v4741_v27  ;;  %v691_v39 = vmax.f32 %v461_v28, 0.0  ;;  %v464_v40 = vadd.f32 %v6098_v45, %v463_v35  ;;  %v1862_v46 = vshrl.u32 %v1814_v36, 16 }
  0xfa   :  { %v757_v43 = vmin.f32 %v693_v33, 6.0  ;;  %v694_v44 = vmax.f32 %v472_v34, 0.0  ;;  %v1865_v47 = vshll.u32 %v1814_v36, 16  ;;  %v1850_v50 = vrot.slane %v1848_v30, 4  ;;  %v1818_v54 = vld [vmem:[#allocation2 + $0x18] sm:$0xf] }
  0xfb   :  { %v755_v48 = vmin.f32 %v691_v39, 6.0  ;;  %v692_v49 = vmax.f32 %v464_v40, 0.0  ;;  %v1853_v51 = vrot.slane %v1851_v31, 5  ;;  %v1878_v55 = vrot.slane %v1876_v37, 4  ;;  %v5471_v31 = vld [vmem:[%s6756_s3 + $0x28] sm:$0xff]  }
  0xfc   :  { %v4746_v52 = vpack.c.bf16 %v757_v43, %v757_v43  ;;  %v758_v53 = vmin.f32 %v694_v44, 6.0  ;;  %v1881_v57 = vrot.slane %v1879_v38, 5  ;;  %v1864_v62 = vrot.slane %v1862_v46, 4 }
  0xfd   :  { %v4744_v59 = vpack.c.bf16 %v755_v48, %v755_v48  ;;  %v756_v60 = vmin.f32 %v692_v49, 6.0  ;;  %v4970_v61 = vpop.f32.mrb[12].mxu0  ;;  %v1867_v1 = vrot.slane %v1865_v47, 5  ;;  %v6171_v9 = vrot.slane %v2025_v13, 5  ;;  %v6192_v49 = vld [vmem:[%s6756_s3 + $0x30] sm:$0xff]  }
  0xfe   :  { %1369 = vst.msk [vmem:[#allocation2 + $0x58] sm:$0xf] %vm843_vm1, %v4746_v52  ;;  %v4747_v2 = vpack.c.bf16 %v758_v53, %v758_v53  ;;  %v485_v7 = vadd.f32 %v4970_v61, %v6098_v45  ;;  %v476_v8 = vpop.f32.mrb[13].mxu0  ;;  %v6173_v17 = vrot.slane %v2039_v25, 5  ;;  %v1854_v21 = vor.u32 %v1853_v51, %v1850_v50  ;;  %v1820_v23 = vld [vmem:[#allocation2 + $0x20] sm:$0xf] }
  0xff   :  { %1367 = vst.msk [vmem:[#allocation2 + $0x48] sm:$0xf] %vm843_vm1, %v4744_v59  ;;  %v4745_v18 = vpack.c.bf16 %v756_v60, %v756_v60  ;;  %v477_v19 = vadd.f32 %v6098_v45, %v476_v8  ;;  %v4971_v20 = vpop.f32.mrb[14].mxu0  ;;  %v1890_v22 = vshrl.u32 %v1818_v54, 16  ;;  %v5468_v30 = vld [vmem:[#allocation2 + $0x30] ss:$8 sps:$4 sm:$0xff]   ;;  %v1868_v33 = vor.u32 %v1867_v1, %v1864_v62 }
 0x100   :  { %1370 = vst.msk [vmem:[#allocation2 + $0x60] sm:$0xf] %vm843_vm1, %v4747_v2  ;;  %v697_v24 = vmax.f32 %v485_v7, 0.0  ;;  %v488_v27 = vadd.f32 %v4971_v20, %v6098_v45  ;;  %v479_v28 = vpop.f32.mrb[15].mxu0  ;;  %v5466_v29 = vld [vmem:[#allocation2 + $0x20] ss:$8 sps:$4 sm:$0xff]   ;;  %v1882_v34 = vor.u32 %v1881_v57, %v1878_v55 }
 0x101   :  { %1368 = vst.msk [vmem:[#allocation2 + $0x50] sm:$0xf] %vm843_vm1, %v4745_v18  ;;  %v695_v13 = vmax.f32 %v477_v19, 0.0  ;;  %v480_v25 = vadd.f32 %v6098_v45, %v479_v28  ;;  %5048 = vmatprep.mubr.msk.bf16.mxu1 %vm1517_vm5, %v5466_v29  ;;  %v1893_v37 = vshll.u32 %v1818_v54, 16  ;;  %v1904_v38 = vshrl.u32 %v1820_v23, 16 }
 0x102   :  { %v761_v35 = vmin.f32 %v697_v24, 6.0  ;;  %v698_v36 = vmax.f32 %v488_v27, 0.0  ;;  %5049 = vmatmul.mubr.msk.bf16.vlgmr.msra.gmra.mrb[0].mxu1 %vm1517_vm5, %v5468_v30  ;;  %v6186_v43 = vrot.slane %v1854_v21, 4  ;;  %v1822_v44 = vld [vmem:[#allocation2 + $0x28] sm:$0xf]  ;;  %v1907_v46 = vshll.u32 %v1820_v23, 16 }
 0x103   :  { %v759_v39 = vmin.f32 %v695_v13, 6.0  ;;  %v696_v40 = vmax.f32 %v480_v25, 0.0  ;;  %5061 = vmatpush3.bf16.msra.mxu1 %v5929_v56  ;;  %v1892_v50 = vrot.slane %v1890_v22, 4  ;;  %v1895_v51 = vrot.slane %v1893_v37, 5 }
 0x104   :  { %v4750_v47 = vpack.c.bf16 %v761_v35, %v761_v35  ;;  %v762_v48 = vmin.f32 %v698_v36, 6.0  ;;  %5062 = vmatprep.subr.bf16.mxu1 %v5471_v31  ;;  %v6194_v55 = vrot.slane %v1868_v33, 4  ;;  %v6196_v57 = vrot.slane %v1882_v34, 4  ;;  %v1824_v35 = vld [vmem:[#allocation2 + $0x30] sm:$0xf] }
 0x105   :  { %v4748_v52 = vpack.c.bf16 %v759_v39, %v759_v39  ;;  %v760_v53 = vmin.f32 %v696_v40, 6.0  ;;  %v4974_v54 = vpop.f32.mrb[16].mxu0  ;;  %v1906_v62 = vrot.slane %v1904_v38, 4  ;;  %v1918_v1 = vshrl.u32 %v1822_v44, 16  ;;  %v1826_v39 = vld [vmem:[#allocation2 + $0x38] sm:$0xf] }
 0x106   :  { %1373 = vst.msk [vmem:[#allocation2 + $0x78] sm:$0xf] %vm843_vm1, %v4750_v47  ;;  %v4751_v59 = vpack.c.bf16 %v762_v48, %v762_v48  ;;  %v501_v56 = vadd.f32 %v4974_v54, %v6098_v45  ;;  %v492_v60 = vpop.f32.mrb[17].mxu0  ;;  %v1909_v18 = vrot.slane %v1907_v46, 5  ;;  %v1921_v19 = vshll.u32 %v1822_v44, 16 }
 0x107   :  { %1371 = vst.msk [vmem:[#allocation2 + $0x68] sm:$0xf] %vm843_vm1, %v4748_v52  ;;  %v4749_v2 = vpack.c.bf16 %v760_v53, %v760_v53  ;;  %v493_v7 = vadd.f32 %v6098_v45, %v492_v60  ;;  %v4975_v8 = vpop.f32.mrb[18].mxu0  ;;  %5063 = vmatpush3.bf16.msra.mxu1 %v5471_v31  ;;  %v1896_v24 = vor.u32 %v1895_v51, %v1892_v50  ;;  %v5470_v29 = vld [vmem:[#allocation2 + $0x58] ss:$8 sps:$4 sm:$0xff]   ;;  %v1920_v33 = vrot.slane %v1918_v1, 4 }
 0x108   :  { %1374 = vst.msk [vmem:[#allocation2 + $0x80] sm:$0xf] %vm843_vm1, %v4751_v59  ;;  %v701_v20 = vmax.f32 %v501_v56, 0.0  ;;  %v504_v21 = vadd.f32 %v4975_v8, %v6098_v45  ;;  %v495_v22 = vpop.f32.mrb[19].mxu0  ;;  %v5469_v23 = vld [vmem:[#allocation2 + $0x48] ss:$8 sps:$4 sm:$0xff]   ;;  %v1860_v13 = vsel %vm6202_vm8, %v6186_v43, %v6110_v5  ;;  %5080 = vmatprep.subr.bf16.mxu1 %v6192_v49  ;;  %v1888_v25 = vsel %vm6202_vm8, %v6196_v57, %v6112_v6 }
 0x109   :  { %1372 = vst.msk [vmem:[#allocation2 + $0x70] sm:$0xf] %vm843_vm1, %v4749_v2  ;;  %v699_v27 = vmax.f32 %v493_v7, 0.0  ;;  %v496_v28 = vadd.f32 %v6098_v45, %v495_v22  ;;  %5052 = vmatprep.mubr.msk.bf16.mxu1 %vm1517_vm5, %v5469_v23  ;;  %v1923_v34 = vrot.slane %v1921_v19, 5  ;;  %v1874_v5 = vsel %vm6202_vm8, %v6194_v55, %v6115_v10  ;;  %v1828_v55 = vld [vmem:[#allocation2 + $0x48] sm:$0xf] }
 0x10a   :  { %v765_v30 = vmin.f32 %v701_v20, 6.0  ;;  %v702_v31 = vmax.f32 %v504_v21, 0.0  ;;  %5053 = vmatmul.mubr.msk.bf16.gmra.mrb[4].mxu1 %vm1517_vm5, %v5470_v29  ;;  %v1910_v38 = vor.u32 %v1909_v18, %v1906_v62  ;;  %v6227_v44 = vrot.slane %v1896_v24, 4  ;;  %v1834_v57 = vld [vmem:[#allocation2 + $0x60] sm:$0xf] }
 0x10b   :  { %v763_v36 = vmin.f32 %v699_v27, 6.0  ;;  %v700_v37 = vmax.f32 %v496_v28, 0.0  ;;  %v1924_v46 = vor.u32 %v1923_v34, %v1920_v33  ;;  %v1932_v51 = vshrl.u32 %v1824_v35, 16 }
 0x10c   :  { %v4754_v40 = vpack.c.bf16 %v765_v30, %v765_v30  ;;  %v766_v43 = vmin.f32 %v702_v31, 6.0  ;;  %v1935_v52 = vshll.u32 %v1824_v35, 16  ;;  %v1946_v10 = vshrl.u32 %v1826_v39, 16 }
 0x10d   :  { %v4752_v47 = vpack.c.bf16 %v763_v36, %v763_v36  ;;  %v764_v48 = vmin.f32 %v700_v37, 6.0  ;;  %v4978_v50 = vpop.f32.mrb[20].mxu0  ;;  %v6231_v56 = vrot.slane %v1924_v46, 4  ;;  %v1911_v2 = vrot.slane %v1910_v38, 4 }
 0x10e   :  { %1377 = vst.msk [vmem:[#allocation2 + $0xa0] sm:$0xf] %vm843_vm1, %v4754_v40  ;;  %v4755_v53 = vpack.c.bf16 %v766_v43, %v766_v43  ;;  %v517_v54 = vadd.f32 %v4978_v50, %v6098_v45  ;;  %v508_v59 = vpop.f32.mrb[21].mxu0  ;;  %v1934_v7 = vrot.slane %v1932_v51, 4  ;;  %v4561_v21 = vcombine.low %v1860_v13, %v1874_v5  ;;  %v1830_v40 = vld [vmem:[#allocation2 + $0x50] sm:$0xf] }
 0x10f   :  { %1375 = vst.msk [vmem:[#allocation2 + $0x90] sm:$0xf] %vm843_vm1, %v4752_v47  ;;  %v4753_v60 = vpack.c.bf16 %v764_v48, %v764_v48  ;;  %v509_v62 = vadd.f32 %v6098_v45, %v508_v59  ;;  %v4979_v1 = vpop.f32.mrb[22].mxu0  ;;  %v1902_v22 = vsel %vm6202_vm8, %v6227_v44, %v6117_v11  ;;  %v5474_v27 = vld [vmem:[#allocation2 + $0x78] ss:$8 sps:$4 sm:$0xff]   ;;  %v1930_v28 = vsel %vm6202_vm8, %v6231_v56, %v6122_v16 }
 0x110   :  { %1378 = vst.msk [vmem:[#allocation2 + $0xa8] sm:$0xf] %vm843_vm1, %v4755_v53  ;;  %v705_v8 = vmax.f32 %v517_v54, 0.0  ;;  %v520_v18 = vadd.f32 %v4979_v1, %v6098_v45  ;;  %v511_v19 = vpop.f32.mrb[23].mxu0  ;;  %v5472_v20 = vld [vmem:[#allocation2 + $0x68] ss:$8 sps:$4 sm:$0xff]  }
 0x111   :  { %1376 = vst.msk [vmem:[#allocation2 + $0x98] sm:$0xf] %vm843_vm1, %v4753_v60  ;;  %v703_v23 = vmax.f32 %v509_v62, 0.0  ;;  %v512_v24 = vadd.f32 %v6098_v45, %v511_v19  ;;  %v1937_v29 = vrot.slane %v1935_v52, 5  ;;  %5056 = vmatprep.mubr.msk.bf16.mxu1 %vm1517_vm5, %v5472_v20  ;;  %v1948_v13 = vrot.slane %v1946_v10, 4  ;;  %v6262_v60 = vld [vmem:[%s6756_s3 + $0x38] sm:$0xff]  }
 0x112   :  { %v769_v30 = vmin.f32 %v705_v8, 6.0  ;;  %v706_v31 = vmax.f32 %v520_v18, 0.0  ;;  %v1949_v33 = vshll.u32 %v1826_v39, 16  ;;  %5057 = vmatmul.mubr.msk.bf16.gmra.mrb[8].mxu1 %vm1517_vm5, %v5474_v27  ;;  %v1960_v36 = vshrl.u32 %v1828_v55, 16  ;;  %v6264_v62 = vld [vmem:[#allocation2 + $0x58] sm:$0xf] }
 0x113   :  { %v767_v34 = vmin.f32 %v703_v23, 6.0  ;;  %v704_v11 = vmax.f32 %v512_v24, 0.0  ;;  %v1938_v35 = vor.u32 %v1937_v29, %v1934_v7  ;;  %5064 = vmatprep.mubr.msk.bf16.mxu1 %vm1517_vm5, %v4561_v21  ;;  %v1963_v16 = vshll.u32 %v1828_v55, 16 }
 0x114   :  { %v4758_v37 = vpack.c.bf16 %v769_v30, %v769_v30  ;;  %v770_v5 = vmin.f32 %v706_v31, 6.0  ;;  %v1951_v38 = vrot.slane %v1949_v33, 5  ;;  %v1962_v48 = vrot.slane %v1960_v36, 4 }
 0x115   :  { %v4756_v43 = vpack.c.bf16 %v767_v34, %v767_v34  ;;  %v768_v44 = vmin.f32 %v704_v11, 6.0  ;;  %v4982_v46 = vpop.f32.mrb[24].mxu0  ;;  %v6250_v47 = vrot.slane %v1938_v35, 4  ;;  %v1965_v53 = vrot.slane %v1963_v16, 5  ;;  %v6291_v11 = vld [vmem:[%s6756_s3 + $0x40] sm:$0xff]  }
 0x116   :  { %1381 = vst.msk [vmem:[#allocation2 + $0xc0] sm:$0xf] %vm843_vm1, %v4758_v37  ;;  %v4759_v39 = vpack.c.bf16 %v770_v5, %v770_v5  ;;  %v533_v50 = vadd.f32 %v4982_v46, %v6098_v45  ;;  %v524_v51 = vpop.f32.mrb[25].mxu0  ;;  %v1952_v52 = vor.u32 %v1951_v38, %v1948_v13  ;;  %v1916_v10 = vsel %vm6202_vm8, %v1911_v2, %v6120_v15  ;;  %v5537_v46 = vld [vmem:[%s6756_s3 + $0x8] sm:$0xff]  }
 0x117   :  { %1379 = vst.msk [vmem:[#allocation2 + $0xb0] sm:$0xf] %vm843_vm1, %v4756_v43  ;;  %v4757_v54 = vpack.c.bf16 %v768_v44, %v768_v44  ;;  %v525_v59 = vadd.f32 %v6098_v45, %v524_v51  ;;  %v4983_v56 = vpop.f32.mrb[26].mxu0  ;;  %v1974_v55 = vshrl.u32 %v1830_v40, 16  ;;  %v4562_v15 = vcombine.low %v1888_v25, %v1902_v22  ;;  %v5478_v21 = vld [vmem:[#allocation2 + $0xa0] ss:$8 sps:$4 sm:$0xff]  }
 0x118   :  { %1382 = vst.msk [vmem:[#allocation2 + $0xc8] sm:$0xf] %vm843_vm1, %v4759_v39  ;;  %v709_v1 = vmax.f32 %v533_v50, 0.0  ;;  %v536_v7 = vadd.f32 %v4983_v56, %v6098_v45  ;;  %v527_v8 = vpop.f32.mrb[27].mxu0  ;;  %v5476_v18 = vld [vmem:[#allocation2 + $0x90] ss:$8 sps:$4 sm:$0xff]   ;;  %v1966_v2 = vor.u32 %v1965_v53, %v1962_v48  ;;  %v4563_v23 = vcombine.low %v1916_v10, %v1930_v28 }
 0x119   :  { %1380 = vst.msk [vmem:[#allocation2 + $0xb8] sm:$0xf] %vm843_vm1, %v4757_v54  ;;  %v707_v19 = vmax.f32 %v525_v59, 0.0  ;;  %v528_v20 = vadd.f32 %v6098_v45, %v527_v8  ;;  %v1953_v24 = vrot.slane %v1952_v52, 4  ;;  %5024 = vmatprep.mubr.msk.bf16.mxu0 %vm1517_vm5, %v5476_v18  ;;  %v1944_v30 = vsel %vm6202_vm8, %v6250_v47, %v6138_v58 }
 0x11a   :  { %v773_v27 = vmin.f32 %v709_v1, 6.0  ;;  %v710_v29 = vmax.f32 %v536_v7, 0.0  ;;  %v1977_v6 = vshll.u32 %v1830_v40, 16  ;;  %5025 = vmatmul.mubr.msk.bf16.vlgmr.msra.gmra.mrb[64].mxu0 %vm1517_vm5, %v5478_v21  ;;  %5065 = vmatmul.mubr.msk.bf16.vlgmr.msra.gmra.mrb[12].mxu1 %vm1517_vm5, %v4562_v15  ;;  %v1976_v31 = vrot.slane %v1974_v55, 4 }
 0x11b   :  { %v771_v25 = vmin.f32 %v707_v19, 6.0  ;;  %v708_v22 = vmax.f32 %v528_v20, 0.0  ;;  %v1988_v28 = vshrl.u32 %v6264_v62, 16  ;;  %5081 = vmatpush3.bf16.msra.mxu1 %v6192_v49  ;;  %5068 = vmatprep.mubr.msk.bf16.mxu1 %vm1517_vm5, %v4563_v23  ;;  %v1958_v58 = vsel %vm6202_vm8, %v1953_v24, %v6144_v63  ;;  %v5536_v49 = vld [vmem:[%s6756_s3] sm:$0xff]   ;;  %v1836_v20 = vld [vmem:[#allocation2 + $0x68] sm:$0xf] }
 0x11c   :  { %v4762_v13 = vpack.c.bf16 %v773_v27, %v773_v27  ;;  %v774_v33 = vmin.f32 %v710_v29, 6.0  ;;  %v1967_v34 = vrot.slane %v1966_v2, 4  ;;  %v1979_v5 = vrot.slane %v1977_v6, 5  ;;  %5082 = vmatprep.subr.bf16.mxu1 %v6262_v60  ;;  %5041 = vmatpush3.bf16.msra.mxu0 %v5536_v49 }
 0x11d   :  { %v4760_v35 = vpack.c.bf16 %v771_v25, %v771_v25  ;;  %v772_v36 = vmin.f32 %v708_v22, 6.0  ;;  %v4986_v37 = vpop.f32.mrb[28].mxu0  ;;  %v1990_v38 = vrot.slane %v1988_v28, 4  ;;  %v1991_v43 = vshll.u32 %v6264_v62, 16  ;;  %5042 = vmatprep.subr.bf16.mxu0 %v5537_v46 }
 0x11e   :  { %1385 = vst.msk [vmem:[#allocation2 + $0xe8] sm:$0xf] %vm843_vm1, %v4762_v13  ;;  %v4763_v63 = vpack.c.bf16 %v774_v33, %v774_v33  ;;  %v549_v40 = vadd.f32 %v4986_v37, %v6098_v45  ;;  %v540_v16 = vpop.f32.mrb[29].mxu0  ;;  %v2002_v44 = vshrl.u32 %v1834_v57, 16  ;;  %v1980_v51 = vor.u32 %v1979_v5, %v1976_v31  ;;  %v1838_v31 = vld [vmem:[#allocation2 + $0x70] sm:$0xf] }
 0x11f   :  { %1383 = vst.msk [vmem:[#allocation2 + $0xd8] sm:$0xf] %vm843_vm1, %v4760_v35  ;;  %v4761_v47 = vpack.c.bf16 %v772_v36, %v772_v36  ;;  %v541_v48 = vadd.f32 %v6098_v45, %v540_v16  ;;  %v4987_v39 = vpop.f32.mrb[30].mxu0  ;;  %v5480_v50 = vld [vmem:[#allocation2 + $0xc0] ss:$8 sps:$4 sm:$0xff]   ;;  %v2005_v52 = vshll.u32 %v1834_v57, 16  ;;  %v4564_v10 = vcombine.low %v1944_v30, %v1958_v58  ;;  %5083 = vmatpush3.bf16.msra.mxu1 %v6262_v60 }
 0x120   :  { %1386 = vst.msk [vmem:[#allocation2 + $0xf0] sm:$0xf] %vm843_vm1, %v4763_v63  ;;  %v713_v53 = vmax.f32 %v549_v40, 0.0  ;;  %v552_v54 = vadd.f32 %v4987_v39, %v6098_v45  ;;  %v543_v59 = vpop.f32.mrb[31].mxu0  ;;  %v5479_v56 = vld [vmem:[#allocation2 + $0xb0] ss:$8 sps:$4 sm:$0xff]   ;;  %v1972_v55 = vsel %vm6202_vm8, %v1967_v34, %v6146_v0  ;;  %5043 = vmatpush3.bf16.msra.mxu0 %v5537_v46  ;;  %5100 = vmatprep.subr.bf16.mxu1 %v6291_v11 }
 0x121   :  { %1384 = vst.msk [vmem:[#allocation2 + $0xe0] sm:$0xf] %vm843_vm1, %v4761_v47  ;;  %v711_v62 = vmax.f32 %v541_v48, 0.0  ;;  %v544_v1 = vadd.f32 %v6098_v45, %v543_v59  ;;  %v1981_v7 = vrot.slane %v1980_v51, 4  ;;  %v1993_v8 = vrot.slane %v1991_v43, 5  ;;  %5028 = vmatprep.mubr.msk.bf16.mxu0 %vm1517_vm5, %v5479_v56 }
 0x122   :  { %v777_v18 = vmin.f32 %v713_v53, 6.0  ;;  %v714_v15 = vmax.f32 %v552_v54, 0.0  ;;  %v2004_v2 = vrot.slane %v2002_v44, 4  ;;  %v2007_v19 = vrot.slane %v2005_v52, 5  ;;  %5029 = vmatmul.mubr.msk.bf16.gmra.mrb[68].mxu0 %vm1517_vm5, %v5480_v50  ;;  %5069 = vmatmul.mubr.msk.bf16.gmra.mrb[0].mxu1 %vm1517_vm5, %v4564_v10 }
 0x123   :  { %v775_v0 = vmin.f32 %v711_v62, 6.0  ;;  %v712_v21 = vmax.f32 %v544_v1, 0.0  ;;  %v1986_v60 = vsel %vm6202_vm8, %v1981_v7, %v6148_v3  ;;  %v1994_v23 = vor.u32 %v1993_v8, %v1990_v38  ;;  %v1840_v38 = vld [vmem:[#allocation2 + $0x78] sm:$0xf]  ;;  %v1842_v7 = vld [vmem:[#allocation2 + $0x80] sm:$0xf] }
 0x124   :  { %v4766_v24 = vpack.c.bf16 %v777_v18, %v777_v18  ;;  %v778_v27 = vmin.f32 %v714_v15, 6.0  ;;  %v4565_v29 = vcombine.low %v1972_v55, %v1986_v60  ;;  %v2008_v30 = vor.u32 %v2007_v19, %v2004_v2 }
 0x125   :  { %v4764_v6 = vpack.c.bf16 %v775_v0, %v775_v0  ;;  %v776_v57 = vmin.f32 %v712_v21, 6.0  ;;  %v4990_v25 = vpop.f32.mrb[32].mxu0  ;;  %v1995_v22 = vrot.slane %v1994_v23, 4  ;;  %v2016_v28 = vshrl.u32 %v1836_v20, 16 }
 0x126   :  { %1389 = vst.msk [vmem:[#allocation2 + $0x108] sm:$0xf] %vm843_vm1, %v4766_v24  ;;  %v4767_v13 = vpack.c.bf16 %v778_v27, %v778_v27  ;;  %v565_v33 = vadd.f32 %v4990_v25, %v6098_v45  ;;  %5072 = vmatprep.mubr.msk.bf16.mxu1 %vm1517_vm5, %v4565_v29  ;;  %v556_v58 = vpop.f32.mrb[33].mxu0  ;;  %v2009_v3 = vrot.slane %v2008_v30, 4  ;;  %v2019_v34 = vshll.u32 %v1836_v20, 16 }
 0x127   :  { %1387 = vst.msk [vmem:[#allocation2 + $0xf8] sm:$0xf] %vm843_vm1, %v4764_v6  ;;  %v4765_v35 = vpack.c.bf16 %v776_v57, %v776_v57  ;;  %v557_v36 = vadd.f32 %v6098_v45, %v556_v58  ;;  %v4991_v37 = vpop.f32.mrb[34].mxu0  ;;  %v2018_v5 = vrot.slane %v2016_v28, 4  ;;  %v2000_v43 = vsel %vm6202_vm8, %v1995_v22, %v6150_v4  ;;  %v5483_v48 = vld [vmem:[#allocation2 + $0xe8] ss:$8 sps:$4 sm:$0xff]  }
 0x128   :  { %1390 = vst.msk [vmem:[#allocation2 + $0x110] sm:$0xf] %vm843_vm1, %v4767_v13  ;;  %v717_v49 = vmax.f32 %v565_v33, 0.0  ;;  %v568_v63 = vadd.f32 %v4991_v37, %v6098_v45  ;;  %v559_v40 = vpop.f32.mrb[35].mxu0  ;;  %v5481_v16 = vld [vmem:[#allocation2 + $0xd8] ss:$8 sps:$4 sm:$0xff]   ;;  %v2014_v44 = vsel %vm6202_vm8, %v2009_v3, %v6152_v12 }
 0x129   :  { %1388 = vst.msk [vmem:[#allocation2 + $0x100] sm:$0xf] %vm843_vm1, %v4765_v35  ;;  %v715_v46 = vmax.f32 %v557_v36, 0.0  ;;  %v560_v47 = vadd.f32 %v6098_v45, %v559_v40  ;;  %v4566_v39 = vcombine.low %v2000_v43, %v2014_v44  ;;  %v2021_v50 = vrot.slane %v2019_v34, 5  ;;  %5032 = vmatprep.mubr.msk.bf16.mxu0 %vm1517_vm5, %v5481_v16  ;;  %v5486_v34 = vld [vmem:[#allocation2] ss:$8 sps:$4 sm:$0xff]  }
 0x12a   :  { %v781_v51 = vmin.f32 %v717_v49, 6.0  ;;  %v718_v52 = vmax.f32 %v568_v63, 0.0  ;;  %v2030_v53 = vshrl.u32 %v1838_v31, 16  ;;  %v2033_v54 = vshll.u32 %v1838_v31, 16  ;;  %5033 = vmatmul.mubr.msk.bf16.gmra.mrb[72].mxu0 %vm1517_vm5, %v5483_v48 }
 0x12b   :  { %v779_v59 = vmin.f32 %v715_v46, 6.0  ;;  %v716_v4 = vmax.f32 %v560_v47, 0.0  ;;  %5073 = vmatmul.mubr.msk.bf16.gmra.mrb[4].mxu1 %vm1517_vm5, %v4566_v39  ;;  %v2022_v12 = vor.u32 %v2021_v50, %v2018_v5  ;;  %v2044_v56 = vshrl.u32 %v1840_v38, 16 }
 0x12c   :  { %v4770_v10 = vpack.c.bf16 %v781_v51, %v781_v51  ;;  %v782_v55 = vmin.f32 %v718_v52, 6.0  ;;  %v2032_v62 = vrot.slane %v2030_v53, 4  ;;  %v2035_v1 = vrot.slane %v2033_v54, 5 }
 0x12d   :  { %v4768_v8 = vpack.c.bf16 %v779_v59, %v779_v59  ;;  %v780_v18 = vmin.f32 %v716_v4, 6.0  ;;  %v4994_v15 = vpop.f32.mrb[36].mxu0  ;;  %v2023_v2 = vrot.slane %v2022_v12, 4  ;;  %v2046_v19 = vrot.slane %v2044_v56, 4 }
 0x12e   :  { %1393 = vst.msk [vmem:[#allocation2 + $0x130] sm:$0xf] %vm843_vm1, %v4770_v10  ;;  %v4771_v20 = vpack.c.bf16 %v782_v55, %v782_v55  ;;  %v581_v0 = vadd.f32 %v4994_v15, %v6098_v45  ;;  %v2036_v21 = vor.u32 %v2035_v1, %v2032_v62  ;;  %v572_v60 = vpop.f32.mrb[37].mxu0  ;;  %v2047_v23 = vshll.u32 %v1840_v38, 16  ;;  %v5489_v15 = vld [vmem:[#allocation2 + $0x10] ss:$8 sps:$4 sm:$0xff]  }
 0x12f   :  { %1391 = vst.msk [vmem:[#allocation2 + $0x120] sm:$0xf] %vm843_vm1, %v4768_v8  ;;  %v4769_v24 = vpack.c.bf16 %v780_v18, %v780_v18  ;;  %v2028_v27 = vsel %vm6202_vm8, %v2023_v2, %v6171_v9  ;;  %v573_v29 = vadd.f32 %v6098_v45, %v572_v60  ;;  %v4995_v30 = vpop.f32.mrb[38].mxu0  ;;  %v2058_v6 = vshrl.u32 %v1842_v7, 16  ;;  %v5485_v5 = vld [vmem:[#allocation2 + $0x108] ss:$8 sps:$4 sm:$0xff]  }
 0x130   :  { %1394 = vst.msk [vmem:[#allocation2 + $0x138] sm:$0xf] %vm843_vm1, %v4771_v20  ;;  %v721_v57 = vmax.f32 %v581_v0, 0.0  ;;  %v2037_v25 = vrot.slane %v2036_v21, 4  ;;  %v584_v22 = vadd.f32 %v4995_v30, %v6098_v45  ;;  %v575_v31 = vpop.f32.mrb[39].mxu0  ;;  %v2049_v28 = vrot.slane %v2047_v23, 5 }
 0x131   :  { %1392 = vst.msk [vmem:[#allocation2 + $0x128] sm:$0xf] %vm843_vm1, %v4769_v24  ;;  %v719_v13 = vmax.f32 %v573_v29, 0.0  ;;  %v576_v33 = vadd.f32 %v6098_v45, %v575_v31  ;;  %v5484_v58 = vld [vmem:[#allocation2 + $0xf8] ss:$8 sps:$4 sm:$0xff]   ;;  %v2060_v3 = vrot.slane %v2058_v6, 4 }
 0x132   :  { %v2061_v9 = vshll.u32 %v1842_v7, 16  ;;  %v785_v35 = vmin.f32 %v721_v57, 6.0  ;;  %v2042_v36 = vsel %vm6202_vm8, %v2037_v25, %v6173_v17  ;;  %v722_v37 = vmax.f32 %v584_v22, 0.0  ;;  %5036 = vmatprep.mubr.msk.bf16.mxu0 %vm1517_vm5, %v5484_v58 }
 0x133   :  { %v2050_v38 = vor.u32 %v2049_v28, %v2046_v19  ;;  %v4567_v49 = vcombine.low %v2028_v27, %v2042_v36  ;;  %v783_v63 = vmin.f32 %v719_v13, 6.0  ;;  %v720_v40 = vmax.f32 %v576_v33, 0.0  ;;  %5037 = vmatmul.mubr.msk.bf16.gmra.mrb[76].mxu0 %vm1517_vm5, %v5485_v5 }
 0x134   :  { %v2063_v16 = vrot.slane %v2061_v9, 5  ;;  %v4774_v43 = vpack.c.bf16 %v785_v35, %v785_v35  ;;  %v786_v45 = vmin.f32 %v722_v37, 6.0  ;;  %v2055_v44 = vrot.slane %v2053_v41, 5  ;;  %5044 = vmatprep.mubr.msk.bf16.mxu0 %vm1517_vm5, %v5486_v34  ;;  %v5494_v34 = vld [vmem:[%s6756_s3 + $0x48] sm:$0xff]  }
 0x135   :  { %v2069_v46 = vrot.slane %v2067_v42, 5  ;;  %5076 = vmatprep.mubr.msk.bf16.mxu1 %vm1517_vm5, %v4567_v49  ;;  %v4772_v17 = vpack.c.bf16 %v783_v63, %v783_v63  ;;  %v784_v47 = vmin.f32 %v720_v40, 6.0  ;;  %v2051_v48 = vrot.slane %v2050_v38, 4  ;;  %v4998_v50 = vpop.f32.mrb[40].mxu0 }
 0x136   :  { %v2064_v39 = vor.u32 %v2063_v16, %v2060_v3  ;;  %1397 = vst.msk [vmem:[#allocation2 + $0x150] sm:$0xf] %vm843_vm1, %v4774_v43  ;;  %v4775_v51 = vpack.c.bf16 %v786_v45, %v786_v45  ;;  %v597_v26 = vadd.f32 %v6364_v14, %v4998_v50  ;;  %v588_v41 = vpop.f32.mrb[41].mxu0  ;;  %v6399_v45 = vld [vmem:[%s6756_s3 + $0x50] sm:$0xff]  }
 0x137   :  { %1395 = vst.msk [vmem:[#allocation2 + $0x140] sm:$0xf] %vm843_vm1, %v4772_v17  ;;  %v4773_v42 = vpack.c.bf16 %v784_v47, %v784_v47  ;;  %v589_v53 = vadd.f32 %v6364_v14, %v588_v41  ;;  %v4999_v54 = vpop.f32.mrb[42].mxu0  ;;  %v2056_v56 = vsel %vm6202_vm8, %v2051_v48, %v2055_v44  ;;  %v5490_v58 = vld [vmem:[#allocation2 + $0x130] ss:$8 sps:$4 sm:$0xff]  }
 0x138   :  { %v2065_v52 = vrot.slane %v2064_v39, 4  ;;  %1398 = vst.msk [vmem:[#allocation2 + $0x158] sm:$0xf] %vm843_vm1, %v4775_v51  ;;  %v725_v59 = vmax.f32 %v597_v26, 0.0  ;;  %v600_v4 = vadd.f32 %v6364_v14, %v4999_v54  ;;  %v591_v12 = vpop.f32.mrb[43].mxu0 }
 0x139   :  { %1396 = vst.msk [vmem:[#allocation2 + $0x148] sm:$0xf] %vm843_vm1, %v4773_v42  ;;  %v723_v55 = vmax.f32 %v589_v53, 0.0  ;;  %v592_v62 = vadd.f32 %v6364_v14, %v591_v12  ;;  %v5487_v1 = vld [vmem:[#allocation2 + $0x120] ss:$8 sps:$4 sm:$0xff]  }
 0x13a   :  { %v2070_v10 = vsel %vm6202_vm8, %v2065_v52, %v2069_v46  ;;  %v789_v8 = vmin.f32 %v725_v59, 6.0  ;;  %v726_v18 = vmax.f32 %v600_v4, 0.0 }
 0x13b   :  { %v4568_v7 = vcombine.low %v2056_v56, %v2070_v10  ;;  %v787_v2 = vmin.f32 %v723_v55, 6.0  ;;  %v724_v19 = vmax.f32 %v592_v62, 0.0  ;;  %5045 = vmatmul.mubr.msk.bf16.vlgmr.msra.gmra.mrb[64].mxu0 %vm1517_vm5, %v5489_v15 }
 0x13c   :  { %v4778_v20 = vpack.c.bf16 %v789_v8, %v789_v8  ;;  %v790_v0 = vmin.f32 %v726_v18, 6.0 }
 0x13d   :  { %5077 = vmatmul.mubr.msk.bf16.gmra.mrb[8].mxu1 %vm1517_vm5, %v4568_v7  ;;  %v4776_v21 = vpack.c.bf16 %v787_v2, %v787_v2  ;;  %v788_v60 = vmin.f32 %v724_v19, 6.0  ;;  %v5002_v23 = vpop.f32.mrb[44].mxu0 }
 0x13e   :  { %5084 = vmatprep.mubr.msk.bf16.mxu1 %vm1517_vm5, %v5487_v1  ;;  %1401 = vst.msk [vmem:[#allocation2 + $0x178] sm:$0xf] %vm843_vm1, %v4778_v20  ;;  %v4779_v24 = vpack.c.bf16 %v790_v0, %v790_v0  ;;  %v613_v27 = vadd.f32 %v6364_v14, %v5002_v23  ;;  %v604_v29 = vpop.f32.mrb[45].mxu0 }
 0x13f   :  { %1399 = vst.msk [vmem:[#allocation2 + $0x168] sm:$0xf] %vm843_vm1, %v4776_v21  ;;  %v4777_v30 = vpack.c.bf16 %v788_v60, %v788_v60  ;;  %v605_v6 = vadd.f32 %v6364_v14, %v604_v29  ;;  %v5003_v57 = vpop.f32.mrb[46].mxu0  ;;  %v5492_v26 = vld [vmem:[#allocation2 + $0x150] ss:$8 sps:$4 sm:$0xff]  }
 0x140   :  { %1402 = vst.msk [vmem:[#allocation2 + $0x180] sm:$0xf] %vm843_vm1, %v4779_v24  ;;  %v729_v25 = vmax.f32 %v613_v27, 0.0  ;;  %v616_v22 = vadd.f32 %v6364_v14, %v5003_v57  ;;  %v607_v31 = vpop.f32.mrb[47].mxu0  ;;  %v5491_v33 = vld [vmem:[#allocation2 + $0x140] ss:$8 sps:$4 sm:$0xff]  }
 0x141   :  { %1400 = vst.msk [vmem:[#allocation2 + $0x170] sm:$0xf] %vm843_vm1, %v4777_v30  ;;  %v727_v28 = vmax.f32 %v605_v6, 0.0  ;;  %v608_v13 = vadd.f32 %v6364_v14, %v607_v31 }
 0x142   :  { %v793_v3 = vmin.f32 %v729_v25, 6.0  ;;  %v730_v9 = vmax.f32 %v616_v22, 0.0 }
 0x143   :  { %v791_v35 = vmin.f32 %v727_v28, 6.0  ;;  %v728_v36 = vmax.f32 %v608_v13, 0.0 }
 0x144   :  { %v4782_v37 = vpack.c.bf16 %v793_v3, %v793_v3  ;;  %v794_v5 = vmin.f32 %v730_v9, 6.0 }
 0x145   :  { %5085 = vmatmul.mubr.msk.bf16.vlgmr.msra.gmra.mrb[12].mxu1 %vm1517_vm5, %v5490_v58  ;;  %v4780_v38 = vpack.c.bf16 %v791_v35, %v791_v35  ;;  %v792_v49 = vmin.f32 %v728_v36, 6.0  ;;  %v5006_v63 = vpop.f32.mrb[48].mxu0 }
 0x146   :  { %5101 = vmatpush3.bf16.msra.mxu1 %v6291_v11  ;;  %5088 = vmatprep.mubr.msk.bf16.mxu1 %vm1517_vm5, %v5491_v33  ;;  %1405 = vst.msk [vmem:[#allocation2 + $0x198] sm:$0xf] %vm843_vm1, %v4782_v37  ;;  %v4783_v40 = vpack.c.bf16 %v794_v5, %v794_v5  ;;  %v629_v16 = vadd.f32 %v6364_v14, %v5006_v63  ;;  %v620_v43 = vpop.f32.mrb[49].mxu0 }
 0x147   :  { %5102 = vmatprep.subr.bf16.mxu1 %v5494_v34  ;;  %1403 = vst.msk [vmem:[#allocation2 + $0x188] sm:$0xf] %vm843_vm1, %v4780_v38  ;;  %v4781_v11 = vpack.c.bf16 %v792_v49, %v792_v49  ;;  %v621_v44 = vadd.f32 %v6364_v14, %v620_v43  ;;  %v5007_v46 = vpop.f32.mrb[50].mxu0  ;;  %v5495_v21 = vld [vmem:[#allocation2 + $0x178] ss:$8 sps:$4 sm:$0xff]  }
 0x148   :  { %1406 = vst.msk [vmem:[#allocation2 + $0x1a0] sm:$0xf] %vm843_vm1, %v4783_v40  ;;  %v733_v17 = vmax.f32 %v629_v16, 0.0  ;;  %v632_v47 = vadd.f32 %v6364_v14, %v5007_v46  ;;  %v623_v48 = vpop.f32.mrb[51].mxu0  ;;  %v5493_v51 = vld [vmem:[#allocation2 + $0x168] ss:$8 sps:$4 sm:$0xff]  }
 0x149   :  { %1404 = vst.msk [vmem:[#allocation2 + $0x190] sm:$0xf] %vm843_vm1, %v4781_v11  ;;  %v731_v39 = vmax.f32 %v621_v44, 0.0  ;;  %v624_v50 = vadd.f32 %v6364_v14, %v623_v48 }
 0x14a   :  { %5103 = vmatpush3.bf16.msra.mxu1 %v5494_v34  ;;  %v797_v41 = vmin.f32 %v733_v17, 6.0  ;;  %v734_v42 = vmax.f32 %v632_v47, 0.0 }
 0x14b   :  { %5120 = vmatprep.subr.bf16.mxu1 %v6399_v45  ;;  %v795_v52 = vmin.f32 %v731_v39, 6.0  ;;  %v732_v53 = vmax.f32 %v624_v50, 0.0 }
 0x14c   :  { %v4786_v54 = vpack.c.bf16 %v797_v41, %v797_v41  ;;  %v798_v59 = vmin.f32 %v734_v42, 6.0 }
 0x14d   :  { %5089 = vmatmul.mubr.msk.bf16.gmra.mrb[0].mxu1 %vm1517_vm5, %v5492_v26  ;;  %v4784_v4 = vpack.c.bf16 %v795_v52, %v795_v52  ;;  %v796_v12 = vmin.f32 %v732_v53, 6.0  ;;  %v5010_v56 = vpop.f32.mrb[52].mxu0  ;;  %v2676_v52 = vld [vmem:[#allocation2 + $0x134] sm:$0x1] }
 0x14e   :  { %5092 = vmatprep.mubr.msk.bf16.mxu1 %vm1517_vm5, %v5493_v51  ;;  %1409 = vst.msk [vmem:[#allocation2 + $0x1c0] sm:$0xf] %vm843_vm1, %v4786_v54  ;;  %v4787_v10 = vpack.c.bf16 %v798_v59, %v798_v59  ;;  %v645_v55 = vadd.f32 %v6364_v14, %v5010_v56  ;;  %v636_v62 = vpop.f32.mrb[53].mxu0 }
 0x14f   :  { %1407 = vst.msk [vmem:[#allocation2 + $0x1b0] sm:$0xf] %vm843_vm1, %v4784_v4  ;;  %v4785_v1 = vpack.c.bf16 %v796_v12, %v796_v12  ;;  %v637_v7 = vadd.f32 %v6364_v14, %v636_v62  ;;  %v5011_v8 = vpop.f32.mrb[54].mxu0  ;;  %v5497_v5 = vld [vmem:[#allocation2 + $0x198] ss:$8 sps:$4 sm:$0xff]  }
 0x150   :  { %1410 = vst.msk [vmem:[#allocation2 + $0x1c8] sm:$0xf] %vm843_vm1, %v4787_v10  ;;  %v737_v18 = vmax.f32 %v645_v55, 0.0  ;;  %v648_v15 = vadd.f32 %v6364_v14, %v5011_v8  ;;  %v639_v2 = vpop.f32.mrb[55].mxu0  ;;  %v5496_v0 = vld [vmem:[#allocation2 + $0x188] ss:$8 sps:$4 sm:$0xff]  }
 0x151   :  { %1408 = vst.msk [vmem:[#allocation2 + $0x1b8] sm:$0xf] %vm843_vm1, %v4785_v1  ;;  %v735_v19 = vmax.f32 %v637_v7, 0.0  ;;  %v640_v20 = vadd.f32 %v6364_v14, %v639_v2  ;;  %v5504_v4 = vld [vmem:[%s6756_s3 + $0x58] sm:$0xff]   ;;  %v2672_v1 = vld [vmem:[#allocation2 + $0x124] sm:$0x1] }
 0x152   :  { %v801_v60 = vmin.f32 %v737_v18, 6.0  ;;  %v738_v23 = vmax.f32 %v648_v15, 0.0  ;;  %v2678_v7 = vld [vmem:[#allocation2 + $0x13c] sm:$0x1]  ;;  %v2674_v15 = vld [vmem:[#allocation2 + $0x12c] sm:$0x1] }
 0x153   :  { %v799_v24 = vmin.f32 %v735_v19, 6.0  ;;  %v736_v27 = vmax.f32 %v640_v20, 0.0  ;;  %v2673_v19 = vld [vmem:[#allocation2 + $0x128] sm:$0xf]  ;;  %v2741_v20 = vshll.u32 %v2676_v52, 16 }
 0x154   :  { %v4790_v29 = vpack.c.bf16 %v801_v60, %v801_v60  ;;  %v802_v30 = vmin.f32 %v738_v23, 6.0  ;;  %v2713_v60 = vshll.u32 %v2672_v1, 16  ;;  %v6448_v23 = vld [vmem:[%s6756_s3 + $0x60] sm:$0xff]  }
 0x155   :  { %5093 = vmatmul.mubr.msk.bf16.gmra.mrb[4].mxu1 %vm1517_vm5, %v5495_v21  ;;  %v4788_v6 = vpack.c.bf16 %v799_v24, %v799_v24  ;;  %v800_v57 = vmin.f32 %v736_v27, 6.0  ;;  %v5014_v25 = vpop.f32.mrb[56].mxu0  ;;  %v2671_v21 = vld [vmem:[#allocation2 + $0x120] sm:$0xf]  ;;  %v2727_v24 = vshll.u32 %v2674_v15, 16  ;;  %v2755_v27 = vshll.u32 %v2678_v7, 16 }
 0x156   :  { %5096 = vmatprep.mubr.msk.bf16.mxu1 %vm1517_vm5, %v5496_v0  ;;  %1413 = vst.msk [vmem:[#allocation2 + $0x1e0] sm:$0xf] %vm843_vm1, %v4790_v29  ;;  %v4791_v22 = vpack.c.bf16 %v802_v30, %v802_v30  ;;  %v661_v31 = vadd.f32 %v6364_v14, %v5014_v25  ;;  %v652_v28 = vpop.f32.mrb[57].mxu0  ;;  %v2718_v29 = vshrl.u32 %v2673_v19, 16  ;;  %v2721_v30 = vshll.u32 %v2673_v19, 16 }
 0x157   :  { %1411 = vst.msk [vmem:[#allocation2 + $0x1d0] sm:$0xf] %vm843_vm1, %v4788_v6  ;;  %v4789_v13 = vpack.c.bf16 %v800_v57, %v800_v57  ;;  %v653_v33 = vadd.f32 %v6364_v14, %v652_v28  ;;  %v5015_v58 = vpop.f32.mrb[58].mxu0  ;;  %v5500_v12 = vld [vmem:[#allocation2 + $0x1c0] ss:$8 sps:$4 sm:$0xff]   ;;  %v2704_v57 = vshrl.u32 %v2671_v21, 16 }
 0x158   :  { %1414 = vst.msk [vmem:[#allocation2 + $0x1e8] sm:$0xf] %vm843_vm1, %v4791_v22  ;;  %v741_v3 = vmax.f32 %v661_v31, 0.0  ;;  %v664_v9 = vadd.f32 %v6364_v14, %v5015_v58  ;;  %v655_v34 = vpop.f32.mrb[59].mxu0  ;;  %v5498_v37 = vld [vmem:[#allocation2 + $0x1b0] ss:$8 sps:$4 sm:$0xff]  }
 0x159   :  { %1412 = vst.msk [vmem:[#allocation2 + $0x1d8] sm:$0xf] %vm843_vm1, %v4789_v13  ;;  %v739_v35 = vmax.f32 %v653_v33, 0.0  ;;  %v656_v36 = vadd.f32 %v6364_v14, %v655_v34  ;;  %v2707_v25 = vshll.u32 %v2671_v21, 16  ;;  %v6453_v31 = vrot.slane %v2713_v60, 5 }
 0x15a   :  { %v805_v38 = vmin.f32 %v741_v3, 6.0  ;;  %v742_v49 = vmax.f32 %v664_v9, 0.0  ;;  %v6456_v28 = vrot.slane %v2741_v20, 5  ;;  %v6458_v13 = vrot.slane %v2727_v24, 5  ;;  %v2677_v33 = vld [vmem:[#allocation2 + $0x138] sm:$0xf] }
 0x15b   :  { %v803_v63 = vmin.f32 %v739_v35, 6.0  ;;  %v740_v40 = vmax.f32 %v656_v36, 0.0  ;;  %v6460_v58 = vrot.slane %v2755_v27, 5  ;;  %v2684_v3 = vld [vmem:[#allocation2 + $0x154] sm:$0x1]  ;;  %v2720_v9 = vrot.slane %v2718_v29, 4 }
 0x15c   :  { %v4794_v16 = vpack.c.bf16 %v805_v38, %v805_v38  ;;  %v806_v43 = vmin.f32 %v742_v49, 6.0  ;;  %v2723_v34 = vrot.slane %v2721_v30, 5  ;;  %v2675_v35 = vld [vmem:[#allocation2 + $0x130] sm:$0xf]  ;;  %v2680_v36 = vld [vmem:[#allocation2 + $0x144] sm:$0x1] }
 0x15d   :  { %5097 = vmatmul.mubr.msk.bf16.gmra.mrb[8].mxu1 %vm1517_vm5, %v5497_v5  ;;  %v4792_v11 = vpack.c.bf16 %v803_v63, %v803_v63  ;;  %v804_v44 = vmin.f32 %v740_v40, 6.0  ;;  %v5018_v46 = vpop.f32.mrb[60].mxu0  ;;  %v2706_v5 = vrot.slane %v2704_v57, 4  ;;  %v2709_v38 = vrot.slane %v2707_v25, 5  ;;  %v2681_v49 = vld [vmem:[#allocation2 + $0x148] sm:$0xf] }
 0x15e   :  { %5104 = vmatprep.mubr.msk.bf16.mxu1 %vm1517_vm5, %v5498_v37  ;;  %1417 = vst.msk [vmem:[#allocation2 + $0x208] sm:$0xf] %vm843_vm1, %v4794_v16  ;;  %v4795_v17 = vpack.c.bf16 %v806_v43, %v806_v43  ;;  %v677_v47 = vadd.f32 %v6364_v14, %v5018_v46  ;;  %v668_v48 = vpop.f32.mrb[61].mxu0  ;;  %v2686_v37 = vld [vmem:[#allocation2 + $0x15c] sm:$0x1]  ;;  %v2746_v63 = vshrl.u32 %v2677_v33, 16  ;;  %v2724_v46 = vor.u32 %v2723_v34, %v2720_v9 }
 0x15f   :  { %1415 = vst.msk [vmem:[#allocation2 + $0x1f8] sm:$0xf] %vm843_vm1, %v4792_v11  ;;  %v4793_v39 = vpack.c.bf16 %v804_v44, %v804_v44  ;;  %v669_v50 = vadd.f32 %v6364_v14, %v668_v48  ;;  %v5019_v51 = vpop.f32.mrb[62].mxu0  ;;  %v5502_v22 = vld [vmem:[#allocation2 + $0x1e0] ss:$8 sps:$4 sm:$0xff]   ;;  %v2749_v40 = vshll.u32 %v2677_v33, 16  ;;  %v2710_v52 = vor.u32 %v2709_v38, %v2706_v5 }
 0x160   :  { %1418 = vst.msk [vmem:[#allocation2 + $0x210] sm:$0xf] %vm843_vm1, %v4795_v17  ;;  %v745_v26 = vmax.f32 %v677_v47, 0.0  ;;  %v680_v41 = vadd.f32 %v6364_v14, %v5019_v51  ;;  %v671_v42 = vpop.f32.mrb[63].mxu0  ;;  %v5501_v59 = vld [vmem:[#allocation2 + $0x1d0] ss:$8 sps:$4 sm:$0xff]  }
 0x161   :  { %1416 = vst.msk [vmem:[#allocation2 + $0x200] sm:$0xf] %vm843_vm1, %v4793_v39  ;;  %v743_v53 = vmax.f32 %v669_v50, 0.0  ;;  %v672_v54 = vadd.f32 %v6364_v14, %v671_v42  ;;  %v2679_v16 = vld [vmem:[#allocation2 + $0x140] sm:$0xf]  ;;  %v2732_v43 = vshrl.u32 %v2675_v35, 16 }
 0x162   :  { %v809_v56 = vmin.f32 %v745_v26, 6.0  ;;  %v746_v10 = vmax.f32 %v680_v41, 0.0  ;;  %v2735_v11 = vshll.u32 %v2675_v35, 16  ;;  %v2682_v44 = vld [vmem:[#allocation2 + $0x14c] sm:$0x1]  ;;  %v2774_v17 = vshrl.u32 %v2681_v49, 16 }
 0x163   :  { %v807_v55 = vmin.f32 %v743_v53, 6.0  ;;  %v744_v62 = vmax.f32 %v672_v54, 0.0  ;;  %v2777_v47 = vshll.u32 %v2681_v49, 16  ;;  %v2797_v48 = vshll.u32 %v2684_v3, 16  ;;  %v2685_v7 = vld [vmem:[#allocation2 + $0x158] sm:$0xf] }
 0x164   :  { %v4798_v8 = vpack.c.bf16 %v809_v56, %v809_v56  ;;  %v810_v18 = vmin.f32 %v746_v10, 6.0  ;;  %v2760_v50 = vshrl.u32 %v2679_v16, 16  ;;  %v2763_v51 = vshll.u32 %v2679_v16, 16  ;;  %v6464_v56 = vld [vmem:[#allocation2 + $0x16c] sm:$0x1] }
 0x165   :  { %5105 = vmatmul.mubr.msk.bf16.vlgmr.msra.gmra.mrb[12].mxu1 %vm1517_vm5, %v5500_v12  ;;  %v4796_v14 = vpack.c.bf16 %v807_v55, %v807_v55  ;;  %v808_v2 = vmin.f32 %v744_v62, 6.0  ;;  %v2769_v26 = vshll.u32 %v2680_v36, 16  ;;  %v2811_v41 = vshll.u32 %v2686_v37, 16  ;;  %v6466_v10 = vld [vmem:[#allocation2 + $0x17c] sm:$0x1] }
 0x166   :  { %5121 = vmatpush3.bf16.msra.mxu1 %v6399_v45  ;;  %5108 = vmatprep.mubr.msk.bf16.mxu1 %vm1517_vm5, %v5501_v59  ;;  %1421 = vst.msk [vmem:[#allocation2 + $0x228] sm:$0xf] %vm843_vm1, %v4798_v8  ;;  %v4799_v0 = vpack.c.bf16 %v810_v18, %v810_v18  ;;  %v2748_v53 = vrot.slane %v2746_v63, 4  ;;  %v2751_v54 = vrot.slane %v2749_v40, 5  ;;  %v2783_v59 = vshll.u32 %v2682_v44, 16 }
 0x167   :  { %5122 = vmatprep.subr.bf16.mxu1 %v5504_v4  ;;  %1419 = vst.msk [vmem:[#allocation2 + $0x218] sm:$0xf] %vm843_vm1, %v4796_v14  ;;  %v4797_v45 = vpack.c.bf16 %v808_v2, %v808_v2  ;;  %v5505_v42 = vld [vmem:[#allocation2 + $0x208] ss:$8 sps:$4 sm:$0xff]   ;;  %v2737_v12 = vrot.slane %v2735_v11, 5  ;;  %v2725_v55 = vrot.slane %v2724_v46, 4 }
 0x168   :  { %1422 = vst.msk [vmem:[#allocation2 + $0x230] sm:$0xf] %vm843_vm1, %v4799_v0  ;;  %v5503_v6 = vld [vmem:[#allocation2 + $0x1f8] ss:$8 sps:$4 sm:$0xff]   ;;  %v2776_v62 = vrot.slane %v2774_v17, 4  ;;  %v2779_v1 = vrot.slane %v2777_v47, 5  ;;  %v2752_v0 = vor.u32 %v2751_v54, %v2748_v53 }
 0x169   :  { %1420 = vst.msk [vmem:[#allocation2 + $0x220] sm:$0xf] %vm843_vm1, %v4797_v45  ;;  %v6469_v8 = vrot.slane %v2797_v48, 5  ;;  %v2762_v18 = vrot.slane %v2760_v50, 4  ;;  %v2765_v15 = vrot.slane %v2763_v51, 5  ;;  %v6472_v14 = vrot.slane %v2769_v26, 5 }
 0x16a   :  { %5123 = vmatpush3.bf16.msra.mxu1 %v5504_v4  ;;  %v2734_v4 = vrot.slane %v2732_v43, 4  ;;  %v6474_v2 = vrot.slane %v2811_v41, 5  ;;  %v2689_v19 = vld [vmem:[#allocation2 + $0x170] sm:$0xf]  ;;  %v2711_v20 = vrot.slane %v2710_v52, 4  ;;  %v6476_v21 = vrot.slane %v2783_v59, 5 }
 0x16b   :  { %5140 = vmatprep.subr.bf16.mxu1 %v6448_v23  ;;  %v2683_v60 = vld [vmem:[#allocation2 + $0x150] sm:$0xf]  ;;  %v2853_v45 = vshll.u32 %v6466_v10, 16  ;;  %v2802_v27 = vshrl.u32 %v2685_v7, 16  ;;  %v2805_v29 = vshll.u32 %v2685_v7, 16  ;;  %v2730_v57 = vsel %vm6202_vm8, %v2725_v55, %v6458_v13 }
 0x16c   :  { %v2738_v24 = vor.u32 %v2737_v12, %v2734_v4  ;;  %v2687_v30 = vld [vmem:[#allocation2 + $0x168] sm:$0xf]  ;;  %v2780_v25 = vor.u32 %v2779_v1, %v2776_v62  ;;  %v2833_v33 = vshll.u32 %v2689_v19, 16  ;;  %v2766_v3 = vor.u32 %v2765_v15, %v2762_v18  ;;  %v2690_v35 = vld [vmem:[#allocation2 + $0x174] sm:$0x1] }
 0x16d   :  { %5109 = vmatmul.mubr.msk.bf16.gmra.mrb[0].mxu1 %vm1517_vm5, %v5502_v22  ;;  %v2830_v22 = vshrl.u32 %v2689_v19, 16  ;;  %v2788_v9 = vshrl.u32 %v2683_v60, 16  ;;  %v2791_v34 = vshll.u32 %v2683_v60, 16  ;;  %v6483_v36 = vld [vmem:[#allocation2 + $0x184] sm:$0x1]  ;;  %v2716_v5 = vsel %vm6202_vm8, %v2711_v20, %v6453_v31 }
 0x16e   :  { %5112 = vmatprep.mubr.msk.bf16.mxu1 %vm1517_vm5, %v5503_v6  ;;  %v2825_v6 = vshll.u32 %v6464_v56, 16  ;;  %v2753_v38 = vrot.slane %v2752_v0, 4  ;;  %v2816_v49 = vshrl.u32 %v2687_v30, 16  ;;  %v2819_v63 = vshll.u32 %v2687_v30, 16  ;;  %v880_v11 = vld [vmem:[#allocation2 + $0x44] sm:$0x1] }
 0x16f   :  { %v5507_v37 = vld [vmem:[#allocation2 + $0x228] ss:$8 sps:$4 sm:$0xff]   ;;  %v4627_v40 = vcombine.low %v2716_v5, %v2730_v57  ;;  %v2739_v16 = vrot.slane %v2738_v24, 4  ;;  %v2804_v13 = vrot.slane %v2802_v27, 4  ;;  %v2807_v43 = vrot.slane %v2805_v29, 5 }
 0x170   :  { %v5506_v39 = vld [vmem:[#allocation2 + $0x218] ss:$8 sps:$4 sm:$0xff]   ;;  %v2781_v44 = vrot.slane %v2780_v25, 4  ;;  %v2832_v46 = vrot.slane %v2830_v22, 4  ;;  %v2835_v17 = vrot.slane %v2833_v33, 5  ;;  %v2839_v47 = vshll.u32 %v2690_v35, 16 }
 0x171   :  { %v2693_v48 = vld [vmem:[#allocation2 + $0x180] sm:$0xf]  ;;  %v2790_v50 = vrot.slane %v2788_v9, 4  ;;  %v2793_v31 = vrot.slane %v2791_v34, 5  ;;  %v2867_v51 = vshll.u32 %v6483_v36, 16  ;;  %v2758_v41 = vsel %vm6202_vm8, %v2753_v38, %v6460_v58  ;;  %v5509_v24 = vld [vmem:[%s6756_s3 + $0x68] sm:$0xff]  }
 0x172   :  { %v2697_v26 = vld [vmem:[#allocation2 + $0x190] sm:$0xf]  ;;  %v2821_v52 = vrot.slane %v2819_v63, 5  ;;  %v2691_v53 = vld [vmem:[#allocation2 + $0x178] sm:$0xf]  ;;  %v881_v54 = vsel %vm5879_vm4, 0, %v880_v11  ;;  %v2744_v59 = vsel %vm6202_vm8, %v2739_v16, %v6456_v28  ;;  %v2808_v4 = vor.u32 %v2807_v43, %v2804_v13 }
 0x173   :  { %v2858_v12 = vshrl.u32 %v2693_v48, 16  ;;  %v2861_v55 = vshll.u32 %v2693_v48, 16  ;;  %v2695_v62 = vld [vmem:[#allocation2 + $0x188] sm:$0xf]  ;;  %882 = vst [vmem:[#allocation2 + $0x44] sm:$0x1] %v881_v54  ;;  %v2786_v1 = vsel %vm6202_vm8, %v2781_v44, %v6476_v21  ;;  %v2836_v58 = vor.u32 %v2835_v17, %v2832_v46 }
 0x174   :  { %v2886_v7 = vshrl.u32 %v2697_v26, 16  ;;  %v2889_v18 = vshll.u32 %v2697_v26, 16  ;;  %v4628_v15 = vcombine.low %v2744_v59, %v2758_v41  ;;  %v2794_v19 = vor.u32 %v2793_v31, %v2790_v50  ;;  %v2701_v34 = vld [vmem:[#allocation2 + $0x1a0] sm:$0xf]  ;;  %v2698_v5 = vld [vmem:[#allocation2 + $0x194] sm:$0x1] }
 0x175   :  { %5113 = vmatmul.mubr.msk.bf16.gmra.mrb[4].mxu1 %vm1517_vm5, %v5505_v42  ;;  %v2818_v42 = vrot.slane %v2816_v49, 4  ;;  %v2844_v20 = vshrl.u32 %v2691_v53, 16  ;;  %v2847_v0 = vshll.u32 %v2691_v53, 16  ;;  %v2872_v27 = vshrl.u32 %v2695_v62, 16  ;;  %v6516_v16 = vld [vmem:[%s6756_s3 + $0x70] sm:$0xff]  }
 0x176   :  { %5116 = vmatprep.mubr.msk.bf16.mxu1 %vm1517_vm5, %v5506_v39  ;;  %v2767_v39 = vrot.slane %v2766_v3, 4  ;;  %v2875_v29 = vshll.u32 %v2695_v62, 16  ;;  %v2809_v21 = vrot.slane %v2808_v4, 4  ;;  %v2860_v57 = vrot.slane %v2858_v12, 4  ;;  %v2696_v56 = vld [vmem:[#allocation2 + $0x18c] sm:$0x1] }
 0x177   :  { %v2822_v60 = vor.u32 %v2821_v52, %v2818_v42  ;;  %v2863_v25 = vrot.slane %v2861_v55, 5  ;;  %v2837_v22 = vrot.slane %v2836_v58, 4  ;;  %v2841_v33 = vrot.slane %v2839_v47, 5  ;;  %v2702_v59 = vld [vmem:[#allocation2 + $0x1a4] sm:$0x1] }
 0x178   :  { %v2772_v28 = vsel %vm6202_vm8, %v2767_v39, %v6472_v14  ;;  %v2888_v3 = vrot.slane %v2886_v7, 4  ;;  %v2891_v9 = vrot.slane %v2889_v18, 5  ;;  %v2795_v14 = vrot.slane %v2794_v19, 4  ;;  %v2700_v7 = vld [vmem:[#allocation2 + $0x19c] sm:$0x1] }
 0x179   :  { %v4629_v30 = vcombine.low %v2772_v28, %v2786_v1  ;;  %v2827_v35 = vrot.slane %v2825_v6, 5  ;;  %v2846_v36 = vrot.slane %v2844_v20, 4  ;;  %v2823_v38 = vrot.slane %v2822_v60, 4  ;;  %v916_v18 = vld [vmem:[#allocation2 + $0x8c] sm:$0x1] }
 0x17a   :  { %v2874_v49 = vrot.slane %v2872_v27, 4  ;;  %v2877_v63 = vrot.slane %v2875_v29, 5  ;;  %v2864_v13 = vor.u32 %v2863_v25, %v2860_v57  ;;  %v2914_v6 = vshrl.u32 %v2701_v34, 16 }
 0x17b   :  { %v2917_v43 = vshll.u32 %v2701_v34, 16  ;;  %v2842_v11 = vsel %vm6202_vm8, %v2837_v22, %v2841_v33  ;;  %v2869_v44 = vrot.slane %v2867_v51, 5  ;;  %v2892_v46 = vor.u32 %v2891_v9, %v2888_v3  ;;  %v5510_v3 = vld [vmem:[#allocation2 + $0x8] ss:$8 sps:$4 sm:$0xff]   ;;  %v5512_v9 = vld [vmem:[#allocation2 + $0x18] ss:$8 sps:$4 sm:$0xff]  }
 0x17c   :  { %v2895_v17 = vshll.u32 %v2698_v5, 16  ;;  %v2800_v47 = vsel %vm6202_vm8, %v2795_v14, %v6469_v8  ;;  %v2878_v26 = vor.u32 %v2877_v63, %v2874_v49  ;;  %v2881_v41 = vshll.u32 %v2696_v56, 16  ;;  %v5516_v34 = vld [vmem:[%s6756_s3 + $0x78] sm:$0xff]   ;;  %v5513_v14 = vld [vmem:[#allocation2 + $0x28] ss:$8 sps:$4 sm:$0xff]  }
 0x17d   :  { %5117 = vmatmul.mubr.msk.bf16.gmra.mrb[8].mxu1 %vm1517_vm5, %v5507_v37  ;;  %v2849_v37 = vrot.slane %v2847_v0, 5  ;;  %v2865_v51 = vrot.slane %v2864_v13, 4  ;;  %v2916_v52 = vrot.slane %v2914_v6, 4  ;;  %v2919_v53 = vrot.slane %v2917_v43, 5  ;;  %v5517_v5 = vld [vmem:[#allocation2 + $0x60] ss:$8 sps:$4 sm:$0xff]  }
 0x17e   :  { %5124 = vmatprep.mubr.msk.bf16.mxu1 %vm1517_vm5, %v4627_v40  ;;  %v2699_v40 = vld [vmem:[#allocation2 + $0x198] sm:$0xf]  ;;  %v2893_v54 = vrot.slane %v2892_v46, 4  ;;  %v2897_v8 = vrot.slane %v2895_v17, 5  ;;  %v2855_v12 = vrot.slane %v2853_v45, 5  ;;  %v2879_v1 = vrot.slane %v2878_v26, 4 }
 0x17f   :  { %v2850_v48 = vor.u32 %v2849_v37, %v2846_v36  ;;  %v2900_v39 = vshrl.u32 %v2699_v40, 16  ;;  %v2903_v50 = vshll.u32 %v2699_v40, 16  ;;  %v2883_v58 = vrot.slane %v2881_v41, 5  ;;  %v5514_v36 = vld [vmem:[#allocation2 + $0x38] ss:$8 sps:$4 sm:$0xff]  }
 0x180   :  { %v2920_v19 = vor.u32 %v2919_v53, %v2916_v52  ;;  %v2923_v20 = vshll.u32 %v2702_v59, 16  ;;  %v2898_v0 = vsel %vm6202_vm8, %v2893_v54, %v2897_v8  ;;  %v2909_v10 = vshll.u32 %v2700_v7, 16  ;;  %v5515_v37 = vld [vmem:[#allocation2 + $0x50] ss:$8 sps:$4 sm:$0xff]   ;;  %v5519_v49 = vld [vmem:[#allocation2 + $0x80] ss:$8 sps:$4 sm:$0xff]  }
 0x181   :  { %v2851_v4 = vrot.slane %v2850_v48, 4  ;;  %v2902_v55 = vrot.slane %v2900_v39, 4  ;;  %v2905_v62 = vrot.slane %v2903_v50, 5  ;;  %v917_v45 = vsel %vm5879_vm4, 0, %v916_v18  ;;  %v5520_v63 = vld [vmem:[#allocation2 + $0x98] ss:$8 sps:$4 sm:$0xff]  }
 0x182   :  { %v2884_v27 = vsel %vm6202_vm8, %v2879_v1, %v2883_v58  ;;  %918 = vst [vmem:[#allocation2 + $0x8c] sm:$0x1] %v917_v45  ;;  %v2911_v25 = vrot.slane %v2909_v10, 5  ;;  %v3527_v40 = vld [vmem:[#allocation2 + $0x8] sm:$0xf] }
 0x183   :  { %v2856_v28 = vsel %vm6202_vm8, %v2851_v4, %v2855_v12  ;;  %v2906_v60 = vor.u32 %v2905_v62, %v2902_v55  ;;  %v4633_v29 = vcombine.low %v2884_v27, %v2898_v0  ;;  %v3529_v13 = vld [vmem:[#allocation2 + $0x10] sm:$0xf]  ;;  %v5523_v56 = vld [vmem:[#allocation2 + $0xb8] ss:$8 sps:$4 sm:$0xff]   ;;  %v3560_v6 = vshrl.u32 %v3527_v40, 16 }
 0x184   :  { %v3563_v43 = vshll.u32 %v3527_v40, 16  ;;  %v3531_v46 = vld [vmem:[#allocation2 + $0x18] sm:$0xf]  ;;  %v3533_v17 = vld [vmem:[#allocation2 + $0x20] sm:$0xf] }
 0x185   :  { %5125 = vmatmul.mubr.msk.bf16.vlgmr.msra.gmra.mrb[12].mxu1 %vm1517_vm5, %v4628_v15  ;;  %v2870_v15 = vsel %vm6202_vm8, %v2865_v51, %v2869_v44  ;;  %v2907_v57 = vrot.slane %v2906_v60, 4  ;;  %v3577_v44 = vshll.u32 %v3529_v13, 16  ;;  %v3528_v39 = vld [vmem:[#allocation2 + $0xc] sm:$0x1]  ;;  %v3591_v26 = vshll.u32 %v3531_v46, 16 }
 0x186   :  { %5141 = vmatpush3.bf16.msra.mxu1 %v6448_v23  ;;  %5128 = vmatprep.mubr.msk.bf16.mxu1 %vm1517_vm5, %v4629_v30  ;;  %v2814_v23 = vsel %vm6202_vm8, %v2809_v21, %v6474_v2  ;;  %v2828_v2 = vsel %vm6202_vm8, %v2823_v38, %v2827_v35  ;;  %v2921_v30 = vrot.slane %v2920_v19, 4  ;;  %v2925_v21 = vrot.slane %v2923_v20, 5  ;;  %v5521_v35 = vld [vmem:[%s6756_s3 + $0x80] sm:$0xff]   ;;  %v5518_v38 = vld [vmem:[#allocation2 + $0x70] ss:$8 sps:$4 sm:$0xff]  }
 0x187   :  { %5142 = vmatprep.subr.bf16.mxu1 %v5509_v24  ;;  %v4630_v31 = vcombine.low %v2800_v47, %v2814_v23  ;;  %v4631_v42 = vcombine.low %v2828_v2, %v2842_v11  ;;  %v2912_v32 = vsel %vm6202_vm8, %v2907_v57, %v2911_v25  ;;  %v5526_v23 = vld [vmem:[%s6756_s3 + $0x88] sm:$0xff]   ;;  %v3574_v11 = vshrl.u32 %v3529_v13, 16  ;;  %v3537_v4 = vld [vmem:[#allocation2 + $0x30] sm:$0xf]  ;;  %v3532_v62 = vld [vmem:[#allocation2 + $0x1c] sm:$0x1] }
 0x188   :  { %v2926_v22 = vsel %vm6202_vm8, %v2921_v30, %v2925_v21  ;;  %v3562_v47 = vrot.slane %v3560_v6, 4  ;;  %v3565_v48 = vrot.slane %v3563_v43, 5  ;;  %v3588_v2 = vshrl.u32 %v3531_v46, 16  ;;  %v5524_v41 = vld [vmem:[#allocation2 + $0xc8] ss:$8 sps:$4 sm:$0xff]  }
 0x189   :  { %v4634_v33 = vcombine.low %v2912_v32, %v2926_v22  ;;  %v3576_v50 = vrot.slane %v3574_v11, 4  ;;  %v3602_v51 = vshrl.u32 %v3533_v17, 16  ;;  %v3605_v52 = vshll.u32 %v3533_v17, 16  ;;  %v5525_v53 = vld [vmem:[#allocation2 + $0xe0] ss:$8 sps:$4 sm:$0xff]  }
 0x18a   :  { %5143 = vmatpush3.bf16.msra.mxu1 %v5509_v24  ;;  %v4632_v24 = vcombine.low %v2856_v28, %v2870_v15  ;;  %v3535_v54 = vld [vmem:[#allocation2 + $0x28] sm:$0xf]  ;;  %v3566_v8 = vor.u32 %v3565_v48, %v3562_v47  ;;  %v3569_v59 = vshll.u32 %v3528_v39, 16  ;;  %v3590_v1 = vrot.slane %v3588_v2, 4  ;;  %v3534_v7 = vld [vmem:[#allocation2 + $0x24] sm:$0x1] }
 0x18b   :  { %5160 = vmatprep.subr.bf16.mxu1 %v6516_v16  ;;  %v3593_v58 = vrot.slane %v3591_v26, 5  ;;  %v3604_v18 = vrot.slane %v3602_v51, 4  ;;  %v3607_v15 = vrot.slane %v3605_v52, 5  ;;  %v3616_v19 = vshrl.u32 %v3535_v54, 16  ;;  %v5527_v60 = vld [vmem:[#allocation2 + $0xf0] ss:$8 sps:$4 sm:$0xff]  }
 0x18c   :  { %v3619_v20 = vshll.u32 %v3535_v54, 16  ;;  %v3630_v0 = vshrl.u32 %v3537_v4, 16  ;;  %v3633_v28 = vshll.u32 %v3537_v4, 16  ;;  %v3567_v10 = vrot.slane %v3566_v8, 4  ;;  %v3539_v27 = vld [vmem:[#allocation2 + $0x38] sm:$0xf] }
 0x18d   :  { %5129 = vmatmul.mubr.msk.bf16.gmra.mrb[0].mxu1 %vm1517_vm5, %v4630_v31  ;;  %v3579_v31 = vrot.slane %v3577_v44, 5  ;;  %v3571_v45 = vrot.slane %v3569_v59, 5  ;;  %v3594_v21 = vor.u32 %v3593_v58, %v3590_v1  ;;  %v3611_v57 = vshll.u32 %v3534_v7, 16  ;;  %v3541_v25 = vld [vmem:[#allocation2 + $0x40] sm:$0xf] }
 0x18e   :  { %5132 = vmatprep.mubr.msk.bf16.mxu1 %vm1517_vm5, %v4631_v42  ;;  %v3530_v42 = vld [vmem:[#allocation2 + $0x14] sm:$0x1]  ;;  %v3608_v32 = vor.u32 %v3607_v15, %v3604_v18  ;;  %v3661_v40 = vshll.u32 %v3541_v25, 16  ;;  %v3545_v13 = vld [vmem:[#allocation2 + $0x58] sm:$0xf] }
 0x18f   :  { %v3580_v12 = vor.u32 %v3579_v31, %v3576_v50  ;;  %v3583_v55 = vshll.u32 %v3530_v42, 16  ;;  %v3540_v48 = vld [vmem:[#allocation2 + $0x3c] sm:$0x1]  ;;  %v3544_v26 = vld [vmem:[#allocation2 + $0x54] sm:$0x1]  ;;  %v3689_v42 = vshll.u32 %v3545_v13, 16 }
 0x190   :  { %v3609_v11 = vrot.slane %v3608_v32, 4  ;;  %v3663_v2 = vrot.slane %v3661_v40, 5  ;;  %v5529_v51 = vld [vmem:[#allocation2 + $0x110] ss:$8 sps:$4 sm:$0xff]   ;;  %v3681_v7 = vshll.u32 %v3544_v26, 16 }
 0x191   :  { %v3585_v30 = vrot.slane %v3583_v55, 5  ;;  %v3581_v22 = vrot.slane %v3580_v12, 4  ;;  %v3542_v12 = vld [vmem:[#allocation2 + $0x44] sm:$0x1]  ;;  %v3653_v55 = vshll.u32 %v3540_v48, 16 }
 0x192   :  { %v3549_v18 = vld [vmem:[#allocation2 + $0x68] sm:$0xf]  ;;  %v3683_v32 = vrot.slane %v3681_v7, 5 }
 0x193   :  { %v3586_v43 = vsel %vm6202_vm8, %v3581_v22, %v3585_v30  ;;  %v3547_v30 = vld [vmem:[#allocation2 + $0x60] sm:$0xf] }
 0x195   :  { %5133 = vmatmul.mubr.msk.bf16.gmra.mrb[4].mxu1 %vm1517_vm5, %v4632_v24  ;;  %v3597_v24 = vshll.u32 %v3532_v62, 16 }
 0x196   :  { %5136 = vmatprep.mubr.msk.bf16.mxu1 %vm1517_vm5, %v4633_v29  ;;  %v5528_v29 = vld [vmem:[#allocation2 + $0x100] ss:$8 sps:$4 sm:$0xff]  }
 0x19d   :  { %5137 = vmatmul.mubr.msk.bf16.gmra.mrb[8].mxu1 %vm1517_vm5, %v4634_v33  ;;  %v3618_v33 = vrot.slane %v3616_v19, 4 }
 0x19e   :  { %5144 = vmatprep.mubr.msk.bf16.mxu1 %vm1517_vm5, %v5510_v3  ;;  %v3621_v3 = vrot.slane %v3619_v20, 5  ;;  %v3546_v20 = vld [vmem:[#allocation2 + $0x5c] sm:$0x1] }
 0x1a0   :  { %v3622_v44 = vor.u32 %v3621_v3, %v3618_v33  ;;  %v3695_v33 = vshll.u32 %v3546_v20, 16  ;;  %v3553_v3 = vld [vmem:[#allocation2 + $0x78] sm:$0xf] }
 0x1a1   :  { %v3742_v40 = vshrl.u32 %v3553_v3, 16 }
 0x1a2   :  { %v3623_v59 = vrot.slane %v3622_v44, 4 }
 0x1a5   :  { %5145 = vmatmul.mubr.msk.bf16.vlgmr.msra.gmra.mrb[12].mxu1 %vm1517_vm5, %v5512_v9  ;;  %v3543_v9 = vld [vmem:[#allocation2 + $0x50] sm:$0xf] }
 0x1a6   :  { %5161 = vmatpush3.bf16.msra.mxu1 %v6516_v16  ;;  %5148 = vmatprep.mubr.msk.bf16.mxu1 %vm1517_vm5, %v5513_v14  ;;  %v5522_v16 = vld [vmem:[#allocation2 + $0xa8] ss:$8 sps:$4 sm:$0xff]   ;;  %v3632_v14 = vrot.slane %v3630_v0, 4  ;;  %v3675_v6 = vshll.u32 %v3543_v9, 16 }
 0x1a7   :  { %5162 = vmatprep.subr.bf16.mxu1 %v5516_v34 }
 0x1a8   :  { %v3677_v54 = vrot.slane %v3675_v6, 5  ;;  %v3555_v6 = vld [vmem:[#allocation2 + $0x80] sm:$0xf] }
 0x1aa   :  { %5163 = vmatpush3.bf16.msra.mxu1 %v5516_v34  ;;  %v3536_v34 = vld [vmem:[#allocation2 + $0x2c] sm:$0x1] }
 0x1ab   :  { %5180 = vmatprep.subr.bf16.mxu1 %v5521_v35  ;;  %v3625_v46 = vshll.u32 %v3536_v34, 16 }
 0x1ad   :  { %5149 = vmatmul.mubr.msk.bf16.gmra.mrb[0].mxu1 %vm1517_vm5, %v5514_v36  ;;  %v3644_v36 = vshrl.u32 %v3539_v27, 16  ;;  %v3627_v4 = vrot.slane %v3625_v46, 5 }
 0x1ae   :  { %5152 = vmatprep.mubr.msk.bf16.mxu1 %vm1517_vm5, %v5515_v37  ;;  %v3647_v37 = vshll.u32 %v3539_v27, 16 }
 0x1af   :  { %v3646_v39 = vrot.slane %v3644_v36, 4  ;;  %v3628_v27 = vsel %vm6202_vm8, %v3623_v59, %v3627_v4 }
 0x1b0   :  { %v3649_v50 = vrot.slane %v3647_v37, 5 }
 0x1b2   :  { %v3650_v58 = vor.u32 %v3649_v50, %v3646_v39 }
 0x1b4   :  { %v3651_v22 = vrot.slane %v3650_v58, 4 }
 0x1b5   :  { %5153 = vmatmul.mubr.msk.bf16.gmra.mrb[4].mxu1 %vm1517_vm5, %v5517_v5  ;;  %v3572_v5 = vsel %vm6202_vm8, %v3567_v10, %v3571_v45  ;;  %v3667_v10 = vshll.u32 %v3542_v12, 16 }
 0x1b6   :  { %5156 = vmatprep.mubr.msk.bf16.mxu1 %vm1517_vm5, %v5518_v38  ;;  %v3599_v38 = vrot.slane %v3597_v24, 5  ;;  %v4693_v52 = vcombine.low %v3572_v5, %v3586_v43  ;;  %v3551_v24 = vld [vmem:[#allocation2 + $0x70] sm:$0xf]  ;;  %v3700_v5 = vshrl.u32 %v3547_v30, 16 }
 0x1b7   :  { %v3669_v36 = vrot.slane %v3667_v10, 5 }
 0x1b8   :  { %v3702_v39 = vrot.slane %v3700_v5, 4 }
 0x1bd   :  { %5157 = vmatmul.mubr.msk.bf16.gmra.mrb[8].mxu1 %vm1517_vm5, %v5519_v49  ;;  %v3538_v49 = vld [vmem:[#allocation2 + $0x34] sm:$0x1] }
 0x1be   :  { %5164 = vmatprep.mubr.msk.bf16.mxu1 %vm1517_vm5, %v5520_v63  ;;  %v3658_v63 = vshrl.u32 %v3541_v25, 16  ;;  %v3639_v47 = vshll.u32 %v3538_v49, 16 }
 0x1c0   :  { %v3660_v31 = vrot.slane %v3658_v63, 4  ;;  %v3641_v1 = vrot.slane %v3639_v47, 5 }
 0x1c2   :  { %v3664_v19 = vor.u32 %v3663_v2, %v3660_v31  ;;  %v3552_v31 = vld [vmem:[#allocation2 + $0x74] sm:$0x1]  ;;  %v3548_v2 = vld [vmem:[#allocation2 + $0x64] sm:$0x1] }
 0x1c3   :  { %v3709_v7 = vshll.u32 %v3548_v2, 16 }
 0x1c5   :  { %5165 = vmatmul.mubr.msk.bf16.vlgmr.msra.gmra.mrb[12].mxu1 %vm1517_vm5, %v5522_v16  ;;  %v3595_v16 = vrot.slane %v3594_v21, 4  ;;  %v3714_v21 = vshrl.u32 %v3549_v18, 16 }
 0x1c6   :  { %5181 = vmatpush3.bf16.msra.mxu1 %v5521_v35  ;;  %5168 = vmatprep.mubr.msk.bf16.mxu1 %vm1517_vm5, %v5523_v56  ;;  %v3635_v35 = vrot.slane %v3633_v28, 5  ;;  %v3672_v56 = vshrl.u32 %v3543_v9, 16  ;;  %v3691_v28 = vrot.slane %v3689_v42, 5  ;;  %v3665_v9 = vrot.slane %v3664_v19, 4 }
 0x1c7   :  { %5182 = vmatprep.subr.bf16.mxu1 %v5526_v23  ;;  %v3600_v15 = vsel %vm6202_vm8, %v3595_v16, %v3599_v38  ;;  %v3703_v38 = vshll.u32 %v3547_v30, 16  ;;  %v3716_v49 = vrot.slane %v3714_v21, 4  ;;  %v3745_v16 = vshll.u32 %v3553_v3, 16 }
 0x1c8   :  { %v3636_v17 = vor.u32 %v3635_v35, %v3632_v14  ;;  %v3728_v14 = vshrl.u32 %v3551_v24, 16  ;;  %v3731_v35 = vshll.u32 %v3551_v24, 16  ;;  %v3670_v47 = vsel %vm6202_vm8, %v3665_v9, %v3669_v36 }
 0x1c9   :  { %v3705_v50 = vrot.slane %v3703_v38, 5  ;;  %v3744_v42 = vrot.slane %v3742_v40, 4  ;;  %v3711_v21 = vrot.slane %v3709_v7, 5 }
 0x1ca   :  { %5183 = vmatpush3.bf16.msra.mxu1 %v5526_v23  ;;  %v3613_v23 = vrot.slane %v3611_v57, 5  ;;  %v3637_v62 = vrot.slane %v3636_v17, 4  ;;  %v3717_v57 = vshll.u32 %v3549_v18, 16  ;;  %v3730_v44 = vrot.slane %v3728_v14, 4  ;;  %v3557_v17 = vld [vmem:[#allocation2 + $0x88] sm:$0xf] }
 0x1cb   :  { %v3733_v46 = vrot.slane %v3731_v35, 5  ;;  %v3773_v59 = vshll.u32 %v3557_v17, 16  ;;  %v3706_v58 = vor.u32 %v3705_v50, %v3702_v39 }
 0x1cc   :  { %v3614_v8 = vsel %vm6202_vm8, %v3609_v11, %v3613_v23  ;;  %v3642_v25 = vsel %vm6202_vm8, %v3637_v62, %v3641_v1  ;;  %v3719_v63 = vrot.slane %v3717_v57, 5  ;;  %v3697_v11 = vrot.slane %v3695_v33, 5 }
 0x1cd   :  { %5169 = vmatmul.mubr.msk.bf16.gmra.mrb[0].mxu1 %vm1517_vm5, %v5524_v41  ;;  %v3686_v41 = vshrl.u32 %v3545_v13, 16  ;;  %v4695_v23 = vcombine.low %v3628_v27, %v3642_v25  ;;  %v3734_v12 = vor.u32 %v3733_v46, %v3730_v44  ;;  %v3707_v30 = vrot.slane %v3706_v58, 4 }
 0x1ce   :  { %5172 = vmatprep.mubr.msk.bf16.mxu1 %vm1517_vm5, %v5525_v53  ;;  %v3674_v53 = vrot.slane %v3672_v56, 4  ;;  %v3550_v56 = vld [vmem:[#allocation2 + $0x6c] sm:$0x1]  ;;  %v3720_v26 = vor.u32 %v3719_v63, %v3716_v49 }
 0x1cf   :  { %v3688_v0 = vrot.slane %v3686_v41, 4  ;;  %v3723_v41 = vshll.u32 %v3550_v56, 16  ;;  %v3735_v24 = vrot.slane %v3734_v12, 4  ;;  %v3712_v14 = vsel %vm6202_vm8, %v3707_v30, %v3711_v21 }
 0x1d0   :  { %v3678_v45 = vor.u32 %v3677_v54, %v3674_v53  ;;  %v3756_v53 = vshrl.u32 %v3555_v6, 16  ;;  %v3759_v54 = vshll.u32 %v3555_v6, 16  ;;  %v3721_v18 = vrot.slane %v3720_v26, 4 }
 0x1d1   :  { %v3692_v34 = vor.u32 %v3691_v28, %v3688_v0  ;;  %v3556_v0 = vld [vmem:[#allocation2 + $0x84] sm:$0x1] }
 0x1d2   :  { %v3679_v37 = vrot.slane %v3678_v45, 4  ;;  %v3758_v28 = vrot.slane %v3756_v53, 4  ;;  %v3775_v45 = vrot.slane %v3773_v59, 5  ;;  %v6644_v53 = vld [vmem:[%s6757_s4] ss:$0 sm:$0xff] }
 0x1d3   :  { %v3693_v43 = vrot.slane %v3692_v34, 4 }
 0x1d4   :  { %v3684_v48 = vsel %vm6202_vm8, %v3679_v37, %v3683_v32 }
 0x1d5   :  { %5173 = vmatmul.mubr.msk.bf16.gmra.mrb[4].mxu1 %vm1517_vm5, %v5527_v60  ;;  %v4694_v60 = vcombine.low %v3600_v15, %v3614_v8  ;;  %v3770_v8 = vshrl.u32 %v3557_v17, 16  ;;  %v3698_v4 = vsel %vm6202_vm8, %v3693_v43, %v3697_v11  ;;  %v3725_v15 = vrot.slane %v3723_v41, 5  ;;  %v5530_v41 = vld [vmem:[%s6758_s5] sm:$0xff]  }
 0x1d6   :  { %5176 = vmatprep.mubr.msk.bf16.mxu1 %vm1517_vm5, %v5528_v29  ;;  %v3655_v29 = vrot.slane %v3653_v55, 5  ;;  %v3737_v55 = vshll.u32 %v3552_v31, 16  ;;  %v4697_v1 = vcombine.low %v3684_v48, %v3698_v4  ;;  %5200 = vmatprep.subr.bf16.mxu0 %v5530_v41 }
 0x1d7   :  { %v3772_v10 = vrot.slane %v3770_v8, 4  ;;  %v3726_v32 = vsel %vm6202_vm8, %v3721_v18, %v3725_v15  ;;  %5201 = vmatpush3.bf16.msra.mxu0 %v5530_v41 }
 0x1d8   :  { %v3656_v13 = vsel %vm6202_vm8, %v3651_v22, %v3655_v29  ;;  %v3739_v27 = vrot.slane %v3737_v55, 5  ;;  %v3558_v29 = vld [vmem:[#allocation2 + $0x8c] sm:$0x1]  ;;  %v3765_v22 = vshll.u32 %v3556_v0, 16  ;;  %v4698_v35 = vcombine.low %v3712_v14, %v3726_v32 }
 0x1d9   :  { %v4696_v62 = vcombine.low %v3656_v13, %v3670_v47  ;;  %v3776_v3 = vor.u32 %v3775_v45, %v3772_v10  ;;  %v3779_v9 = vshll.u32 %v3558_v29, 16 }
 0x1da   :  { %v3740_v34 = vsel %vm6202_vm8, %v3735_v24, %v3739_v27  ;;  %v3767_v37 = vrot.slane %v3765_v22, 5 }
 0x1db   :  { %v3777_v49 = vrot.slane %v3776_v3, 4  ;;  %v3781_v63 = vrot.slane %v3779_v9, 5 }
 0x1dd   :  { %5177 = vmatmul.mubr.msk.bf16.gmra.mrb[8].mxu1 %vm1517_vm5, %v5529_v51  ;;  %v3747_v51 = vrot.slane %v3745_v16, 5 }
 0x1de   :  { %5184 = vmatprep.mubr.msk.bf16.mxu1 %vm1517_vm5, %v4693_v52  ;;  %v3554_v52 = vld [vmem:[#allocation2 + $0x7c] sm:$0x1] }
 0x1df   :  { %v3748_v19 = vor.u32 %v3747_v51, %v3744_v42  ;;  %v3751_v20 = vshll.u32 %v3554_v52, 16  ;;  %v5531_v42 = vld [vmem:[%s6758_s5 + $0x8] sm:$0xff]   ;;  %v5532_v51 = vld [vmem:[%s6760_s7] sm:$0xff]  }
 0x1e0   :  { %5202 = vmatprep.subr.bf16.mxu0 %v5531_v42 }
 0x1e1   :  { %v3749_v57 = vrot.slane %v3748_v19, 4  ;;  %v3753_v25 = vrot.slane %v3751_v20, 5  ;;  %5203 = vmatpush3.bf16.msra.mxu0 %v5531_v42 }
 0x1e2   :  { %5220 = vmatprep.subr.bf16.mxu0 %v5532_v51 }
 0x1e3   :  { %v3754_v36 = vsel %vm6202_vm8, %v3749_v57, %v3753_v25 }
 0x1e4   :  { %v4699_v5 = vcombine.low %v3740_v34, %v3754_v36 }
 0x1e5   :  { %5185 = vmatmul.mubr.msk.bf16.vlgmr.msra.gmra.mrb[12].mxu1 %vm1517_vm5, %v4694_v60  ;;  %v3761_v60 = vrot.slane %v3759_v54, 5 }
 0x1e6   :  { %5188 = vmatprep.mubr.msk.bf16.mxu1 %vm1517_vm5, %v4695_v23  ;;  %v3782_v23 = vsel %vm6202_vm8, %v3777_v49, %v3781_v63 }
 0x1e7   :  { %v3762_v33 = vor.u32 %v3761_v60, %v3758_v28 }
 0x1e9   :  { %v3763_v38 = vrot.slane %v3762_v33, 4 }
 0x1eb   :  { %v3768_v16 = vsel %vm6202_vm8, %v3763_v38, %v3767_v37 }
 0x1ec   :  { %v4700_v43 = vcombine.low %v3768_v16, %v3782_v23 }
 0x1ed   :  { %5189 = vmatmul.mubr.msk.bf16.gmra.mrb[0].mxu1 %vm1517_vm5, %v4696_v62 }
 0x1ee   :  { %5192 = vmatprep.mubr.msk.bf16.mxu1 %vm1517_vm5, %v4697_v1 }
 0x1f5   :  { %5193 = vmatmul.mubr.msk.bf16.gmra.mrb[4].mxu1 %vm1517_vm5, %v4698_v35  ;;  %v5030_v40 = vpop.f32.mrb[68].mxu0  ;;  %v5533_v35 = vld [vmem:[%s6760_s7 + $0x8] sm:$0xff]  }
 0x1f6   :  { %5196 = vmatprep.mubr.msk.bf16.mxu1 %vm1517_vm5, %v4699_v5  ;;  %v1592_v13 = vpop.f32.mrb[69].mxu0 }
 0x1f7   :  { %v5031_v56 = vpop.f32.mrb[70].mxu0 }
 0x1f8   :  { %v1595_v6 = vpop.f32.mrb[71].mxu0 }
 0x1fd   :  { %5197 = vmatmul.mubr.msk.bf16.gmra.mrb[8].mxu1 %vm1517_vm5, %v4700_v43  ;;  %v6616_v11 = vpop.f32.mrb[72].mxu0 }
 0x1fe   :  { %v6618_v44 = vpop.f32.mrb[73].mxu0 }
 0x1ff   :  { %v6620_v46 = vpop.f32.mrb[74].mxu0 }
 0x200   :  { %v6622_v17 = vpop.f32.mrb[75].mxu0 }
 0x206   :  { %v6624_v47 = vpop.f32.mrb[76].mxu0 }
 0x207   :  { %v6626_v48 = vpop.f32.mrb[77].mxu0 }
 0x208   :  { %v6628_v61 = vpop.f32.mrb[78].mxu0 }
 0x209   :  { %v6630_v39 = vpop.f32.mrb[79].mxu0 }
 0x20e   :  { %v5046_v50 = vpop.f32.mrb[64].mxu0 }
 0x20f   :  { %v1749_v31 = vpop.f32.mrb[65].mxu0 }
 0x210   :  { %v5047_v2 = vpop.f32.mrb[66].mxu0 }
 0x211   :  { %v1752_v26 = vpop.f32.mrb[67].mxu0 }
 0x2b8   :  { %v5186_v52 = vpop.f32.mrb[12].mxu1 }
 0x2b9   :  { %v5248_v54 = vadd.f32 %v5186_v52, %v5046_v50  ;;  %v3882_v8 = vpop.f32.mrb[13].mxu1 }
 0x2ba   :  { %v5249_v59 = vadd.f32 %v3882_v8, %v1749_v31  ;;  %v5187_v4 = vpop.f32.mrb[14].mxu1 }
 0x2bb   :  { %v3970_v12 = vadd.f32 %v5248_v54, %v6644_v53  ;;  %v5250_v55 = vadd.f32 %v5187_v4, %v5047_v2  ;;  %v3885_v62 = vpop.f32.mrb[15].mxu1 }
 0x2bc   :  { %v3968_v1 = vadd.f32 %v5249_v59, %v6644_v53  ;;  %v5251_v58 = vadd.f32 %v3885_v62, %v1752_v26 }
 0x2bd   :  { %v3986_v7 = vmax.f32 %v3970_v12, 0.0  ;;  %v3971_v18 = vadd.f32 %v5250_v55, %v6644_v53 }
 0x2be   :  { %v3984_v15 = vmax.f32 %v3968_v1, 0.0  ;;  %v3969_v19 = vadd.f32 %v5251_v58, %v6644_v53 }
 0x2bf   :  { %v3987_v20 = vmax.f32 %v3971_v18, 0.0  ;;  %v4002_v60 = vmin.f32 %v3986_v7, 6.0 }
 0x2c0   :  { %v3985_v0 = vmax.f32 %v3969_v19, 0.0  ;;  %v5190_v28 = vpop.f32.mrb[0].mxu1  ;;  %v4000_v27 = vmin.f32 %v3984_v15, 6.0 }
 0x2c1   :  { %v4003_v10 = vmin.f32 %v3987_v20, 6.0  ;;  %v5252_v45 = vadd.f32 %v5190_v28, %v5030_v40  ;;  %v3898_v24 = vpop.f32.mrb[1].mxu1 }
 0x2c2   :  { %v4001_v29 = vmin.f32 %v3985_v0, 6.0  ;;  %v5253_v30 = vadd.f32 %v3898_v24, %v1592_v13  ;;  %v5191_v21 = vpop.f32.mrb[2].mxu1  ;;  %v5534_v13 = vld [vmem:[%s6760_s7 + $0x10] sm:$0xff]  }
 0x2c3   :  { %v4017_v57 = vpack.c.bf16 %v4003_v10, %v4002_v60  ;;  %v3974_v25 = vadd.f32 %v5252_v45, %v6644_v53  ;;  %v5254_v22 = vadd.f32 %v5191_v21, %v5031_v56  ;;  %v3901_v32 = vpop.f32.mrb[3].mxu1 }
 0x2c4   :  { %v4016_v33 = vpack.c.bf16 %v4001_v29, %v4000_v27  ;;  %v3972_v3 = vadd.f32 %v5253_v30, %v6644_v53  ;;  %v5255_v9 = vadd.f32 %v3901_v32, %v1595_v6 }
 0x2c5   :  { %v3990_v34 = vmax.f32 %v3974_v25, 0.0  ;;  %v3975_v14 = vadd.f32 %v5254_v22, %v6644_v53 }
 0x2c6   :  { %v3988_v36 = vmax.f32 %v3972_v3, 0.0  ;;  %v3973_v37 = vadd.f32 %v5255_v9, %v6644_v53  ;;  %5204 = vmatprep.mubr.msk.bf16.mxu0 %vm1517_vm5, %v4016_v33  ;;  %v5541_v33 = vld [vmem:[%s6753_s0 + $0x10] sm:$0xff]   ;;  %v5542_v3 = vld [vmem:[%s6753_s0 + $0x18] sm:$0xff]   ;;  %v5543_v9 = vld [vmem:[%s6753_s0 + $0x20] sm:$0xff]  }
 0x2c7   :  { %v3991_v5 = vmax.f32 %v3975_v14, 0.0  ;;  %5205 = vmatmul.mubr.msk.bf16.vlgmr.msra.gmra.mrb[80].mxu0 %vm1517_vm5, %v4017_v57  ;;  %v4006_v63 = vmin.f32 %v3990_v34, 6.0  ;;  %v5544_v34 = vld [vmem:[%s6753_s0 + $0x28] sm:$0xff]   ;;  %v5545_v14 = vld [vmem:[%s6753_s0 + $0x30] sm:$0xff]  }
 0x2c8   :  { %v3989_v38 = vmax.f32 %v3973_v37, 0.0  ;;  %5221 = vmatpush3.bf16.msra.mxu0 %v5532_v51  ;;  %v5194_v49 = vpop.f32.mrb[4].mxu1  ;;  %v4004_v56 = vmin.f32 %v3988_v36, 6.0  ;;  %v4712_v36 = vld [vmem:[%s6759_s6] ss:$0 sm:$0xff] }
 0x2c9   :  { %v4007_v40 = vmin.f32 %v3991_v5, 6.0  ;;  %v5256_v16 = vadd.f32 %v5194_v49, %v6616_v11  ;;  %v3914_v23 = vpop.f32.mrb[5].mxu1  ;;  %5222 = vmatprep.subr.bf16.mxu0 %v5533_v35  ;;  %v4723_v37 = vld [vmem:[%s6761_s8] ss:$0 sm:$0xff] }
 0x2ca   :  { %v4005_v6 = vmin.f32 %v3989_v38, 6.0  ;;  %v5257_v43 = vadd.f32 %v3914_v23, %v6618_v44  ;;  %v5195_v50 = vpop.f32.mrb[6].mxu1  ;;  %v5535_v44 = vld [vmem:[%s6760_s7 + $0x18] sm:$0xff]   ;;  %v6725_v5 = vadd.f32 %v4723_v37, %v4712_v36 }
 0x2cb   :  { %v4019_v31 = vpack.c.bf16 %v4007_v40, %v4006_v63  ;;  %v3978_v2 = vadd.f32 %v5256_v16, %v6644_v53  ;;  %v5258_v26 = vadd.f32 %v5195_v50, %v6620_v46  ;;  %v3917_v41 = vpop.f32.mrb[7].mxu1 }
 0x2cc   :  { %v4018_v42 = vpack.c.bf16 %v4005_v6, %v4004_v56  ;;  %v3976_v11 = vadd.f32 %v5257_v43, %v6644_v53  ;;  %v5259_v51 = vadd.f32 %v3917_v41, %v6622_v17  ;;  %5223 = vmatpush3.bf16.msra.mxu0 %v5533_v35  ;;  %v5546_v35 = vld [vmem:[%s6753_s0 + $0x38] sm:$0xff]  }
 0x2cd   :  { %v3994_v52 = vmax.f32 %v3978_v2, 0.0  ;;  %v3979_v54 = vadd.f32 %v5258_v26, %v6644_v53  ;;  %5224 = vmatprep.subr.bf16.mxu0 %v5534_v13 }
 0x2ce   :  { %v3992_v8 = vmax.f32 %v3976_v11, 0.0  ;;  %v3977_v59 = vadd.f32 %v5259_v51, %v6644_v53  ;;  %5208 = vmatprep.mubr.msk.bf16.mxu0 %vm1517_vm5, %v4018_v42 }
 0x2cf   :  { %v3995_v46 = vmax.f32 %v3979_v54, 0.0  ;;  %5209 = vmatmul.mubr.msk.bf16.gmra.mrb[84].mxu0 %vm1517_vm5, %v4019_v31  ;;  %v4010_v17 = vmin.f32 %v3994_v52, 6.0 }
 0x2d0   :  { %v3993_v4 = vmax.f32 %v3977_v59, 0.0  ;;  %v5198_v12 = vpop.f32.mrb[8].mxu1  ;;  %5225 = vmatpush3.bf16.msra.mxu0 %v5534_v13  ;;  %v4008_v58 = vmin.f32 %v3992_v8, 6.0 }
 0x2d1   :  { %v4011_v55 = vmin.f32 %v3995_v46, 6.0  ;;  %v5260_v62 = vadd.f32 %v5198_v12, %v6624_v47  ;;  %v3930_v1 = vpop.f32.mrb[9].mxu1  ;;  %5226 = vmatprep.subr.bf16.mxu0 %v5535_v44 }
 0x2d2   :  { %v4009_v7 = vmin.f32 %v3993_v4, 6.0  ;;  %v5261_v18 = vadd.f32 %v3930_v1, %v6626_v48  ;;  %v5199_v15 = vpop.f32.mrb[10].mxu1 }
 0x2d3   :  { %v4021_v19 = vpack.c.bf16 %v4011_v55, %v4010_v17  ;;  %v3982_v20 = vadd.f32 %v5260_v62, %v6644_v53  ;;  %v5262_v0 = vadd.f32 %v5199_v15, %v6628_v61  ;;  %v3933_v28 = vpop.f32.mrb[11].mxu1 }
 0x2d4   :  { %v4020_v60 = vpack.c.bf16 %v4009_v7, %v4008_v58  ;;  %v3980_v10 = vadd.f32 %v5261_v18, %v6644_v53  ;;  %v5263_v45 = vadd.f32 %v3933_v28, %v6630_v39  ;;  %5227 = vmatpush3.bf16.msra.mxu0 %v5535_v44  ;;  %v5539_v39 = vld [vmem:[%s6753_s0] sm:$0xff]  }
 0x2d5   :  { %v3998_v47 = vmax.f32 %v3982_v20, 0.0  ;;  %v3983_v24 = vadd.f32 %v5262_v0, %v6644_v53 }
 0x2d6   :  { %v3996_v27 = vmax.f32 %v3980_v10, 0.0  ;;  %v3981_v29 = vadd.f32 %v5263_v45, %v6644_v53  ;;  %5212 = vmatprep.mubr.msk.bf16.mxu0 %vm1517_vm5, %v4020_v60  ;;  %v5540_v53 = vld [vmem:[%s6753_s0 + $0x8] sm:$0xff]   ;;  %s5572_s0 = smov [#allocation3]  }
 0x2d7   :  { %v3999_v48 = vmax.f32 %v3983_v24, 0.0  ;;  %5213 = vmatmul.mubr.msk.bf16.gmra.mrb[88].mxu0 %vm1517_vm5, %v4021_v19  ;;  %v4014_v61 = vmin.f32 %v3998_v47, 6.0  ;;  %s4373_s6 = sshll.u32 %s5572_s0, 4  ;;  %s4374_s6 = int_to_ptr.vmem [resolvable:$true] %s4373_s6 }
 0x2d8   :  { %v3997_v30 = vmax.f32 %v3981_v29, 0.0  ;;  %v4012_v57 = vmin.f32 %v3996_v27, 6.0  ;;  %s5547_s8 = scalar_lea.vmem %s4374_s6, 2048  ;;  %p5552_p1 = scmp.lt.s32.totalorder %s4374_s6, %s4374_s6 }
 0x2d9   :  { %v4015_v21 = vmin.f32 %v3999_v48, 6.0  ;;  %p5548_p0 = scmp.ne.s32.totalorder %s4374_s6, %s5547_s8  ;;  %p5553_p2 = scmp.lt.s32.totalorder %s5547_s8, %s5547_s8 }
 0x2da   :  { %v4013_v25 = vmin.f32 %v3997_v30, 6.0 }
 0x2db   :  { %v4023_v22 = vpack.c.bf16 %v4015_v21, %v4014_v61  ;;  %p5554_p3 = por %p5553_p2, %p5552_p1 }
 0x2dc   :  { %v4022_v32 = vpack.c.bf16 %v4013_v25, %v4012_v57 }
 0x2dd   :  { %p5555_p4 = pnand %p5554_p3, %p5548_p0 }
 0x2de   :  { %5216 = vmatprep.mubr.msk.bf16.mxu0 %vm1517_vm5, %v4022_v32 }
 0x2df   :  { %5217 = vmatmul.mubr.msk.bf16.gmra.mrb[92].mxu0 %vm1517_vm5, %v4023_v22 }
 0x2e0   :  { %5228 = vmatprep.mubr.msk.bf16.mxu0 %vm297_vm0, %v5539_v39 }
 0x2e7   :  { %5229 = vmatmul.mubr.msk.bf16.vlgmr.msra.gmra.mrb[80].mxu0 %vm297_vm0, %v5540_v53 }
 0x2e8   :  { %5232 = vmatprep.mubr.msk.bf16.mxu0 %vm297_vm0, %v5541_v33 }
 0x2ef   :  { %5233 = vmatmul.mubr.msk.bf16.gmra.mrb[84].mxu0 %vm297_vm0, %v5542_v3 }
 0x2f0   :  { %5236 = vmatprep.mubr.msk.bf16.mxu0 %vm297_vm0, %v5543_v9 }
 0x2f7   :  { %5237 = vmatmul.mubr.msk.bf16.gmra.mrb[88].mxu0 %vm297_vm0, %v5544_v34 }
 0x2f8   :  { %5240 = vmatprep.mubr.msk.bf16.mxu0 %vm297_vm0, %v5545_v14 }
 0x2ff   :  { %5241 = vmatmul.mubr.msk.bf16.gmra.mrb[92].mxu0 %vm297_vm0, %v5546_v35 }
 0x3ba   :  { %v5230_v38 = vpop.f32.mrb[80].mxu0 }
 0x3bb   :  { %v5264_v49 = vadd.f32 %v5230_v38, %v4712_v36  ;;  %v4241_v63 = vpop.f32.mrb[81].mxu0 }
 0x3bc   :  { %v5266_v40 = vadd.f32 %v4712_v36, %v4241_v63  ;;  %v5231_v16 = vpop.f32.mrb[82].mxu0 }
 0x3bd   :  { %v5265_v23 = vadd.f32 %v5264_v49, %v4723_v37  ;;  %v5269_v13 = vadd.f32 %v6725_v5, %v5231_v16  ;;  %v4244_v56 = vpop.f32.mrb[83].mxu0 }
 0x3be   :  { %v5267_v6 = vadd.f32 %v5266_v40, %v4723_v37  ;;  %v5271_v43 = vadd.f32 %v6725_v5, %v4244_v56 }
 0x3bf   :  { %v4322_v50 = vmax.f32 %v5265_v23, 0.0  ;;  %v4323_v31 = vmax.f32 %v5269_v13, 0.0 }
 0x3c0   :  { %v4320_v2 = vmax.f32 %v5267_v6, 0.0  ;;  %v4321_v26 = vmax.f32 %v5271_v43, 0.0 }
 0x3c1   :  { %v4338_v41 = vmin.f32 %v4322_v50, 6.0  ;;  %v4339_v42 = vmin.f32 %v4323_v31, 6.0 }
 0x3c2   :  { %v4336_v11 = vmin.f32 %v4320_v2, 6.0  ;;  %v4337_v51 = vmin.f32 %v4321_v26, 6.0  ;;  %v5234_v52 = vpop.f32.mrb[84].mxu0 }
 0x3c3   :  { %4354 = vst [vmem:[#allocation3 + $0x10] sm:$0xff] %v4338_v41  ;;  %4355 = vst [vmem:[#allocation3 + $0x18] sm:$0xff] %v4339_v42  ;;  %v5273_v54 = vadd.f32 %v6725_v5, %v5234_v52  ;;  %v4257_v44 = vpop.f32.mrb[85].mxu0 }
 0x3c4   :  { %4352 = vst [vmem:[#allocation3] sm:$0xff] %v4336_v11  ;;  %4353 = vst [vmem:[#allocation3 + $0x8] sm:$0xff] %v4337_v51  ;;  %v5275_v8 = vadd.f32 %v6725_v5, %v4257_v44  ;;  %v5235_v59 = vpop.f32.mrb[86].mxu0 }
 0x3c5   :  { %v4326_v46 = vmax.f32 %v5273_v54, 0.0  ;;  %v5277_v4 = vadd.f32 %v6725_v5, %v5235_v59  ;;  %v4260_v12 = vpop.f32.mrb[87].mxu0 }
 0x3c6   :  { %v4324_v17 = vmax.f32 %v5275_v8, 0.0  ;;  %v5279_v55 = vadd.f32 %v6725_v5, %v4260_v12 }
 0x3c7   :  { %v4342_v62 = vmin.f32 %v4326_v46, 6.0  ;;  %v4327_v1 = vmax.f32 %v5277_v4, 0.0 }
 0x3c8   :  { %v4340_v58 = vmin.f32 %v4324_v17, 6.0  ;;  %v4325_v7 = vmax.f32 %v5279_v55, 0.0 }
 0x3c9   :  { %4358 = vst [vmem:[#allocation3 + $0x30] sm:$0xff] %v4342_v62  ;;  %v4343_v18 = vmin.f32 %v4327_v1, 6.0 }
 0x3ca   :  { %4356 = vst [vmem:[#allocation3 + $0x20] sm:$0xff] %v4340_v58  ;;  %v4341_v15 = vmin.f32 %v4325_v7, 6.0  ;;  %v5238_v19 = vpop.f32.mrb[88].mxu0 }
 0x3cb   :  { %4359 = vst [vmem:[#allocation3 + $0x38] sm:$0xff] %v4343_v18  ;;  %v5281_v20 = vadd.f32 %v6725_v5, %v5238_v19  ;;  %v4273_v0 = vpop.f32.mrb[89].mxu0 }
 0x3cc   :  { %4357 = vst [vmem:[#allocation3 + $0x28] sm:$0xff] %v4341_v15  ;;  %v5283_v28 = vadd.f32 %v6725_v5, %v4273_v0  ;;  %v5239_v60 = vpop.f32.mrb[90].mxu0 }
 0x3cd   :  { %v4330_v10 = vmax.f32 %v5281_v20, 0.0  ;;  %v5285_v45 = vadd.f32 %v6725_v5, %v5239_v60  ;;  %v4276_v47 = vpop.f32.mrb[91].mxu0 }
 0x3ce   :  { %v4328_v24 = vmax.f32 %v5283_v28, 0.0  ;;  %v5287_v27 = vadd.f32 %v6725_v5, %v4276_v47 }
 0x3cf   :  { %v4346_v29 = vmin.f32 %v4330_v10, 6.0  ;;  %v4331_v48 = vmax.f32 %v5285_v45, 0.0 }
 0x3d0   :  { %v4344_v30 = vmin.f32 %v4328_v24, 6.0  ;;  %v4329_v61 = vmax.f32 %v5287_v27, 0.0 }
 0x3d1   :  { %4362 = vst [vmem:[#allocation3 + $0x50] sm:$0xff] %v4346_v29  ;;  %v4347_v21 = vmin.f32 %v4331_v48, 6.0 }
 0x3d2   :  { %4360 = vst [vmem:[#allocation3 + $0x40] sm:$0xff] %v4344_v30  ;;  %v4345_v57 = vmin.f32 %v4329_v61, 6.0  ;;  %v5242_v25 = vpop.f32.mrb[92].mxu0 }
 0x3d3   :  { %4363 = vst [vmem:[#allocation3 + $0x58] sm:$0xff] %v4347_v21  ;;  %v5289_v22 = vadd.f32 %v6725_v5, %v5242_v25  ;;  %v4289_v32 = vpop.f32.mrb[93].mxu0 }
 0x3d4   :  { %4361 = vst [vmem:[#allocation3 + $0x48] sm:$0xff] %v4345_v57  ;;  %v5291_v39 = vadd.f32 %v6725_v5, %v4289_v32  ;;  %v5243_v53 = vpop.f32.mrb[94].mxu0 }
 0x3d5   :  { %v4334_v33 = vmax.f32 %v5289_v22, 0.0  ;;  %v5293_v3 = vadd.f32 %v6725_v5, %v5243_v53  ;;  %v4292_v9 = vpop.f32.mrb[95].mxu0 }
 0x3d6   :  { %v4332_v34 = vmax.f32 %v5291_v39, 0.0  ;;  %v5295_v14 = vadd.f32 %v6725_v5, %v4292_v9 }
 0x3d7   :  { %v4350_v35 = vmin.f32 %v4334_v33, 6.0  ;;  %v4335_v36 = vmax.f32 %v5293_v3, 0.0 }
 0x3d8   :  { %v4348_v37 = vmin.f32 %v4332_v34, 6.0  ;;  %v4333_v38 = vmax.f32 %v5295_v14, 0.0 }
 0x3d9   :  { %4366 = vst [vmem:[#allocation3 + $0x70] sm:$0xff] %v4350_v35  ;;  %v4351_v49 = vmin.f32 %v4335_v36, 6.0 }
 0x3da   :  { %4364 = vst [vmem:[#allocation3 + $0x60] sm:$0xff] %v4348_v37  ;;  %v4349_v63 = vmin.f32 %v4333_v38, 6.0 }
 0x3db   :  { %4367 = vst [vmem:[#allocation3 + $0x78] sm:$0xff] %v4351_v49 }
 0x3dc   :  { %4365 = vst [vmem:[#allocation3 + $0x68] sm:$0xff] %v4349_v63 }
 0x3dd   :  { %5558 = shalt.err (!%p5555_p4)
}
 0x3de   :  { %s5559_s5 = scalar_lea.hbm %s6762_s9, 2048 }
 0x3df   :  { %p5560_p5 = scmp.ne.s32.totalorder %s6762_s9, %s5559_s5  ;;  %p5563_p6 = scmp.lt.u32.totalorder %s5559_s5, %s6762_s9 }
 0x3e1   :  { %p5565_p7 = pnand %p5563_p6, %p5560_p5 }
 0x3e3   :  { %5568 = shalt.err (!%p5565_p7)
}
 0x3e4   :  { %s5573_s7 = smov 128   ;;  %s5574_s24 = smov 8  }
 0x3e5   :  { %4379 = dma.vmem_to_hbm [thread:$0]  %s4374_s6, 2048, %s6762_s9, [#allocation4], %s5573_s7, %s5573_s7, %s5574_s24  }
 0x3e6   :  { %5569 = dma.done.wait [#allocation4], 2048  }
 0x3e7   :  { %5570 = vsyncadd [#allocation4], 4294965248 }
 0x3e8   :  { %4383 = vsyncpa [#allocation4], 1 }

</bundles_post_ra>
